<compile_context>
chip_gen: v6e
topology: v6e:2x2x1
jax: 0.10.0
libtpu: 0.0.40
codegen_flags: <defaults>
</compile_context>

<pallas_src>
import numpy as np

import jax
import jax.numpy as jnp
from jax.experimental import pallas as pl
from jax.experimental.pallas import tpu as pltpu

EPS = 1e-5
CPAD = 128      # lane-dense channel padding
K1 = 27         # conv1 im2col depth (3*3*3)
K1P = 32        # ... padded to a sublane-friendly size
C1 = 6          # conv1 out channels
C2 = 12         # conv2 out channels
C1P = 8         # conv2 per-tap contraction depth (6 -> 8)
NPOOL = 49      # 7*7 pooled positions
NPOOLP = 56     # ... padded to a multiple of 8


# ----------------------------------------------------------------------------
# Constant 0/1 selection matrices (pure numpy, computed once at import time).
# They let the kernel do all spatial gathers (maxpool windows, conv2 im2col)
# as small matmuls on VMEM-resident data -- no strided/gather lowering needed.
# ----------------------------------------------------------------------------
def _build_pool_selection():
    """(9, 56, 256): tap k=(kh*3+kw); row p=oh*7+ow; col r=h*16+w of y1."""
    sel = np.zeros((9, NPOOLP, 256), np.float32)
    for kh in range(3):
        for kw in range(3):
            k = kh * 3 + kw
            for oh in range(7):
                for ow in range(7):
                    h, w = 2 * oh + kh, 2 * ow + kw
                    sel[k, oh * 7 + ow, h * 16 + w] = 1.0
    return sel


def _build_conv2_selection():
    """(9, 16, 56): tap k; row q=oh*4+ow; col s=h*7+w of pooled (0-row = zero pad)."""
    sel = np.zeros((9, 16, NPOOLP), np.float32)
    for kh in range(3):
        for kw in range(3):
            k = kh * 3 + kw
            for oh in range(4):
                for ow in range(4):
                    h, w = 2 * oh + kh - 1, 2 * ow + kw - 1
                    if 0 <= h < 7 and 0 <= w < 7:
                        sel[k, oh * 4 + ow, h * 7 + w] = 1.0
    return sel


SEL_POOL = _build_pool_selection()       # (9, 56, 256)
SEL_CONV2 = _build_conv2_selection()     # (9, 16, 56)


# ----------------------------------------------------------------------------
# The fused kernel
# ----------------------------------------------------------------------------
def fused_cnn_kernel(p1_ref, w1_ref, g1_ref, b1_ref,
                     selp_ref, selc_ref, w2_ref, g2_ref, b2_ref,
                     o_ref):
    """Whole CNN_Base forward on VMEM-resident, lane-dense (128-wide) slabs.

    p1_ref  : (B*256, 32)  conv1 im2col patches (K zero-padded 27->32)
    w1_ref  : (32, 128)    conv1 weight, channels zero-padded 6->128
    g1_ref  : (1, 128)     BN1 gamma (zero-padded)
    b1_ref  : (1, 128)     BN1 beta  (zero-padded)
    selp_ref: (9, 56, 256) maxpool window gather matrices (0/1)
    selc_ref: (9, 16, 56)  conv2 tap gather matrices (0/1; zero row = zero pad)
    w2_ref  : (9, 8, 128)  conv2 per-tap weight (ci padded 6->8, co 12->128)
    g2_ref  : (1, 128)     BN2 gamma (zero-padded)
    b2_ref  : (1, 128)     BN2 beta  (zero-padded)
    o_ref   : (B*16, 128)  ReLU(BN2(conv2)) output, rows = (b, oh, ow)

    Conv biases are omitted: with train-mode BN they cancel exactly.
    Padded channels stay exactly 0 end-to-end (weights/gamma/beta padded with 0).
    """
    batch = o_ref.shape[0] // 16

    # ---- Conv1 (im2col matmul) + BN1(train, biased var) + ReLU -------------
    z1 = jnp.dot(p1_ref[...], w1_ref[...], preferred_element_type=jnp.float32)
    mu1 = jnp.mean(z1, axis=0, keepdims=True)
    var1 = jnp.mean((z1 - mu1) ** 2, axis=0, keepdims=True)
    y1 = jnp.maximum(
        (z1 - mu1) * jax.lax.rsqrt(var1 + EPS) * g1_ref[...] + b1_ref[...], 0.0)
    # y1: (B*256, 128), rows ordered (b, h, w), real channels in lanes 0..5.

    # ---- MaxPool(3, s=2) + Conv2 taps, per batch element (B small/static) --
    z2_parts = []
    for b in range(batch):
        y1_b = y1[b * 256:(b + 1) * 256, :]                       # (256, 128)

        # MaxPool: 9 window-gather matmuls + running elementwise max.
        pooled = None
        for k in range(9):
            g = jnp.dot(selp_ref[k], y1_b,
                        preferred_element_type=jnp.float32)       # (56, 128)
            pooled = g if pooled is None else jnp.maximum(pooled, g)

        # Conv2 (3x3, s=2, p=1) as a sum of 9 gathered taps.
        z2_b = None
        for k in range(9):
            gk = jnp.dot(selc_ref[k], pooled,
                         preferred_element_type=jnp.float32)      # (16, 128)
            t = jnp.dot(gk[:, :C1P], w2_ref[k],
                        preferred_element_type=jnp.float32)       # (16, 128)
            z2_b = t if z2_b is None else z2_b + t
        z2_parts.append(z2_b)

    z2 = jnp.concatenate(z2_parts, axis=0) if batch > 1 else z2_parts[0]

    # ---- BN2(train) + ReLU, lane-dense store --------------------------------
    mu2 = jnp.mean(z2, axis=0, keepdims=True)
    var2 = jnp.mean((z2 - mu2) ** 2, axis=0, keepdims=True)
    o_ref[...] = jnp.maximum(
        (z2 - mu2) * jax.lax.rsqrt(var2 + EPS) * g2_ref[...] + b2_ref[...], 0.0)


# ----------------------------------------------------------------------------
# Wrapper: layout plumbing + single pallas_call
# ----------------------------------------------------------------------------
def _im2col_conv1(x_nhwc):
    """3x3/s2/p1 patches for conv1. (B,32,32,3) -> (B*256, 32), K zero-padded."""
    B = x_nhwc.shape[0]
    xp = jnp.pad(x_nhwc, ((0, 0), (1, 1), (1, 1), (0, 0)))       # (B,34,34,3)
    cols = [xp[:, kh:kh + 32:2, kw:kw + 32:2, :]                 # (B,16,16,3)
            for kh in range(3) for kw in range(3)]
    patches = jnp.stack(cols, axis=3).reshape(B * 256, K1)       # (kh,kw,ci) order
    return jnp.pad(patches, ((0, 0), (0, K1P - K1)))


def _prep_params(p):
    """Flatten / zero-pad weights and BN params to lane-dense shapes."""
    w1 = jnp.transpose(p["w1"], (2, 3, 1, 0)).reshape(K1, C1)            # (27, 6)
    w1p = jnp.pad(w1, ((0, K1P - K1), (0, CPAD - C1)))                   # (32, 128)
    g1p = jnp.pad(p["g1"].reshape(1, C1), ((0, 0), (0, CPAD - C1)))
    b1p = jnp.pad(p["be1"].reshape(1, C1), ((0, 0), (0, CPAD - C1)))

    w2 = jnp.transpose(p["w2"], (2, 3, 1, 0)).reshape(9, C1, C2)         # (9, 6, 12)
    w2p = jnp.pad(w2, ((0, 0), (0, C1P - C1), (0, CPAD - C2)))           # (9, 8, 128)
    g2p = jnp.pad(p["g2"].reshape(1, C2), ((0, 0), (0, CPAD - C2)))
    b2p = jnp.pad(p["be2"].reshape(1, C2), ((0, 0), (0, CPAD - C2)))
    # p["b1"], p["b2"] (conv biases) cancel exactly under train-mode BN.
    return w1p, g1p, b1p, w2p, g2p, b2p


def fused_forward(patches1, w1p, g1p, b1p, w2p, g2p, b2p, batch):
    M1, M2 = batch * 256, batch * 16
    grid_spec = pltpu.PrefetchScalarGridSpec(
        num_scalar_prefetch=0,
        grid=(1,),
        in_specs=[
            pl.BlockSpec((M1, K1P), lambda i: (0, 0)),
            pl.BlockSpec((K1P, CPAD), lambda i: (0, 0)),
            pl.BlockSpec((1, CPAD), lambda i: (0, 0)),
            pl.BlockSpec((1, CPAD), lambda i: (0, 0)),
            pl.BlockSpec((9, NPOOLP, 256), lambda i: (0, 0, 0)),
            pl.BlockSpec((9, 16, NPOOLP), lambda i: (0, 0, 0)),
            pl.BlockSpec((9, C1P, CPAD), lambda i: (0, 0, 0)),
            pl.BlockSpec((1, CPAD), lambda i: (0, 0)),
            pl.BlockSpec((1, CPAD), lambda i: (0, 0)),
        ],
        out_specs=pl.BlockSpec((M2, CPAD), lambda i: (0, 0)),
    )
    return pl.pallas_call(
        fused_cnn_kernel,
        out_shape=jax.ShapeDtypeStruct((M2, CPAD), jnp.float32),
        grid_spec=grid_spec,
        compiler_params=pltpu.CompilerParams(
            dimension_semantics=("arbitrary",)),
    )(patches1, w1p, g1p, b1p,
      jnp.asarray(SEL_POOL), jnp.asarray(SEL_CONV2), w2p, g2p, b2p)


def cnn_base_forward(x_nchw, p):
    """x_nchw: (B, 3, 32, 32) float32 -> (B, 192) float32 (train-mode BN)."""
    B = x_nchw.shape[0]
    x = jnp.transpose(x_nchw, (0, 2, 3, 1))                      # NHWC
    patches1 = _im2col_conv1(x)                                  # (B*256, 32)
    w1p, g1p, b1p, w2p, g2p, b2p = _prep_params(p)
    out = fused_forward(patches1, w1p, g1p, b1p, w2p, g2p, b2p, B)   # (B*16, 128)
    # Reproduce PyTorch's view(-1, 12*4*4) on NCHW.
    y = out[:, :C2].reshape(B, 4, 4, C2)                         # (B, 4, 4, 12)
    y = jnp.transpose(y, (0, 3, 1, 2))                           # (B, 12, 4, 4)
    return y.reshape(B, C2 * 4 * 4)


# ----------------------------------------------------------------------------
# Deterministic parameters (shapes mirror CNN_Base.__init__)
# ----------------------------------------------------------------------------
def init_params(key):
    ks = jax.random.split(key, 8)
    p = {}
    p["w1"] = 0.1 * jax.random.normal(ks[0], (6, 3, 3, 3), jnp.float32)   # Conv2d(3,6)
    p["b1"] = 0.1 * jax.random.normal(ks[1], (6,), jnp.float32)           # (cancels in BN)
    p["g1"] = 1.0 + 0.1 * jax.random.normal(ks[2], (6,), jnp.float32)     # BN2d(6)
    p["be1"] = 0.1 * jax.random.normal(ks[3], (6,), jnp.float32)
    p["w2"] = 0.1 * jax.random.normal(ks[4], (12, 6, 3, 3), jnp.float32)  # Conv2d(6,12)
    p["b2"] = 0.1 * jax.random.normal(ks[5], (12,), jnp.float32)          # (cancels in BN)
    p["g2"] = 1.0 + 0.1 * jax.random.normal(ks[6], (12,), jnp.float32)    # BN2d(12)
    p["be2"] = 0.1 * jax.random.normal(ks[7], (12,), jnp.float32)
    return p


if __name__ == "__main__":
    key = jax.random.PRNGKey(0)
    k_x, k_p = jax.random.split(key)
    # Input must be 32x32 (forced by the view(-1, 12*4*4) in the reference model).
    x = jax.random.normal(k_x, (2, 3, 32, 32), jnp.float32)
    params = init_params(k_p)

    out = jax.block_until_ready(jax.jit(cnn_base_forward)(x, params))
    assert out.shape == (2, 192), out.shape
    assert bool(jnp.all(jnp.isfinite(out)))
    print("KERNEL_OK")
</pallas_src>

<mosaic_0001>
module attributes {stable_mosaic.version = 11 : i64} {
  func.func @fused_cnn_kernel(%arg0: i32, %arg1: memref<512x32xf32, #tpu.memory_space<vmem>>, %arg2: memref<32x128xf32, #tpu.memory_space<vmem>>, %arg3: memref<1x128xf32, #tpu.memory_space<vmem>>, %arg4: memref<1x128xf32, #tpu.memory_space<vmem>>, %arg5: memref<9x56x256xf32, #tpu.memory_space<vmem>>, %arg6: memref<9x16x56xf32, #tpu.memory_space<vmem>>, %arg7: memref<9x8x128xf32, #tpu.memory_space<vmem>>, %arg8: memref<1x128xf32, #tpu.memory_space<vmem>>, %arg9: memref<1x128xf32, #tpu.memory_space<vmem>>, %arg10: memref<32x128xf32, #tpu.memory_space<vmem>>) attributes {dimension_semantics = [#tpu.dimension_semantics<arbitrary>], iteration_bounds = array<i64: 1>, scalar_prefetch = 0 : i64, scratch_operands = 0 : i64, tpu.core_type = #tpu.core_type<tc>, window_params = [{pipeline_mode = #tpu.pipeline_mode<synchronous>, transform_indices = @transform_0, window_bounds = array<i64: 512, 32>}, {pipeline_mode = #tpu.pipeline_mode<synchronous>, transform_indices = @transform_1, window_bounds = array<i64: 32, 128>}, {pipeline_mode = #tpu.pipeline_mode<synchronous>, transform_indices = @transform_2, window_bounds = array<i64: 1, 128>}, {pipeline_mode = #tpu.pipeline_mode<synchronous>, transform_indices = @transform_3, window_bounds = array<i64: 1, 128>}, {pipeline_mode = #tpu.pipeline_mode<synchronous>, transform_indices = @transform_4, window_bounds = array<i64: 9, 56, 256>}, {pipeline_mode = #tpu.pipeline_mode<synchronous>, transform_indices = @transform_5, window_bounds = array<i64: 9, 16, 56>}, {pipeline_mode = #tpu.pipeline_mode<synchronous>, transform_indices = @transform_6, window_bounds = array<i64: 9, 8, 128>}, {pipeline_mode = #tpu.pipeline_mode<synchronous>, transform_indices = @transform_7, window_bounds = array<i64: 1, 128>}, {pipeline_mode = #tpu.pipeline_mode<synchronous>, transform_indices = @transform_8, window_bounds = array<i64: 1, 128>}, {pipeline_mode = #tpu.pipeline_mode<synchronous>, transform_indices = @transform_9, window_bounds = array<i64: 32, 128>}]} {
    %c0 = arith.constant 0 : index
    %c0_0 = arith.constant 0 : index
    %0 = vector.load %arg1[%c0, %c0_0] : memref<512x32xf32, #tpu.memory_space<vmem>>, vector<512x32xf32>
    %c0_1 = arith.constant 0 : index
    %c0_2 = arith.constant 0 : index
    %1 = vector.load %arg2[%c0_1, %c0_2] : memref<32x128xf32, #tpu.memory_space<vmem>>, vector<32x128xf32>
    %cst = arith.constant dense<0.000000e+00> : vector<512x128xf32>
    %2 = tpu.matmul %0, %1, %cst {dimension_numbers = #tpu.dot_dimension_numbers<[1], [0], [0], [1], [0, 0, 1, 1], [], []>} : vector<512x32xf32>, vector<32x128xf32>, vector<512x128xf32> -> vector<512x128xf32>
    %cst_3 = arith.constant dense<0.000000e+00> : vector<128xf32>
    %3 = vector.multi_reduction <add>, %2, %cst_3 [0] : vector<512x128xf32> to vector<128xf32>
    %4 = vector.shape_cast %3 : vector<128xf32> to vector<1x128xf32>
    %cst_4 = arith.constant 5.120000e+02 : f32
    %5 = vector.broadcast %cst_4 : f32 to vector<1x128xf32>
    %6 = arith.divf %4, %5 : vector<1x128xf32>
    %7 = vector.broadcast %6 : vector<1x128xf32> to vector<512x128xf32>
    %8 = arith.subf %2, %7 : vector<512x128xf32>
    %9 = arith.mulf %8, %8 : vector<512x128xf32>
    %cst_5 = arith.constant dense<0.000000e+00> : vector<128xf32>
    %10 = vector.multi_reduction <add>, %9, %cst_5 [0] : vector<512x128xf32> to vector<128xf32>
    %11 = vector.shape_cast %10 : vector<128xf32> to vector<1x128xf32>
    %cst_6 = arith.constant 5.120000e+02 : f32
    %12 = vector.broadcast %cst_6 : f32 to vector<1x128xf32>
    %13 = arith.divf %11, %12 : vector<1x128xf32>
    %14 = vector.broadcast %6 : vector<1x128xf32> to vector<512x128xf32>
    %15 = arith.subf %2, %14 : vector<512x128xf32>
    %cst_7 = arith.constant 9.99999974E-6 : f32
    %16 = vector.broadcast %cst_7 : f32 to vector<1x128xf32>
    %17 = arith.addf %13, %16 : vector<1x128xf32>
    %18 = math.rsqrt %17 : vector<1x128xf32>
    %19 = vector.broadcast %18 : vector<1x128xf32> to vector<512x128xf32>
    %20 = arith.mulf %15, %19 : vector<512x128xf32>
    %c0_8 = arith.constant 0 : index
    %c0_9 = arith.constant 0 : index
    %21 = vector.load %arg3[%c0_8, %c0_9] : memref<1x128xf32, #tpu.memory_space<vmem>>, vector<1x128xf32>
    %22 = vector.broadcast %21 : vector<1x128xf32> to vector<512x128xf32>
    %23 = arith.mulf %20, %22 : vector<512x128xf32>
    %c0_10 = arith.constant 0 : index
    %c0_11 = arith.constant 0 : index
    %24 = vector.load %arg4[%c0_10, %c0_11] : memref<1x128xf32, #tpu.memory_space<vmem>>, vector<1x128xf32>
    %25 = vector.broadcast %24 : vector<1x128xf32> to vector<512x128xf32>
    %26 = arith.addf %23, %25 : vector<512x128xf32>
    %cst_12 = arith.constant 0.000000e+00 : f32
    %27 = vector.broadcast %cst_12 : f32 to vector<512x128xf32>
    %28 = arith.maximumf %26, %27 : vector<512x128xf32>
    %29 = vector.extract_strided_slice %28 {offsets = [0, 0], sizes = [256, 128], strides = [1, 1]} : vector<512x128xf32> to vector<256x128xf32>
    %c0_13 = arith.constant 0 : index
    %c0_14 = arith.constant 0 : index
    %c0_15 = arith.constant 0 : index
    %30 = vector.load %arg5[%c0_13, %c0_14, %c0_15] : memref<9x56x256xf32, #tpu.memory_space<vmem>>, vector<1x56x256xf32>
    %31 = vector.shape_cast %30 : vector<1x56x256xf32> to vector<56x256xf32>
    %cst_16 = arith.constant dense<0.000000e+00> : vector<56x128xf32>
    %32 = tpu.matmul %31, %29, %cst_16 {dimension_numbers = #tpu.dot_dimension_numbers<[1], [0], [0], [1], [0, 0, 1, 1], [], []>} : vector<56x256xf32>, vector<256x128xf32>, vector<56x128xf32> -> vector<56x128xf32>
    %c1 = arith.constant 1 : index
    %c0_17 = arith.constant 0 : index
    %c0_18 = arith.constant 0 : index
    %33 = vector.load %arg5[%c1, %c0_17, %c0_18] : memref<9x56x256xf32, #tpu.memory_space<vmem>>, vector<1x56x256xf32>
    %34 = vector.shape_cast %33 : vector<1x56x256xf32> to vector<56x256xf32>
    %cst_19 = arith.constant dense<0.000000e+00> : vector<56x128xf32>
    %35 = tpu.matmul %34, %29, %cst_19 {dimension_numbers = #tpu.dot_dimension_numbers<[1], [0], [0], [1], [0, 0, 1, 1], [], []>} : vector<56x256xf32>, vector<256x128xf32>, vector<56x128xf32> -> vector<56x128xf32>
    %36 = arith.maximumf %32, %35 : vector<56x128xf32>
    %c2 = arith.constant 2 : index
    %c0_20 = arith.constant 0 : index
    %c0_21 = arith.constant 0 : index
    %37 = vector.load %arg5[%c2, %c0_20, %c0_21] : memref<9x56x256xf32, #tpu.memory_space<vmem>>, vector<1x56x256xf32>
    %38 = vector.shape_cast %37 : vector<1x56x256xf32> to vector<56x256xf32>
    %cst_22 = arith.constant dense<0.000000e+00> : vector<56x128xf32>
    %39 = tpu.matmul %38, %29, %cst_22 {dimension_numbers = #tpu.dot_dimension_numbers<[1], [0], [0], [1], [0, 0, 1, 1], [], []>} : vector<56x256xf32>, vector<256x128xf32>, vector<56x128xf32> -> vector<56x128xf32>
    %40 = arith.maximumf %36, %39 : vector<56x128xf32>
    %c3 = arith.constant 3 : index
    %c0_23 = arith.constant 0 : index
    %c0_24 = arith.constant 0 : index
    %41 = vector.load %arg5[%c3, %c0_23, %c0_24] : memref<9x56x256xf32, #tpu.memory_space<vmem>>, vector<1x56x256xf32>
    %42 = vector.shape_cast %41 : vector<1x56x256xf32> to vector<56x256xf32>
    %cst_25 = arith.constant dense<0.000000e+00> : vector<56x128xf32>
    %43 = tpu.matmul %42, %29, %cst_25 {dimension_numbers = #tpu.dot_dimension_numbers<[1], [0], [0], [1], [0, 0, 1, 1], [], []>} : vector<56x256xf32>, vector<256x128xf32>, vector<56x128xf32> -> vector<56x128xf32>
    %44 = arith.maximumf %40, %43 : vector<56x128xf32>
    %c4 = arith.constant 4 : index
    %c0_26 = arith.constant 0 : index
    %c0_27 = arith.constant 0 : index
    %45 = vector.load %arg5[%c4, %c0_26, %c0_27] : memref<9x56x256xf32, #tpu.memory_space<vmem>>, vector<1x56x256xf32>
    %46 = vector.shape_cast %45 : vector<1x56x256xf32> to vector<56x256xf32>
    %cst_28 = arith.constant dense<0.000000e+00> : vector<56x128xf32>
    %47 = tpu.matmul %46, %29, %cst_28 {dimension_numbers = #tpu.dot_dimension_numbers<[1], [0], [0], [1], [0, 0, 1, 1], [], []>} : vector<56x256xf32>, vector<256x128xf32>, vector<56x128xf32> -> vector<56x128xf32>
    %48 = arith.maximumf %44, %47 : vector<56x128xf32>
    %c5 = arith.constant 5 : index
    %c0_29 = arith.constant 0 : index
    %c0_30 = arith.constant 0 : index
    %49 = vector.load %arg5[%c5, %c0_29, %c0_30] : memref<9x56x256xf32, #tpu.memory_space<vmem>>, vector<1x56x256xf32>
    %50 = vector.shape_cast %49 : vector<1x56x256xf32> to vector<56x256xf32>
    %cst_31 = arith.constant dense<0.000000e+00> : vector<56x128xf32>
    %51 = tpu.matmul %50, %29, %cst_31 {dimension_numbers = #tpu.dot_dimension_numbers<[1], [0], [0], [1], [0, 0, 1, 1], [], []>} : vector<56x256xf32>, vector<256x128xf32>, vector<56x128xf32> -> vector<56x128xf32>
    %52 = arith.maximumf %48, %51 : vector<56x128xf32>
    %c6 = arith.constant 6 : index
    %c0_32 = arith.constant 0 : index
    %c0_33 = arith.constant 0 : index
    %53 = vector.load %arg5[%c6, %c0_32, %c0_33] : memref<9x56x256xf32, #tpu.memory_space<vmem>>, vector<1x56x256xf32>
    %54 = vector.shape_cast %53 : vector<1x56x256xf32> to vector<56x256xf32>
    %cst_34 = arith.constant dense<0.000000e+00> : vector<56x128xf32>
    %55 = tpu.matmul %54, %29, %cst_34 {dimension_numbers = #tpu.dot_dimension_numbers<[1], [0], [0], [1], [0, 0, 1, 1], [], []>} : vector<56x256xf32>, vector<256x128xf32>, vector<56x128xf32> -> vector<56x128xf32>
    %56 = arith.maximumf %52, %55 : vector<56x128xf32>
    %c7 = arith.constant 7 : index
    %c0_35 = arith.constant 0 : index
    %c0_36 = arith.constant 0 : index
    %57 = vector.load %arg5[%c7, %c0_35, %c0_36] : memref<9x56x256xf32, #tpu.memory_space<vmem>>, vector<1x56x256xf32>
    %58 = vector.shape_cast %57 : vector<1x56x256xf32> to vector<56x256xf32>
    %cst_37 = arith.constant dense<0.000000e+00> : vector<56x128xf32>
    %59 = tpu.matmul %58, %29, %cst_37 {dimension_numbers = #tpu.dot_dimension_numbers<[1], [0], [0], [1], [0, 0, 1, 1], [], []>} : vector<56x256xf32>, vector<256x128xf32>, vector<56x128xf32> -> vector<56x128xf32>
    %60 = arith.maximumf %56, %59 : vector<56x128xf32>
    %c8 = arith.constant 8 : index
    %c0_38 = arith.constant 0 : index
    %c0_39 = arith.constant 0 : index
    %61 = vector.load %arg5[%c8, %c0_38, %c0_39] : memref<9x56x256xf32, #tpu.memory_space<vmem>>, vector<1x56x256xf32>
    %62 = vector.shape_cast %61 : vector<1x56x256xf32> to vector<56x256xf32>
    %cst_40 = arith.constant dense<0.000000e+00> : vector<56x128xf32>
    %63 = tpu.matmul %62, %29, %cst_40 {dimension_numbers = #tpu.dot_dimension_numbers<[1], [0], [0], [1], [0, 0, 1, 1], [], []>} : vector<56x256xf32>, vector<256x128xf32>, vector<56x128xf32> -> vector<56x128xf32>
    %64 = arith.maximumf %60, %63 : vector<56x128xf32>
    %c0_41 = arith.constant 0 : index
    %c0_42 = arith.constant 0 : index
    %c0_43 = arith.constant 0 : index
    %65 = vector.load %arg6[%c0_41, %c0_42, %c0_43] : memref<9x16x56xf32, #tpu.memory_space<vmem>>, vector<1x16x56xf32>
    %66 = vector.shape_cast %65 : vector<1x16x56xf32> to vector<16x56xf32>
    %cst_44 = arith.constant dense<0.000000e+00> : vector<16x128xf32>
    %67 = tpu.matmul %66, %64, %cst_44 {dimension_numbers = #tpu.dot_dimension_numbers<[1], [0], [0], [1], [0, 0, 1, 1], [], []>} : vector<16x56xf32>, vector<56x128xf32>, vector<16x128xf32> -> vector<16x128xf32>
    %68 = vector.extract_strided_slice %67 {offsets = [0, 0], sizes = [16, 8], strides = [1, 1]} : vector<16x128xf32> to vector<16x8xf32>
    %c0_45 = arith.constant 0 : index
    %c0_46 = arith.constant 0 : index
    %c0_47 = arith.constant 0 : index
    %69 = vector.load %arg7[%c0_45, %c0_46, %c0_47] : memref<9x8x128xf32, #tpu.memory_space<vmem>>, vector<1x8x128xf32>
    %70 = vector.shape_cast %69 : vector<1x8x128xf32> to vector<8x128xf32>
    %cst_48 = arith.constant dense<0.000000e+00> : vector<16x128xf32>
    %71 = tpu.matmul %68, %70, %cst_48 {dimension_numbers = #tpu.dot_dimension_numbers<[1], [0], [0], [1], [0, 0, 1, 1], [], []>} : vector<16x8xf32>, vector<8x128xf32>, vector<16x128xf32> -> vector<16x128xf32>
    %c1_49 = arith.constant 1 : index
    %c0_50 = arith.constant 0 : index
    %c0_51 = arith.constant 0 : index
    %72 = vector.load %arg6[%c1_49, %c0_50, %c0_51] : memref<9x16x56xf32, #tpu.memory_space<vmem>>, vector<1x16x56xf32>
    %73 = vector.shape_cast %72 : vector<1x16x56xf32> to vector<16x56xf32>
    %cst_52 = arith.constant dense<0.000000e+00> : vector<16x128xf32>
    %74 = tpu.matmul %73, %64, %cst_52 {dimension_numbers = #tpu.dot_dimension_numbers<[1], [0], [0], [1], [0, 0, 1, 1], [], []>} : vector<16x56xf32>, vector<56x128xf32>, vector<16x128xf32> -> vector<16x128xf32>
    %75 = vector.extract_strided_slice %74 {offsets = [0, 0], sizes = [16, 8], strides = [1, 1]} : vector<16x128xf32> to vector<16x8xf32>
    %c1_53 = arith.constant 1 : index
    %c0_54 = arith.constant 0 : index
    %c0_55 = arith.constant 0 : index
    %76 = vector.load %arg7[%c1_53, %c0_54, %c0_55] : memref<9x8x128xf32, #tpu.memory_space<vmem>>, vector<1x8x128xf32>
    %77 = vector.shape_cast %76 : vector<1x8x128xf32> to vector<8x128xf32>
    %cst_56 = arith.constant dense<0.000000e+00> : vector<16x128xf32>
    %78 = tpu.matmul %75, %77, %cst_56 {dimension_numbers = #tpu.dot_dimension_numbers<[1], [0], [0], [1], [0, 0, 1, 1], [], []>} : vector<16x8xf32>, vector<8x128xf32>, vector<16x128xf32> -> vector<16x128xf32>
    %79 = arith.addf %71, %78 : vector<16x128xf32>
    %c2_57 = arith.constant 2 : index
    %c0_58 = arith.constant 0 : index
    %c0_59 = arith.constant 0 : index
    %80 = vector.load %arg6[%c2_57, %c0_58, %c0_59] : memref<9x16x56xf32, #tpu.memory_space<vmem>>, vector<1x16x56xf32>
    %81 = vector.shape_cast %80 : vector<1x16x56xf32> to vector<16x56xf32>
    %cst_60 = arith.constant dense<0.000000e+00> : vector<16x128xf32>
    %82 = tpu.matmul %81, %64, %cst_60 {dimension_numbers = #tpu.dot_dimension_numbers<[1], [0], [0], [1], [0, 0, 1, 1], [], []>} : vector<16x56xf32>, vector<56x128xf32>, vector<16x128xf32> -> vector<16x128xf32>
    %83 = vector.extract_strided_slice %82 {offsets = [0, 0], sizes = [16, 8], strides = [1, 1]} : vector<16x128xf32> to vector<16x8xf32>
    %c2_61 = arith.constant 2 : index
    %c0_62 = arith.constant 0 : index
    %c0_63 = arith.constant 0 : index
    %84 = vector.load %arg7[%c2_61, %c0_62, %c0_63] : memref<9x8x128xf32, #tpu.memory_space<vmem>>, vector<1x8x128xf32>
    %85 = vector.shape_cast %84 : vector<1x8x128xf32> to vector<8x128xf32>
    %cst_64 = arith.constant dense<0.000000e+00> : vector<16x128xf32>
    %86 = tpu.matmul %83, %85, %cst_64 {dimension_numbers = #tpu.dot_dimension_numbers<[1], [0], [0], [1], [0, 0, 1, 1], [], []>} : vector<16x8xf32>, vector<8x128xf32>, vector<16x128xf32> -> vector<16x128xf32>
    %87 = arith.addf %79, %86 : vector<16x128xf32>
    %c3_65 = arith.constant 3 : index
    %c0_66 = arith.constant 0 : index
    %c0_67 = arith.constant 0 : index
    %88 = vector.load %arg6[%c3_65, %c0_66, %c0_67] : memref<9x16x56xf32, #tpu.memory_space<vmem>>, vector<1x16x56xf32>
    %89 = vector.shape_cast %88 : vector<1x16x56xf32> to vector<16x56xf32>
    %cst_68 = arith.constant dense<0.000000e+00> : vector<16x128xf32>
    %90 = tpu.matmul %89, %64, %cst_68 {dimension_numbers = #tpu.dot_dimension_numbers<[1], [0], [0], [1], [0, 0, 1, 1], [], []>} : vector<16x56xf32>, vector<56x128xf32>, vector<16x128xf32> -> vector<16x128xf32>
    %91 = vector.extract_strided_slice %90 {offsets = [0, 0], sizes = [16, 8], strides = [1, 1]} : vector<16x128xf32> to vector<16x8xf32>
    %c3_69 = arith.constant 3 : index
    %c0_70 = arith.constant 0 : index
    %c0_71 = arith.constant 0 : index
    %92 = vector.load %arg7[%c3_69, %c0_70, %c0_71] : memref<9x8x128xf32, #tpu.memory_space<vmem>>, vector<1x8x128xf32>
    %93 = vector.shape_cast %92 : vector<1x8x128xf32> to vector<8x128xf32>
    %cst_72 = arith.constant dense<0.000000e+00> : vector<16x128xf32>
    %94 = tpu.matmul %91, %93, %cst_72 {dimension_numbers = #tpu.dot_dimension_numbers<[1], [0], [0], [1], [0, 0, 1, 1], [], []>} : vector<16x8xf32>, vector<8x128xf32>, vector<16x128xf32> -> vector<16x128xf32>
    %95 = arith.addf %87, %94 : vector<16x128xf32>
    %c4_73 = arith.constant 4 : index
    %c0_74 = arith.constant 0 : index
    %c0_75 = arith.constant 0 : index
    %96 = vector.load %arg6[%c4_73, %c0_74, %c0_75] : memref<9x16x56xf32, #tpu.memory_space<vmem>>, vector<1x16x56xf32>
    %97 = vector.shape_cast %96 : vector<1x16x56xf32> to vector<16x56xf32>
    %cst_76 = arith.constant dense<0.000000e+00> : vector<16x128xf32>
    %98 = tpu.matmul %97, %64, %cst_76 {dimension_numbers = #tpu.dot_dimension_numbers<[1], [0], [0], [1], [0, 0, 1, 1], [], []>} : vector<16x56xf32>, vector<56x128xf32>, vector<16x128xf32> -> vector<16x128xf32>
    %99 = vector.extract_strided_slice %98 {offsets = [0, 0], sizes = [16, 8], strides = [1, 1]} : vector<16x128xf32> to vector<16x8xf32>
    %c4_77 = arith.constant 4 : index
    %c0_78 = arith.constant 0 : index
    %c0_79 = arith.constant 0 : index
    %100 = vector.load %arg7[%c4_77, %c0_78, %c0_79] : memref<9x8x128xf32, #tpu.memory_space<vmem>>, vector<1x8x128xf32>
    %101 = vector.shape_cast %100 : vector<1x8x128xf32> to vector<8x128xf32>
    %cst_80 = arith.constant dense<0.000000e+00> : vector<16x128xf32>
    %102 = tpu.matmul %99, %101, %cst_80 {dimension_numbers = #tpu.dot_dimension_numbers<[1], [0], [0], [1], [0, 0, 1, 1], [], []>} : vector<16x8xf32>, vector<8x128xf32>, vector<16x128xf32> -> vector<16x128xf32>
    %103 = arith.addf %95, %102 : vector<16x128xf32>
    %c5_81 = arith.constant 5 : index
    %c0_82 = arith.constant 0 : index
    %c0_83 = arith.constant 0 : index
    %104 = vector.load %arg6[%c5_81, %c0_82, %c0_83] : memref<9x16x56xf32, #tpu.memory_space<vmem>>, vector<1x16x56xf32>
    %105 = vector.shape_cast %104 : vector<1x16x56xf32> to vector<16x56xf32>
    %cst_84 = arith.constant dense<0.000000e+00> : vector<16x128xf32>
    %106 = tpu.matmul %105, %64, %cst_84 {dimension_numbers = #tpu.dot_dimension_numbers<[1], [0], [0], [1], [0, 0, 1, 1], [], []>} : vector<16x56xf32>, vector<56x128xf32>, vector<16x128xf32> -> vector<16x128xf32>
    %107 = vector.extract_strided_slice %106 {offsets = [0, 0], sizes = [16, 8], strides = [1, 1]} : vector<16x128xf32> to vector<16x8xf32>
    %c5_85 = arith.constant 5 : index
    %c0_86 = arith.constant 0 : index
    %c0_87 = arith.constant 0 : index
    %108 = vector.load %arg7[%c5_85, %c0_86, %c0_87] : memref<9x8x128xf32, #tpu.memory_space<vmem>>, vector<1x8x128xf32>
    %109 = vector.shape_cast %108 : vector<1x8x128xf32> to vector<8x128xf32>
    %cst_88 = arith.constant dense<0.000000e+00> : vector<16x128xf32>
    %110 = tpu.matmul %107, %109, %cst_88 {dimension_numbers = #tpu.dot_dimension_numbers<[1], [0], [0], [1], [0, 0, 1, 1], [], []>} : vector<16x8xf32>, vector<8x128xf32>, vector<16x128xf32> -> vector<16x128xf32>
    %111 = arith.addf %103, %110 : vector<16x128xf32>
    %c6_89 = arith.constant 6 : index
    %c0_90 = arith.constant 0 : index
    %c0_91 = arith.constant 0 : index
    %112 = vector.load %arg6[%c6_89, %c0_90, %c0_91] : memref<9x16x56xf32, #tpu.memory_space<vmem>>, vector<1x16x56xf32>
    %113 = vector.shape_cast %112 : vector<1x16x56xf32> to vector<16x56xf32>
    %cst_92 = arith.constant dense<0.000000e+00> : vector<16x128xf32>
    %114 = tpu.matmul %113, %64, %cst_92 {dimension_numbers = #tpu.dot_dimension_numbers<[1], [0], [0], [1], [0, 0, 1, 1], [], []>} : vector<16x56xf32>, vector<56x128xf32>, vector<16x128xf32> -> vector<16x128xf32>
    %115 = vector.extract_strided_slice %114 {offsets = [0, 0], sizes = [16, 8], strides = [1, 1]} : vector<16x128xf32> to vector<16x8xf32>
    %c6_93 = arith.constant 6 : index
    %c0_94 = arith.constant 0 : index
    %c0_95 = arith.constant 0 : index
    %116 = vector.load %arg7[%c6_93, %c0_94, %c0_95] : memref<9x8x128xf32, #tpu.memory_space<vmem>>, vector<1x8x128xf32>
    %117 = vector.shape_cast %116 : vector<1x8x128xf32> to vector<8x128xf32>
    %cst_96 = arith.constant dense<0.000000e+00> : vector<16x128xf32>
    %118 = tpu.matmul %115, %117, %cst_96 {dimension_numbers = #tpu.dot_dimension_numbers<[1], [0], [0], [1], [0, 0, 1, 1], [], []>} : vector<16x8xf32>, vector<8x128xf32>, vector<16x128xf32> -> vector<16x128xf32>
    %119 = arith.addf %111, %118 : vector<16x128xf32>
    %c7_97 = arith.constant 7 : index
    %c0_98 = arith.constant 0 : index
    %c0_99 = arith.constant 0 : index
    %120 = vector.load %arg6[%c7_97, %c0_98, %c0_99] : memref<9x16x56xf32, #tpu.memory_space<vmem>>, vector<1x16x56xf32>
    %121 = vector.shape_cast %120 : vector<1x16x56xf32> to vector<16x56xf32>
    %cst_100 = arith.constant dense<0.000000e+00> : vector<16x128xf32>
    %122 = tpu.matmul %121, %64, %cst_100 {dimension_numbers = #tpu.dot_dimension_numbers<[1], [0], [0], [1], [0, 0, 1, 1], [], []>} : vector<16x56xf32>, vector<56x128xf32>, vector<16x128xf32> -> vector<16x128xf32>
    %123 = vector.extract_strided_slice %122 {offsets = [0, 0], sizes = [16, 8], strides = [1, 1]} : vector<16x128xf32> to vector<16x8xf32>
    %c7_101 = arith.constant 7 : index
    %c0_102 = arith.constant 0 : index
    %c0_103 = arith.constant 0 : index
    %124 = vector.load %arg7[%c7_101, %c0_102, %c0_103] : memref<9x8x128xf32, #tpu.memory_space<vmem>>, vector<1x8x128xf32>
    %125 = vector.shape_cast %124 : vector<1x8x128xf32> to vector<8x128xf32>
    %cst_104 = arith.constant dense<0.000000e+00> : vector<16x128xf32>
    %126 = tpu.matmul %123, %125, %cst_104 {dimension_numbers = #tpu.dot_dimension_numbers<[1], [0], [0], [1], [0, 0, 1, 1], [], []>} : vector<16x8xf32>, vector<8x128xf32>, vector<16x128xf32> -> vector<16x128xf32>
    %127 = arith.addf %119, %126 : vector<16x128xf32>
    %c8_105 = arith.constant 8 : index
    %c0_106 = arith.constant 0 : index
    %c0_107 = arith.constant 0 : index
    %128 = vector.load %arg6[%c8_105, %c0_106, %c0_107] : memref<9x16x56xf32, #tpu.memory_space<vmem>>, vector<1x16x56xf32>
    %129 = vector.shape_cast %128 : vector<1x16x56xf32> to vector<16x56xf32>
    %cst_108 = arith.constant dense<0.000000e+00> : vector<16x128xf32>
    %130 = tpu.matmul %129, %64, %cst_108 {dimension_numbers = #tpu.dot_dimension_numbers<[1], [0], [0], [1], [0, 0, 1, 1], [], []>} : vector<16x56xf32>, vector<56x128xf32>, vector<16x128xf32> -> vector<16x128xf32>
    %131 = vector.extract_strided_slice %130 {offsets = [0, 0], sizes = [16, 8], strides = [1, 1]} : vector<16x128xf32> to vector<16x8xf32>
    %c8_109 = arith.constant 8 : index
    %c0_110 = arith.constant 0 : index
    %c0_111 = arith.constant 0 : index
    %132 = vector.load %arg7[%c8_109, %c0_110, %c0_111] : memref<9x8x128xf32, #tpu.memory_space<vmem>>, vector<1x8x128xf32>
    %133 = vector.shape_cast %132 : vector<1x8x128xf32> to vector<8x128xf32>
    %cst_112 = arith.constant dense<0.000000e+00> : vector<16x128xf32>
    %134 = tpu.matmul %131, %133, %cst_112 {dimension_numbers = #tpu.dot_dimension_numbers<[1], [0], [0], [1], [0, 0, 1, 1], [], []>} : vector<16x8xf32>, vector<8x128xf32>, vector<16x128xf32> -> vector<16x128xf32>
    %135 = arith.addf %127, %134 : vector<16x128xf32>
    %136 = vector.extract_strided_slice %28 {offsets = [256, 0], sizes = [256, 128], strides = [1, 1]} : vector<512x128xf32> to vector<256x128xf32>
    %c0_113 = arith.constant 0 : index
    %c0_114 = arith.constant 0 : index
    %c0_115 = arith.constant 0 : index
    %137 = vector.load %arg5[%c0_113, %c0_114, %c0_115] : memref<9x56x256xf32, #tpu.memory_space<vmem>>, vector<1x56x256xf32>
    %138 = vector.shape_cast %137 : vector<1x56x256xf32> to vector<56x256xf32>
    %cst_116 = arith.constant dense<0.000000e+00> : vector<56x128xf32>
    %139 = tpu.matmul %138, %136, %cst_116 {dimension_numbers = #tpu.dot_dimension_numbers<[1], [0], [0], [1], [0, 0, 1, 1], [], []>} : vector<56x256xf32>, vector<256x128xf32>, vector<56x128xf32> -> vector<56x128xf32>
    %c1_117 = arith.constant 1 : index
    %c0_118 = arith.constant 0 : index
    %c0_119 = arith.constant 0 : index
    %140 = vector.load %arg5[%c1_117, %c0_118, %c0_119] : memref<9x56x256xf32, #tpu.memory_space<vmem>>, vector<1x56x256xf32>
    %141 = vector.shape_cast %140 : vector<1x56x256xf32> to vector<56x256xf32>
    %cst_120 = arith.constant dense<0.000000e+00> : vector<56x128xf32>
    %142 = tpu.matmul %141, %136, %cst_120 {dimension_numbers = #tpu.dot_dimension_numbers<[1], [0], [0], [1], [0, 0, 1, 1], [], []>} : vector<56x256xf32>, vector<256x128xf32>, vector<56x128xf32> -> vector<56x128xf32>
    %143 = arith.maximumf %139, %142 : vector<56x128xf32>
    %c2_121 = arith.constant 2 : index
    %c0_122 = arith.constant 0 : index
    %c0_123 = arith.constant 0 : index
    %144 = vector.load %arg5[%c2_121, %c0_122, %c0_123] : memref<9x56x256xf32, #tpu.memory_space<vmem>>, vector<1x56x256xf32>
    %145 = vector.shape_cast %144 : vector<1x56x256xf32> to vector<56x256xf32>
    %cst_124 = arith.constant dense<0.000000e+00> : vector<56x128xf32>
    %146 = tpu.matmul %145, %136, %cst_124 {dimension_numbers = #tpu.dot_dimension_numbers<[1], [0], [0], [1], [0, 0, 1, 1], [], []>} : vector<56x256xf32>, vector<256x128xf32>, vector<56x128xf32> -> vector<56x128xf32>
    %147 = arith.maximumf %143, %146 : vector<56x128xf32>
    %c3_125 = arith.constant 3 : index
    %c0_126 = arith.constant 0 : index
    %c0_127 = arith.constant 0 : index
    %148 = vector.load %arg5[%c3_125, %c0_126, %c0_127] : memref<9x56x256xf32, #tpu.memory_space<vmem>>, vector<1x56x256xf32>
    %149 = vector.shape_cast %148 : vector<1x56x256xf32> to vector<56x256xf32>
    %cst_128 = arith.constant dense<0.000000e+00> : vector<56x128xf32>
    %150 = tpu.matmul %149, %136, %cst_128 {dimension_numbers = #tpu.dot_dimension_numbers<[1], [0], [0], [1], [0, 0, 1, 1], [], []>} : vector<56x256xf32>, vector<256x128xf32>, vector<56x128xf32> -> vector<56x128xf32>
    %151 = arith.maximumf %147, %150 : vector<56x128xf32>
    %c4_129 = arith.constant 4 : index
    %c0_130 = arith.constant 0 : index
    %c0_131 = arith.constant 0 : index
    %152 = vector.load %arg5[%c4_129, %c0_130, %c0_131] : memref<9x56x256xf32, #tpu.memory_space<vmem>>, vector<1x56x256xf32>
    %153 = vector.shape_cast %152 : vector<1x56x256xf32> to vector<56x256xf32>
    %cst_132 = arith.constant dense<0.000000e+00> : vector<56x128xf32>
    %154 = tpu.matmul %153, %136, %cst_132 {dimension_numbers = #tpu.dot_dimension_numbers<[1], [0], [0], [1], [0, 0, 1, 1], [], []>} : vector<56x256xf32>, vector<256x128xf32>, vector<56x128xf32> -> vector<56x128xf32>
    %155 = arith.maximumf %151, %154 : vector<56x128xf32>
    %c5_133 = arith.constant 5 : index
    %c0_134 = arith.constant 0 : index
    %c0_135 = arith.constant 0 : index
    %156 = vector.load %arg5[%c5_133, %c0_134, %c0_135] : memref<9x56x256xf32, #tpu.memory_space<vmem>>, vector<1x56x256xf32>
    %157 = vector.shape_cast %156 : vector<1x56x256xf32> to vector<56x256xf32>
    %cst_136 = arith.constant dense<0.000000e+00> : vector<56x128xf32>
    %158 = tpu.matmul %157, %136, %cst_136 {dimension_numbers = #tpu.dot_dimension_numbers<[1], [0], [0], [1], [0, 0, 1, 1], [], []>} : vector<56x256xf32>, vector<256x128xf32>, vector<56x128xf32> -> vector<56x128xf32>
    %159 = arith.maximumf %155, %158 : vector<56x128xf32>
    %c6_137 = arith.constant 6 : index
    %c0_138 = arith.constant 0 : index
    %c0_139 = arith.constant 0 : index
    %160 = vector.load %arg5[%c6_137, %c0_138, %c0_139] : memref<9x56x256xf32, #tpu.memory_space<vmem>>, vector<1x56x256xf32>
    %161 = vector.shape_cast %160 : vector<1x56x256xf32> to vector<56x256xf32>
    %cst_140 = arith.constant dense<0.000000e+00> : vector<56x128xf32>
    %162 = tpu.matmul %161, %136, %cst_140 {dimension_numbers = #tpu.dot_dimension_numbers<[1], [0], [0], [1], [0, 0, 1, 1], [], []>} : vector<56x256xf32>, vector<256x128xf32>, vector<56x128xf32> -> vector<56x128xf32>
    %163 = arith.maximumf %159, %162 : vector<56x128xf32>
    %c7_141 = arith.constant 7 : index
    %c0_142 = arith.constant 0 : index
    %c0_143 = arith.constant 0 : index
    %164 = vector.load %arg5[%c7_141, %c0_142, %c0_143] : memref<9x56x256xf32, #tpu.memory_space<vmem>>, vector<1x56x256xf32>
    %165 = vector.shape_cast %164 : vector<1x56x256xf32> to vector<56x256xf32>
    %cst_144 = arith.constant dense<0.000000e+00> : vector<56x128xf32>
    %166 = tpu.matmul %165, %136, %cst_144 {dimension_numbers = #tpu.dot_dimension_numbers<[1], [0], [0], [1], [0, 0, 1, 1], [], []>} : vector<56x256xf32>, vector<256x128xf32>, vector<56x128xf32> -> vector<56x128xf32>
    %167 = arith.maximumf %163, %166 : vector<56x128xf32>
    %c8_145 = arith.constant 8 : index
    %c0_146 = arith.constant 0 : index
    %c0_147 = arith.constant 0 : index
    %168 = vector.load %arg5[%c8_145, %c0_146, %c0_147] : memref<9x56x256xf32, #tpu.memory_space<vmem>>, vector<1x56x256xf32>
    %169 = vector.shape_cast %168 : vector<1x56x256xf32> to vector<56x256xf32>
    %cst_148 = arith.constant dense<0.000000e+00> : vector<56x128xf32>
    %170 = tpu.matmul %169, %136, %cst_148 {dimension_numbers = #tpu.dot_dimension_numbers<[1], [0], [0], [1], [0, 0, 1, 1], [], []>} : vector<56x256xf32>, vector<256x128xf32>, vector<56x128xf32> -> vector<56x128xf32>
    %171 = arith.maximumf %167, %170 : vector<56x128xf32>
    %c0_149 = arith.constant 0 : index
    %c0_150 = arith.constant 0 : index
    %c0_151 = arith.constant 0 : index
    %172 = vector.load %arg6[%c0_149, %c0_150, %c0_151] : memref<9x16x56xf32, #tpu.memory_space<vmem>>, vector<1x16x56xf32>
    %173 = vector.shape_cast %172 : vector<1x16x56xf32> to vector<16x56xf32>
    %cst_152 = arith.constant dense<0.000000e+00> : vector<16x128xf32>
    %174 = tpu.matmul %173, %171, %cst_152 {dimension_numbers = #tpu.dot_dimension_numbers<[1], [0], [0], [1], [0, 0, 1, 1], [], []>} : vector<16x56xf32>, vector<56x128xf32>, vector<16x128xf32> -> vector<16x128xf32>
    %175 = vector.extract_strided_slice %174 {offsets = [0, 0], sizes = [16, 8], strides = [1, 1]} : vector<16x128xf32> to vector<16x8xf32>
    %c0_153 = arith.constant 0 : index
    %c0_154 = arith.constant 0 : index
    %c0_155 = arith.constant 0 : index
    %176 = vector.load %arg7[%c0_153, %c0_154, %c0_155] : memref<9x8x128xf32, #tpu.memory_space<vmem>>, vector<1x8x128xf32>
    %177 = vector.shape_cast %176 : vector<1x8x128xf32> to vector<8x128xf32>
    %cst_156 = arith.constant dense<0.000000e+00> : vector<16x128xf32>
    %178 = tpu.matmul %175, %177, %cst_156 {dimension_numbers = #tpu.dot_dimension_numbers<[1], [0], [0], [1], [0, 0, 1, 1], [], []>} : vector<16x8xf32>, vector<8x128xf32>, vector<16x128xf32> -> vector<16x128xf32>
    %c1_157 = arith.constant 1 : index
    %c0_158 = arith.constant 0 : index
    %c0_159 = arith.constant 0 : index
    %179 = vector.load %arg6[%c1_157, %c0_158, %c0_159] : memref<9x16x56xf32, #tpu.memory_space<vmem>>, vector<1x16x56xf32>
    %180 = vector.shape_cast %179 : vector<1x16x56xf32> to vector<16x56xf32>
    %cst_160 = arith.constant dense<0.000000e+00> : vector<16x128xf32>
    %181 = tpu.matmul %180, %171, %cst_160 {dimension_numbers = #tpu.dot_dimension_numbers<[1], [0], [0], [1], [0, 0, 1, 1], [], []>} : vector<16x56xf32>, vector<56x128xf32>, vector<16x128xf32> -> vector<16x128xf32>
    %182 = vector.extract_strided_slice %181 {offsets = [0, 0], sizes = [16, 8], strides = [1, 1]} : vector<16x128xf32> to vector<16x8xf32>
    %c1_161 = arith.constant 1 : index
    %c0_162 = arith.constant 0 : index
    %c0_163 = arith.constant 0 : index
    %183 = vector.load %arg7[%c1_161, %c0_162, %c0_163] : memref<9x8x128xf32, #tpu.memory_space<vmem>>, vector<1x8x128xf32>
    %184 = vector.shape_cast %183 : vector<1x8x128xf32> to vector<8x128xf32>
    %cst_164 = arith.constant dense<0.000000e+00> : vector<16x128xf32>
    %185 = tpu.matmul %182, %184, %cst_164 {dimension_numbers = #tpu.dot_dimension_numbers<[1], [0], [0], [1], [0, 0, 1, 1], [], []>} : vector<16x8xf32>, vector<8x128xf32>, vector<16x128xf32> -> vector<16x128xf32>
    %186 = arith.addf %178, %185 : vector<16x128xf32>
    %c2_165 = arith.constant 2 : index
    %c0_166 = arith.constant 0 : index
    %c0_167 = arith.constant 0 : index
    %187 = vector.load %arg6[%c2_165, %c0_166, %c0_167] : memref<9x16x56xf32, #tpu.memory_space<vmem>>, vector<1x16x56xf32>
    %188 = vector.shape_cast %187 : vector<1x16x56xf32> to vector<16x56xf32>
    %cst_168 = arith.constant dense<0.000000e+00> : vector<16x128xf32>
    %189 = tpu.matmul %188, %171, %cst_168 {dimension_numbers = #tpu.dot_dimension_numbers<[1], [0], [0], [1], [0, 0, 1, 1], [], []>} : vector<16x56xf32>, vector<56x128xf32>, vector<16x128xf32> -> vector<16x128xf32>
    %190 = vector.extract_strided_slice %189 {offsets = [0, 0], sizes = [16, 8], strides = [1, 1]} : vector<16x128xf32> to vector<16x8xf32>
    %c2_169 = arith.constant 2 : index
    %c0_170 = arith.constant 0 : index
    %c0_171 = arith.constant 0 : index
    %191 = vector.load %arg7[%c2_169, %c0_170, %c0_171] : memref<9x8x128xf32, #tpu.memory_space<vmem>>, vector<1x8x128xf32>
    %192 = vector.shape_cast %191 : vector<1x8x128xf32> to vector<8x128xf32>
    %cst_172 = arith.constant dense<0.000000e+00> : vector<16x128xf32>
    %193 = tpu.matmul %190, %192, %cst_172 {dimension_numbers = #tpu.dot_dimension_numbers<[1], [0], [0], [1], [0, 0, 1, 1], [], []>} : vector<16x8xf32>, vector<8x128xf32>, vector<16x128xf32> -> vector<16x128xf32>
    %194 = arith.addf %186, %193 : vector<16x128xf32>
    %c3_173 = arith.constant 3 : index
    %c0_174 = arith.constant 0 : index
    %c0_175 = arith.constant 0 : index
    %195 = vector.load %arg6[%c3_173, %c0_174, %c0_175] : memref<9x16x56xf32, #tpu.memory_space<vmem>>, vector<1x16x56xf32>
    %196 = vector.shape_cast %195 : vector<1x16x56xf32> to vector<16x56xf32>
    %cst_176 = arith.constant dense<0.000000e+00> : vector<16x128xf32>
    %197 = tpu.matmul %196, %171, %cst_176 {dimension_numbers = #tpu.dot_dimension_numbers<[1], [0], [0], [1], [0, 0, 1, 1], [], []>} : vector<16x56xf32>, vector<56x128xf32>, vector<16x128xf32> -> vector<16x128xf32>
    %198 = vector.extract_strided_slice %197 {offsets = [0, 0], sizes = [16, 8], strides = [1, 1]} : vector<16x128xf32> to vector<16x8xf32>
    %c3_177 = arith.constant 3 : index
    %c0_178 = arith.constant 0 : index
    %c0_179 = arith.constant 0 : index
    %199 = vector.load %arg7[%c3_177, %c0_178, %c0_179] : memref<9x8x128xf32, #tpu.memory_space<vmem>>, vector<1x8x128xf32>
    %200 = vector.shape_cast %199 : vector<1x8x128xf32> to vector<8x128xf32>
    %cst_180 = arith.constant dense<0.000000e+00> : vector<16x128xf32>
    %201 = tpu.matmul %198, %200, %cst_180 {dimension_numbers = #tpu.dot_dimension_numbers<[1], [0], [0], [1], [0, 0, 1, 1], [], []>} : vector<16x8xf32>, vector<8x128xf32>, vector<16x128xf32> -> vector<16x128xf32>
    %202 = arith.addf %194, %201 : vector<16x128xf32>
    %c4_181 = arith.constant 4 : index
    %c0_182 = arith.constant 0 : index
    %c0_183 = arith.constant 0 : index
    %203 = vector.load %arg6[%c4_181, %c0_182, %c0_183] : memref<9x16x56xf32, #tpu.memory_space<vmem>>, vector<1x16x56xf32>
    %204 = vector.shape_cast %203 : vector<1x16x56xf32> to vector<16x56xf32>
    %cst_184 = arith.constant dense<0.000000e+00> : vector<16x128xf32>
    %205 = tpu.matmul %204, %171, %cst_184 {dimension_numbers = #tpu.dot_dimension_numbers<[1], [0], [0], [1], [0, 0, 1, 1], [], []>} : vector<16x56xf32>, vector<56x128xf32>, vector<16x128xf32> -> vector<16x128xf32>
    %206 = vector.extract_strided_slice %205 {offsets = [0, 0], sizes = [16, 8], strides = [1, 1]} : vector<16x128xf32> to vector<16x8xf32>
    %c4_185 = arith.constant 4 : index
    %c0_186 = arith.constant 0 : index
    %c0_187 = arith.constant 0 : index
    %207 = vector.load %arg7[%c4_185, %c0_186, %c0_187] : memref<9x8x128xf32, #tpu.memory_space<vmem>>, vector<1x8x128xf32>
    %208 = vector.shape_cast %207 : vector<1x8x128xf32> to vector<8x128xf32>
    %cst_188 = arith.constant dense<0.000000e+00> : vector<16x128xf32>
    %209 = tpu.matmul %206, %208, %cst_188 {dimension_numbers = #tpu.dot_dimension_numbers<[1], [0], [0], [1], [0, 0, 1, 1], [], []>} : vector<16x8xf32>, vector<8x128xf32>, vector<16x128xf32> -> vector<16x128xf32>
    %210 = arith.addf %202, %209 : vector<16x128xf32>
    %c5_189 = arith.constant 5 : index
    %c0_190 = arith.constant 0 : index
    %c0_191 = arith.constant 0 : index
    %211 = vector.load %arg6[%c5_189, %c0_190, %c0_191] : memref<9x16x56xf32, #tpu.memory_space<vmem>>, vector<1x16x56xf32>
    %212 = vector.shape_cast %211 : vector<1x16x56xf32> to vector<16x56xf32>
    %cst_192 = arith.constant dense<0.000000e+00> : vector<16x128xf32>
    %213 = tpu.matmul %212, %171, %cst_192 {dimension_numbers = #tpu.dot_dimension_numbers<[1], [0], [0], [1], [0, 0, 1, 1], [], []>} : vector<16x56xf32>, vector<56x128xf32>, vector<16x128xf32> -> vector<16x128xf32>
    %214 = vector.extract_strided_slice %213 {offsets = [0, 0], sizes = [16, 8], strides = [1, 1]} : vector<16x128xf32> to vector<16x8xf32>
    %c5_193 = arith.constant 5 : index
    %c0_194 = arith.constant 0 : index
    %c0_195 = arith.constant 0 : index
    %215 = vector.load %arg7[%c5_193, %c0_194, %c0_195] : memref<9x8x128xf32, #tpu.memory_space<vmem>>, vector<1x8x128xf32>
    %216 = vector.shape_cast %215 : vector<1x8x128xf32> to vector<8x128xf32>
    %cst_196 = arith.constant dense<0.000000e+00> : vector<16x128xf32>
    %217 = tpu.matmul %214, %216, %cst_196 {dimension_numbers = #tpu.dot_dimension_numbers<[1], [0], [0], [1], [0, 0, 1, 1], [], []>} : vector<16x8xf32>, vector<8x128xf32>, vector<16x128xf32> -> vector<16x128xf32>
    %218 = arith.addf %210, %217 : vector<16x128xf32>
    %c6_197 = arith.constant 6 : index
    %c0_198 = arith.constant 0 : index
    %c0_199 = arith.constant 0 : index
    %219 = vector.load %arg6[%c6_197, %c0_198, %c0_199] : memref<9x16x56xf32, #tpu.memory_space<vmem>>, vector<1x16x56xf32>
    %220 = vector.shape_cast %219 : vector<1x16x56xf32> to vector<16x56xf32>
    %cst_200 = arith.constant dense<0.000000e+00> : vector<16x128xf32>
    %221 = tpu.matmul %220, %171, %cst_200 {dimension_numbers = #tpu.dot_dimension_numbers<[1], [0], [0], [1], [0, 0, 1, 1], [], []>} : vector<16x56xf32>, vector<56x128xf32>, vector<16x128xf32> -> vector<16x128xf32>
    %222 = vector.extract_strided_slice %221 {offsets = [0, 0], sizes = [16, 8], strides = [1, 1]} : vector<16x128xf32> to vector<16x8xf32>
    %c6_201 = arith.constant 6 : index
    %c0_202 = arith.constant 0 : index
    %c0_203 = arith.constant 0 : index
    %223 = vector.load %arg7[%c6_201, %c0_202, %c0_203] : memref<9x8x128xf32, #tpu.memory_space<vmem>>, vector<1x8x128xf32>
    %224 = vector.shape_cast %223 : vector<1x8x128xf32> to vector<8x128xf32>
    %cst_204 = arith.constant dense<0.000000e+00> : vector<16x128xf32>
    %225 = tpu.matmul %222, %224, %cst_204 {dimension_numbers = #tpu.dot_dimension_numbers<[1], [0], [0], [1], [0, 0, 1, 1], [], []>} : vector<16x8xf32>, vector<8x128xf32>, vector<16x128xf32> -> vector<16x128xf32>
    %226 = arith.addf %218, %225 : vector<16x128xf32>
    %c7_205 = arith.constant 7 : index
    %c0_206 = arith.constant 0 : index
    %c0_207 = arith.constant 0 : index
    %227 = vector.load %arg6[%c7_205, %c0_206, %c0_207] : memref<9x16x56xf32, #tpu.memory_space<vmem>>, vector<1x16x56xf32>
    %228 = vector.shape_cast %227 : vector<1x16x56xf32> to vector<16x56xf32>
    %cst_208 = arith.constant dense<0.000000e+00> : vector<16x128xf32>
    %229 = tpu.matmul %228, %171, %cst_208 {dimension_numbers = #tpu.dot_dimension_numbers<[1], [0], [0], [1], [0, 0, 1, 1], [], []>} : vector<16x56xf32>, vector<56x128xf32>, vector<16x128xf32> -> vector<16x128xf32>
    %230 = vector.extract_strided_slice %229 {offsets = [0, 0], sizes = [16, 8], strides = [1, 1]} : vector<16x128xf32> to vector<16x8xf32>
    %c7_209 = arith.constant 7 : index
    %c0_210 = arith.constant 0 : index
    %c0_211 = arith.constant 0 : index
    %231 = vector.load %arg7[%c7_209, %c0_210, %c0_211] : memref<9x8x128xf32, #tpu.memory_space<vmem>>, vector<1x8x128xf32>
    %232 = vector.shape_cast %231 : vector<1x8x128xf32> to vector<8x128xf32>
    %cst_212 = arith.constant dense<0.000000e+00> : vector<16x128xf32>
    %233 = tpu.matmul %230, %232, %cst_212 {dimension_numbers = #tpu.dot_dimension_numbers<[1], [0], [0], [1], [0, 0, 1, 1], [], []>} : vector<16x8xf32>, vector<8x128xf32>, vector<16x128xf32> -> vector<16x128xf32>
    %234 = arith.addf %226, %233 : vector<16x128xf32>
    %c8_213 = arith.constant 8 : index
    %c0_214 = arith.constant 0 : index
    %c0_215 = arith.constant 0 : index
    %235 = vector.load %arg6[%c8_213, %c0_214, %c0_215] : memref<9x16x56xf32, #tpu.memory_space<vmem>>, vector<1x16x56xf32>
    %236 = vector.shape_cast %235 : vector<1x16x56xf32> to vector<16x56xf32>
    %cst_216 = arith.constant dense<0.000000e+00> : vector<16x128xf32>
    %237 = tpu.matmul %236, %171, %cst_216 {dimension_numbers = #tpu.dot_dimension_numbers<[1], [0], [0], [1], [0, 0, 1, 1], [], []>} : vector<16x56xf32>, vector<56x128xf32>, vector<16x128xf32> -> vector<16x128xf32>
    %238 = vector.extract_strided_slice %237 {offsets = [0, 0], sizes = [16, 8], strides = [1, 1]} : vector<16x128xf32> to vector<16x8xf32>
    %c8_217 = arith.constant 8 : index
    %c0_218 = arith.constant 0 : index
    %c0_219 = arith.constant 0 : index
    %239 = vector.load %arg7[%c8_217, %c0_218, %c0_219] : memref<9x8x128xf32, #tpu.memory_space<vmem>>, vector<1x8x128xf32>
    %240 = vector.shape_cast %239 : vector<1x8x128xf32> to vector<8x128xf32>
    %cst_220 = arith.constant dense<0.000000e+00> : vector<16x128xf32>
    %241 = tpu.matmul %238, %240, %cst_220 {dimension_numbers = #tpu.dot_dimension_numbers<[1], [0], [0], [1], [0, 0, 1, 1], [], []>} : vector<16x8xf32>, vector<8x128xf32>, vector<16x128xf32> -> vector<16x128xf32>
    %242 = arith.addf %234, %241 : vector<16x128xf32>
    %243 = tpu.concatenate %135, %242 in 0 : vector<16x128xf32>, vector<16x128xf32> -> vector<32x128xf32>
    %cst_221 = arith.constant dense<0.000000e+00> : vector<128xf32>
    %244 = vector.multi_reduction <add>, %243, %cst_221 [0] : vector<32x128xf32> to vector<128xf32>
    %245 = vector.shape_cast %244 : vector<128xf32> to vector<1x128xf32>
    %cst_222 = arith.constant 3.200000e+01 : f32
    %246 = vector.broadcast %cst_222 : f32 to vector<1x128xf32>
    %247 = arith.divf %245, %246 : vector<1x128xf32>
    %248 = vector.broadcast %247 : vector<1x128xf32> to vector<32x128xf32>
    %249 = arith.subf %243, %248 : vector<32x128xf32>
    %250 = arith.mulf %249, %249 : vector<32x128xf32>
    %cst_223 = arith.constant dense<0.000000e+00> : vector<128xf32>
    %251 = vector.multi_reduction <add>, %250, %cst_223 [0] : vector<32x128xf32> to vector<128xf32>
    %252 = vector.shape_cast %251 : vector<128xf32> to vector<1x128xf32>
    %cst_224 = arith.constant 3.200000e+01 : f32
    %253 = vector.broadcast %cst_224 : f32 to vector<1x128xf32>
    %254 = arith.divf %252, %253 : vector<1x128xf32>
    %255 = vector.broadcast %247 : vector<1x128xf32> to vector<32x128xf32>
    %256 = arith.subf %243, %255 : vector<32x128xf32>
    %cst_225 = arith.constant 9.99999974E-6 : f32
    %257 = vector.broadcast %cst_225 : f32 to vector<1x128xf32>
    %258 = arith.addf %254, %257 : vector<1x128xf32>
    %259 = math.rsqrt %258 : vector<1x128xf32>
    %260 = vector.broadcast %259 : vector<1x128xf32> to vector<32x128xf32>
    %261 = arith.mulf %256, %260 : vector<32x128xf32>
    %c0_226 = arith.constant 0 : index
    %c0_227 = arith.constant 0 : index
    %262 = vector.load %arg8[%c0_226, %c0_227] : memref<1x128xf32, #tpu.memory_space<vmem>>, vector<1x128xf32>
    %263 = vector.broadcast %262 : vector<1x128xf32> to vector<32x128xf32>
    %264 = arith.mulf %261, %263 : vector<32x128xf32>
    %c0_228 = arith.constant 0 : index
    %c0_229 = arith.constant 0 : index
    %265 = vector.load %arg9[%c0_228, %c0_229] : memref<1x128xf32, #tpu.memory_space<vmem>>, vector<1x128xf32>
    %266 = vector.broadcast %265 : vector<1x128xf32> to vector<32x128xf32>
    %267 = arith.addf %264, %266 : vector<32x128xf32>
    %cst_230 = arith.constant 0.000000e+00 : f32
    %268 = vector.broadcast %cst_230 : f32 to vector<32x128xf32>
    %269 = arith.maximumf %267, %268 : vector<32x128xf32>
    %c0_231 = arith.constant 0 : index
    %c0_232 = arith.constant 0 : index
    %270 = vector.load %arg10[%c0_231, %c0_232] : memref<32x128xf32, #tpu.memory_space<vmem>>, vector<32x128xf32>
    tpu.vector_store %arg10[%c0_231, %c0_232], %269 {strides = array<i32>} : memref<32x128xf32, #tpu.memory_space<vmem>>, vector<32x128xf32>,
    return
  }
  func.func @transform_0(%arg0: i32) -> (i32, i32) {
    %c0_i32 = arith.constant 0 : i32
    %c0_i32_0 = arith.constant 0 : i32
    %c0_i32_1 = arith.constant 0 : i32
    return %c0_i32, %c0_i32_0 : i32, i32
  }
  func.func @transform_1(%arg0: i32) -> (i32, i32) {
    %c0_i32 = arith.constant 0 : i32
    %c0_i32_0 = arith.constant 0 : i32
    %c0_i32_1 = arith.constant 0 : i32
    return %c0_i32, %c0_i32_0 : i32, i32
  }
  func.func @transform_2(%arg0: i32) -> (i32, i32) {
    %c0_i32 = arith.constant 0 : i32
    %c0_i32_0 = arith.constant 0 : i32
    %c0_i32_1 = arith.constant 0 : i32
    return %c0_i32, %c0_i32_0 : i32, i32
  }
  func.func @transform_3(%arg0: i32) -> (i32, i32) {
    %c0_i32 = arith.constant 0 : i32
    %c0_i32_0 = arith.constant 0 : i32
    %c0_i32_1 = arith.constant 0 : i32
    return %c0_i32, %c0_i32_0 : i32, i32
  }
  func.func @transform_4(%arg0: i32) -> (i32, i32, i32) {
    %c0_i32 = arith.constant 0 : i32
    %c0_i32_0 = arith.constant 0 : i32
    %c0_i32_1 = arith.constant 0 : i32
    %c0_i32_2 = arith.constant 0 : i32
    return %c0_i32, %c0_i32_0, %c0_i32_1 : i32, i32, i32
  }
  func.func @transform_5(%arg0: i32) -> (i32, i32, i32) {
    %c0_i32 = arith.constant 0 : i32
    %c0_i32_0 = arith.constant 0 : i32
    %c0_i32_1 = arith.constant 0 : i32
    %c0_i32_2 = arith.constant 0 : i32
    return %c0_i32, %c0_i32_0, %c0_i32_1 : i32, i32, i32
  }
  func.func @transform_6(%arg0: i32) -> (i32, i32, i32) {
    %c0_i32 = arith.constant 0 : i32
    %c0_i32_0 = arith.constant 0 : i32
    %c0_i32_1 = arith.constant 0 : i32
    %c0_i32_2 = arith.constant 0 : i32
    return %c0_i32, %c0_i32_0, %c0_i32_1 : i32, i32, i32
  }
  func.func @transform_7(%arg0: i32) -> (i32, i32) {
    %c0_i32 = arith.constant 0 : i32
    %c0_i32_0 = arith.constant 0 : i32
    %c0_i32_1 = arith.constant 0 : i32
    return %c0_i32, %c0_i32_0 : i32, i32
  }
  func.func @transform_8(%arg0: i32) -> (i32, i32) {
    %c0_i32 = arith.constant 0 : i32
    %c0_i32_0 = arith.constant 0 : i32
    %c0_i32_1 = arith.constant 0 : i32
    return %c0_i32, %c0_i32_0 : i32, i32
  }
  func.func @transform_9(%arg0: i32) -> (i32, i32) {
    %c0_i32 = arith.constant 0 : i32
    %c0_i32_0 = arith.constant 0 : i32
    %c0_i32_1 = arith.constant 0 : i32
    return %c0_i32, %c0_i32_0 : i32, i32
  }
}

</mosaic_0001>

<bundles_post_ra>
// kernel: cnn_base_forward.1
= control target key start
LH: loop header
LB: loop body
LE: loop exit
PB: predicated region body
PF: predicated region fallthrough
CT: control target
= control target key end

     0   :  { %vm100_vm0 = vcmask 261120   ;;  %vm2311_vm1 = vcmask 457728   ;;  %vm2480_vm2 = vcmask 64512   ;;  %s11977_s1 = inlined_call_operand.vmem [shape: f32[32,128], index: 1, kind: input, shape index: {}]   ;;  %s11978_s0 = inlined_call_operand.vmem [shape: f32[512,32], index: 0, kind: input, shape index: {}]   ;;  %s11979_s4 = inlined_call_operand.vmem [shape: f32[9,56,256], index: 4, kind: input, shape index: {}]   ;;  %s11980_s2 = inlined_call_operand.vmem [shape: f32[1,128], index: 2, kind: input, shape index: {}]   ;;  %s11981_s3 = inlined_call_operand.vmem [shape: f32[1,128], index: 3, kind: input, shape index: {}]   ;;  %s11982_s5 = inlined_call_operand.vmem [shape: f32[9,16,56], index: 5, kind: input, shape index: {}]   ;;  %s11983_s6 = inlined_call_operand.vmem [shape: f32[9,8,128], index: 6, kind: input, shape index: {}]   ;;  %s11984_s7 = inlined_call_operand.vmem [shape: f32[1,128], index: 7, kind: input, shape index: {}]   ;;  %s11985_s8 = inlined_call_operand.vmem [shape: f32[1,128], index: 8, kind: input, shape index: {}]   ;;  %s11986_s9 = inlined_call_operand.vmem [shape: f32[32,128], index: 9, kind: output, shape index: {}]  }
   0x1   :  { %v99_v0 = vld [vmem:[%s11977_s1 + $0x18] sm:$0xff]  ;;  %v98_v1 = vld [vmem:[%s11977_s1 + $0x10] sm:$0xff]  ;;  %v32_v2 = vld [vmem:[%s11978_s0] sm:$0xff] }
   0x2   :  { %7783 = vmatprep.subr.mxu0 %v99_v0  ;;  %v97_v3 = vld [vmem:[%s11977_s1 + $0x8] sm:$0xff]  ;;  %7791 = vmatprep.mubr.msk.f32.mxu0 %vm100_vm0, %v32_v2  ;;  %v96_v4 = vld [vmem:[%s11977_s1] sm:$0xff]  ;;  %v34_v6 = vld [vmem:[%s11978_s0 + $0x10] sm:$0xff] }
   0x3   :  { %7784 = vmatpush3.msra.mxu0 %v99_v0  ;;  %v33_v5 = vld [vmem:[%s11978_s0 + $0x8] sm:$0xff]  ;;  %v35_v7 = vld [vmem:[%s11978_s0 + $0x18] sm:$0xff]  ;;  %v36_v8 = vld [vmem:[%s11978_s0 + $0x20] sm:$0xff] }
   0x4   :  { %7785 = vmatprep.subr.mxu0 %v98_v1  ;;  %v37_v9 = vld [vmem:[%s11978_s0 + $0x28] sm:$0xff]  ;;  %v38_v10 = vld [vmem:[%s11978_s0 + $0x30] sm:$0xff]  ;;  %v39_v11 = vld [vmem:[%s11978_s0 + $0x38] sm:$0xff] }
   0x5   :  { %7786 = vmatpush3.msra.mxu0 %v98_v1  ;;  %v40_v12 = vld [vmem:[%s11978_s0 + $0x40] sm:$0xff]  ;;  %v41_v13 = vld [vmem:[%s11978_s0 + $0x48] sm:$0xff]  ;;  %v42_v14 = vld [vmem:[%s11978_s0 + $0x50] sm:$0xff] }
   0x6   :  { %7787 = vmatprep.subr.mxu0 %v97_v3  ;;  %v43_v15 = vld [vmem:[%s11978_s0 + $0x58] sm:$0xff]  ;;  %v44_v16 = vld [vmem:[%s11978_s0 + $0x60] sm:$0xff]  ;;  %v45_v17 = vld [vmem:[%s11978_s0 + $0x68] sm:$0xff] }
   0x7   :  { %7788 = vmatpush3.msra.mxu0 %v97_v3  ;;  %v46_v18 = vld [vmem:[%s11978_s0 + $0x70] sm:$0xff]  ;;  %v47_v19 = vld [vmem:[%s11978_s0 + $0x78] sm:$0xff]  ;;  %v48_v20 = vld [vmem:[%s11978_s0 + $0x80] sm:$0xff] }
   0x8   :  { %7789 = vmatprep.subr.mxu0 %v96_v4  ;;  %v49_v21 = vld [vmem:[%s11978_s0 + $0x88] sm:$0xff]  ;;  %v50_v22 = vld [vmem:[%s11978_s0 + $0x90] sm:$0xff]  ;;  %v51_v23 = vld [vmem:[%s11978_s0 + $0x98] sm:$0xff] }
   0x9   :  { %7790 = vmatpush3.msra.mxu0 %v96_v4  ;;  %v52_v24 = vld [vmem:[%s11978_s0 + $0xa0] sm:$0xff]  ;;  %v53_v25 = vld [vmem:[%s11978_s0 + $0xa8] sm:$0xff]  ;;  %v54_v26 = vld [vmem:[%s11978_s0 + $0xb0] sm:$0xff] }
   0xa   :  { %7792 = vmatmul.mubr.msk.f32.vlgmr.msra.gmra.mxu0 %vm100_vm0, %v33_v5  ;;  %v55_v27 = vld [vmem:[%s11978_s0 + $0xb8] sm:$0xff]  ;;  %v56_v28 = vld [vmem:[%s11978_s0 + $0xc0] sm:$0xff]  ;;  %v57_v29 = vld [vmem:[%s11978_s0 + $0xc8] sm:$0xff] }
   0xb   :  { %7794 = vmatprep.mubr.msk.f32.mxu0 %vm100_vm0, %v34_v6  ;;  %v58_v30 = vld [vmem:[%s11978_s0 + $0xd0] sm:$0xff]  ;;  %v59_v31 = vld [vmem:[%s11978_s0 + $0xd8] sm:$0xff]  ;;  %v60_v32 = vld [vmem:[%s11978_s0 + $0xe0] sm:$0xff] }
   0xc   :  { %v61_v33 = vld [vmem:[%s11978_s0 + $0xe8] sm:$0xff]  ;;  %v62_v34 = vld [vmem:[%s11978_s0 + $0xf0] sm:$0xff]  ;;  %v63_v35 = vld [vmem:[%s11978_s0 + $0xf8] sm:$0xff] }
   0xd   :  { %v64_v36 = vld [vmem:[%s11978_s0 + $0x100] sm:$0xff]  ;;  %v65_v37 = vld [vmem:[%s11978_s0 + $0x108] sm:$0xff]  ;;  %v66_v38 = vld [vmem:[%s11978_s0 + $0x110] sm:$0xff] }
   0xe   :  { %7795 = vmatmul.mubr.msk.f32.gmra.mxu0 %vm100_vm0, %v35_v7  ;;  %v67_v39 = vld [vmem:[%s11978_s0 + $0x118] sm:$0xff]  ;;  %v68_v40 = vld [vmem:[%s11978_s0 + $0x120] sm:$0xff]  ;;  %v69_v41 = vld [vmem:[%s11978_s0 + $0x128] sm:$0xff] }
   0xf   :  { %7797 = vmatprep.mubr.msk.f32.mxu0 %vm100_vm0, %v36_v8  ;;  %v70_v42 = vld [vmem:[%s11978_s0 + $0x130] sm:$0xff]  ;;  %v71_v43 = vld [vmem:[%s11978_s0 + $0x138] sm:$0xff]  ;;  %v72_v44 = vld [vmem:[%s11978_s0 + $0x140] sm:$0xff] }
  0x10   :  { %v73_v45 = vld [vmem:[%s11978_s0 + $0x148] sm:$0xff]  ;;  %v74_v46 = vld [vmem:[%s11978_s0 + $0x150] sm:$0xff]  ;;  %v75_v47 = vld [vmem:[%s11978_s0 + $0x158] sm:$0xff] }
  0x11   :  { %v76_v48 = vld [vmem:[%s11978_s0 + $0x160] sm:$0xff]  ;;  %v77_v49 = vld [vmem:[%s11978_s0 + $0x168] sm:$0xff]  ;;  %v78_v50 = vld [vmem:[%s11978_s0 + $0x170] sm:$0xff] }
  0x12   :  { %7798 = vmatmul.mubr.msk.f32.gmra.mxu0 %vm100_vm0, %v37_v9  ;;  %v79_v51 = vld [vmem:[%s11978_s0 + $0x178] sm:$0xff]  ;;  %v80_v52 = vld [vmem:[%s11978_s0 + $0x180] sm:$0xff]  ;;  %v81_v53 = vld [vmem:[%s11978_s0 + $0x188] sm:$0xff] }
  0x13   :  { %7800 = vmatprep.mubr.msk.f32.mxu0 %vm100_vm0, %v38_v10  ;;  %v82_v54 = vld [vmem:[%s11978_s0 + $0x190] sm:$0xff]  ;;  %v83_v55 = vld [vmem:[%s11978_s0 + $0x198] sm:$0xff]  ;;  %v84_v56 = vld [vmem:[%s11978_s0 + $0x1a0] sm:$0xff] }
  0x14   :  { %v85_v57 = vld [vmem:[%s11978_s0 + $0x1a8] sm:$0xff]  ;;  %v86_v58 = vld [vmem:[%s11978_s0 + $0x1b0] sm:$0xff]  ;;  %v87_v59 = vld [vmem:[%s11978_s0 + $0x1b8] sm:$0xff] }
  0x15   :  { %v88_v60 = vld [vmem:[%s11978_s0 + $0x1c0] sm:$0xff]  ;;  %v89_v61 = vld [vmem:[%s11978_s0 + $0x1c8] sm:$0xff]  ;;  %v90_v62 = vld [vmem:[%s11978_s0 + $0x1d0] sm:$0xff] }
  0x16   :  { %7801 = vmatmul.mubr.msk.f32.gmra.mxu0 %vm100_vm0, %v39_v11  ;;  %v91_v63 = vld [vmem:[%s11978_s0 + $0x1d8] sm:$0xff]  ;;  %v92_v0 = vld [vmem:[%s11978_s0 + $0x1e0] sm:$0xff]  ;;  %v93_v1 = vld [vmem:[%s11978_s0 + $0x1e8] sm:$0xff] }
  0x17   :  { %7803 = vmatprep.mubr.msk.f32.mxu0 %vm100_vm0, %v40_v12  ;;  %v94_v2 = vld [vmem:[%s11978_s0 + $0x1f0] sm:$0xff]  ;;  %v95_v3 = vld [vmem:[%s11978_s0 + $0x1f8] sm:$0xff] }
  0x1a   :  { %7804 = vmatmul.mubr.msk.f32.gmra.mxu0 %vm100_vm0, %v41_v13 }
  0x1b   :  { %7806 = vmatprep.mubr.msk.f32.mxu0 %vm100_vm0, %v42_v14 }
  0x1e   :  { %7807 = vmatmul.mubr.msk.f32.gmra.mxu0 %vm100_vm0, %v43_v15 }
  0x1f   :  { %7809 = vmatprep.mubr.msk.f32.mxu0 %vm100_vm0, %v44_v16 }
  0x22   :  { %7810 = vmatmul.mubr.msk.f32.gmra.mxu0 %vm100_vm0, %v45_v17 }
  0x23   :  { %7812 = vmatprep.mubr.msk.f32.mxu0 %vm100_vm0, %v46_v18 }
  0x26   :  { %7813 = vmatmul.mubr.msk.f32.gmra.mxu0 %vm100_vm0, %v47_v19 }
  0x27   :  { %7815 = vmatprep.mubr.msk.f32.mxu0 %vm100_vm0, %v48_v20 }
  0x2a   :  { %7816 = vmatmul.mubr.msk.f32.gmra.mxu0 %vm100_vm0, %v49_v21 }
  0x2b   :  { %7818 = vmatprep.mubr.msk.f32.mxu0 %vm100_vm0, %v50_v22 }
  0x2e   :  { %7819 = vmatmul.mubr.msk.f32.gmra.mxu0 %vm100_vm0, %v51_v23 }
  0x2f   :  { %7821 = vmatprep.mubr.msk.f32.mxu0 %vm100_vm0, %v52_v24 }
  0x32   :  { %7822 = vmatmul.mubr.msk.f32.gmra.mxu0 %vm100_vm0, %v53_v25 }
  0x33   :  { %7824 = vmatprep.mubr.msk.f32.mxu0 %vm100_vm0, %v54_v26 }
  0x36   :  { %7825 = vmatmul.mubr.msk.f32.gmra.mxu0 %vm100_vm0, %v55_v27 }
  0x37   :  { %7827 = vmatprep.mubr.msk.f32.mxu0 %vm100_vm0, %v56_v28 }
  0x3a   :  { %7828 = vmatmul.mubr.msk.f32.gmra.mxu0 %vm100_vm0, %v57_v29 }
  0x3b   :  { %7830 = vmatprep.mubr.msk.f32.mxu0 %vm100_vm0, %v58_v30 }
  0x3e   :  { %7831 = vmatmul.mubr.msk.f32.gmra.mxu0 %vm100_vm0, %v59_v31 }
  0x3f   :  { %7833 = vmatprep.mubr.msk.f32.mxu0 %vm100_vm0, %v60_v32 }
  0x42   :  { %7834 = vmatmul.mubr.msk.f32.gmra.mxu0 %vm100_vm0, %v61_v33 }
  0x43   :  { %7836 = vmatprep.mubr.msk.f32.mxu0 %vm100_vm0, %v62_v34 }
  0x46   :  { %7837 = vmatmul.mubr.msk.f32.gmra.mxu0 %vm100_vm0, %v63_v35 }
  0x47   :  { %7839 = vmatprep.mubr.msk.f32.mxu0 %vm100_vm0, %v64_v36 }
  0x4a   :  { %7840 = vmatmul.mubr.msk.f32.gmra.mxu0 %vm100_vm0, %v65_v37 }
  0x4b   :  { %7842 = vmatprep.mubr.msk.f32.mxu0 %vm100_vm0, %v66_v38 }
  0x4e   :  { %7843 = vmatmul.mubr.msk.f32.gmra.mxu0 %vm100_vm0, %v67_v39 }
  0x4f   :  { %7845 = vmatprep.mubr.msk.f32.mxu0 %vm100_vm0, %v68_v40 }
  0x52   :  { %7846 = vmatmul.mubr.msk.f32.gmra.mxu0 %vm100_vm0, %v69_v41 }
  0x53   :  { %7848 = vmatprep.mubr.msk.f32.mxu0 %vm100_vm0, %v70_v42 }
  0x56   :  { %7849 = vmatmul.mubr.msk.f32.gmra.mxu0 %vm100_vm0, %v71_v43 }
  0x57   :  { %7851 = vmatprep.mubr.msk.f32.mxu0 %vm100_vm0, %v72_v44 }
  0x5a   :  { %7852 = vmatmul.mubr.msk.f32.gmra.mxu0 %vm100_vm0, %v73_v45 }
  0x5b   :  { %7854 = vmatprep.mubr.msk.f32.mxu0 %vm100_vm0, %v74_v46 }
  0x5e   :  { %7855 = vmatmul.mubr.msk.f32.gmra.mxu0 %vm100_vm0, %v75_v47 }
  0x5f   :  { %7857 = vmatprep.mubr.msk.f32.mxu0 %vm100_vm0, %v76_v48 }
  0x62   :  { %7858 = vmatmul.mubr.msk.f32.gmra.mxu0 %vm100_vm0, %v77_v49 }
  0x63   :  { %7860 = vmatprep.mubr.msk.f32.mxu0 %vm100_vm0, %v78_v50 }
  0x66   :  { %7861 = vmatmul.mubr.msk.f32.gmra.mxu0 %vm100_vm0, %v79_v51 }
  0x67   :  { %7863 = vmatprep.mubr.msk.f32.mxu0 %vm100_vm0, %v80_v52 }
  0x6a   :  { %7864 = vmatmul.mubr.msk.f32.gmra.mxu0 %vm100_vm0, %v81_v53 }
  0x6b   :  { %7866 = vmatprep.mubr.msk.f32.mxu0 %vm100_vm0, %v82_v54 }
  0x6e   :  { %7867 = vmatmul.mubr.msk.f32.gmra.mxu0 %vm100_vm0, %v83_v55 }
  0x6f   :  { %7869 = vmatprep.mubr.msk.f32.mxu0 %vm100_vm0, %v84_v56 }
  0x72   :  { %7870 = vmatmul.mubr.msk.f32.gmra.mxu0 %vm100_vm0, %v85_v57 }
  0x73   :  { %7872 = vmatprep.mubr.msk.f32.mxu0 %vm100_vm0, %v86_v58 }
  0x76   :  { %7873 = vmatmul.mubr.msk.f32.gmra.mxu0 %vm100_vm0, %v87_v59 }
  0x77   :  { %7875 = vmatprep.mubr.msk.f32.mxu0 %vm100_vm0, %v88_v60 }
  0x7a   :  { %7876 = vmatmul.mubr.msk.f32.gmra.mxu0 %vm100_vm0, %v89_v61 }
  0x7b   :  { %7878 = vmatprep.mubr.msk.f32.mxu0 %vm100_vm0, %v90_v62 }
  0x7e   :  { %7879 = vmatmul.mubr.msk.f32.gmra.mxu0 %vm100_vm0, %v91_v63 }
  0x7f   :  { %7881 = vmatprep.mubr.msk.f32.mxu0 %vm100_vm0, %v92_v0 }
  0x82   :  { %7882 = vmatmul.mubr.msk.f32.gmra.mxu0 %vm100_vm0, %v93_v1 }
  0x83   :  { %7884 = vmatprep.mubr.msk.f32.mxu0 %vm100_vm0, %v94_v2 }
  0x86   :  { %7885 = vmatmul.mubr.msk.f32.gmra.mxu0 %vm100_vm0, %v95_v3 }
  0xca   :  { %v8758_v4 = vpop.f32.mrf.mxu0 }
  0xcc   :  { %v8760_v5 = vpop.f32.mrf.mxu0 }
  0xcd   :  { %v678_v7 = vadd.f32 %v8758_v4, %v8760_v5 }
  0xce   :  { %v8762_v6 = vpop.f32.mrf.mxu0 }
  0xd0   :  { %v8766_v8 = vpop.f32.mrf.mxu0 }
  0xd1   :  { %v679_v9 = vadd.f32 %v678_v7, %v8766_v8 }
  0xd2   :  { %v8769_v10 = vpop.f32.mrf.mxu0 }
  0xd3   :  { %v680_v11 = vadd.f32 %v8762_v6, %v679_v9 }
  0xd4   :  { %v8772_v12 = vpop.f32.mrf.mxu0 }
  0xd5   :  { %v681_v13 = vadd.f32 %v680_v11, %v8772_v12 }
  0xd6   :  { %v8775_v14 = vpop.f32.mrf.mxu0 }
  0xd7   :  { %v682_v15 = vadd.f32 %v8769_v10, %v681_v13 }
  0xd8   :  { %v8778_v16 = vpop.f32.mrf.mxu0 }
  0xd9   :  { %v683_v17 = vadd.f32 %v682_v15, %v8778_v16 }
  0xda   :  { %v8781_v18 = vpop.f32.mrf.mxu0 }
  0xdb   :  { %v684_v19 = vadd.f32 %v8775_v14, %v683_v17 }
  0xdc   :  { %v8784_v20 = vpop.f32.mrf.mxu0 }
  0xdd   :  { %v685_v21 = vadd.f32 %v684_v19, %v8784_v20 }
  0xde   :  { %v8787_v22 = vpop.f32.mrf.mxu0 }
  0xdf   :  { %v686_v23 = vadd.f32 %v8781_v18, %v685_v21 }
  0xe0   :  { %v8790_v24 = vpop.f32.mrf.mxu0 }
  0xe1   :  { %v687_v25 = vadd.f32 %v686_v23, %v8790_v24 }
  0xe2   :  { %v8793_v26 = vpop.f32.mrf.mxu0 }
  0xe3   :  { %v688_v27 = vadd.f32 %v8787_v22, %v687_v25 }
  0xe4   :  { %v8796_v28 = vpop.f32.mrf.mxu0 }
  0xe5   :  { %v689_v29 = vadd.f32 %v688_v27, %v8796_v28 }
  0xe6   :  { %v8799_v30 = vpop.f32.mrf.mxu0 }
  0xe7   :  { %v690_v31 = vadd.f32 %v8793_v26, %v689_v29 }
  0xe8   :  { %v8802_v32 = vpop.f32.mrf.mxu0 }
  0xe9   :  { %v691_v33 = vadd.f32 %v690_v31, %v8802_v32 }
  0xea   :  { %v8805_v34 = vpop.f32.mrf.mxu0 }
  0xeb   :  { %v692_v35 = vadd.f32 %v8799_v30, %v691_v33 }
  0xec   :  { %v8808_v36 = vpop.f32.mrf.mxu0 }
  0xed   :  { %v693_v37 = vadd.f32 %v692_v35, %v8808_v36 }
  0xee   :  { %v8811_v38 = vpop.f32.mrf.mxu0 }
  0xef   :  { %v694_v39 = vadd.f32 %v8805_v34, %v693_v37 }
  0xf0   :  { %v8814_v40 = vpop.f32.mrf.mxu0 }
  0xf1   :  { %v695_v41 = vadd.f32 %v694_v39, %v8814_v40 }
  0xf2   :  { %v8817_v42 = vpop.f32.mrf.mxu0 }
  0xf3   :  { %v696_v43 = vadd.f32 %v8811_v38, %v695_v41 }
  0xf4   :  { %v8820_v44 = vpop.f32.mrf.mxu0 }
  0xf5   :  { %v697_v45 = vadd.f32 %v696_v43, %v8820_v44 }
  0xf6   :  { %v8823_v46 = vpop.f32.mrf.mxu0 }
  0xf7   :  { %v698_v47 = vadd.f32 %v8817_v42, %v697_v45 }
  0xf8   :  { %v8826_v48 = vpop.f32.mrf.mxu0 }
  0xf9   :  { %v699_v49 = vadd.f32 %v698_v47, %v8826_v48 }
  0xfa   :  { %v8829_v50 = vpop.f32.mrf.mxu0 }
  0xfb   :  { %v700_v51 = vadd.f32 %v8823_v46, %v699_v49 }
  0xfc   :  { %v8832_v52 = vpop.f32.mrf.mxu0 }
  0xfd   :  { %v701_v53 = vadd.f32 %v700_v51, %v8832_v52 }
  0xfe   :  { %v8835_v54 = vpop.f32.mrf.mxu0 }
  0xff   :  { %v702_v55 = vadd.f32 %v8829_v50, %v701_v53 }
 0x100   :  { %v8838_v56 = vpop.f32.mrf.mxu0 }
 0x101   :  { %v703_v57 = vadd.f32 %v702_v55, %v8838_v56 }
 0x102   :  { %v8841_v58 = vpop.f32.mrf.mxu0 }
 0x103   :  { %v704_v59 = vadd.f32 %v8835_v54, %v703_v57 }
 0x104   :  { %v8844_v60 = vpop.f32.mrf.mxu0 }
 0x105   :  { %v705_v61 = vadd.f32 %v704_v59, %v8844_v60 }
 0x106   :  { %v8847_v62 = vpop.f32.mrf.mxu0 }
 0x107   :  { %v706_v63 = vadd.f32 %v8841_v58, %v705_v61 }
 0x108   :  { %v8850_v0 = vpop.f32.mrf.mxu0 }
 0x109   :  { %v707_v1 = vadd.f32 %v706_v63, %v8850_v0 }
 0x10a   :  { %v8853_v2 = vpop.f32.mrf.mxu0 }
 0x10b   :  { %v708_v3 = vadd.f32 %v8847_v62, %v707_v1 }
 0x10c   :  { %v8856_v7 = vpop.f32.mrf.mxu0 }
 0x10d   :  { %v709_v9 = vadd.f32 %v708_v3, %v8856_v7 }
 0x10e   :  { %v8859_v11 = vpop.f32.mrf.mxu0 }
 0x10f   :  { %v710_v13 = vadd.f32 %v8853_v2, %v709_v9 }
 0x110   :  { %v8862_v15 = vpop.f32.mrf.mxu0 }
 0x111   :  { %v711_v17 = vadd.f32 %v710_v13, %v8862_v15 }
 0x112   :  { %v8865_v19 = vpop.f32.mrf.mxu0 }
 0x113   :  { %v712_v21 = vadd.f32 %v8859_v11, %v711_v17 }
 0x114   :  { %v8868_v23 = vpop.f32.mrf.mxu0 }
 0x115   :  { %v713_v25 = vadd.f32 %v712_v21, %v8868_v23 }
 0x116   :  { %v8871_v27 = vpop.f32.mrf.mxu0 }
 0x117   :  { %12020 = vst [vmem:[#allocation2_spill] sm:$0xff] %v8871_v27  ;;  %v714_v29 = vadd.f32 %v8865_v19, %v713_v25 }
 0x118   :  { %v8874_v31 = vpop.f32.mrf.mxu0 }
 0x119   :  { %v715_v33 = vadd.f32 %v714_v29, %v8874_v31 }
 0x11a   :  { %v8877_v35 = vpop.f32.mrf.mxu0 }
 0x11b   :  { %12021 = vst [vmem:[#allocation3_spill] sm:$0xff] %v8877_v35  ;;  %v716_v37 = vadd.f32 %v8871_v27, %v715_v33 }
 0x11c   :  { %v8880_v39 = vpop.f32.mrf.mxu0 }
 0x11d   :  { %12022 = vst [vmem:[#allocation4_spill] sm:$0xff] %v8880_v39  ;;  %v717_v41 = vadd.f32 %v716_v37, %v8880_v39 }
 0x11e   :  { %v8883_v43 = vpop.f32.mrf.mxu0 }
 0x11f   :  { %12023 = vst [vmem:[#allocation5_spill] sm:$0xff] %v8883_v43  ;;  %v718_v45 = vadd.f32 %v8877_v35, %v717_v41 }
 0x120   :  { %v8886_v47 = vpop.f32.mrf.mxu0 }
 0x121   :  { %12024 = vst [vmem:[#allocation6_spill] sm:$0xff] %v8886_v47  ;;  %v719_v49 = vadd.f32 %v718_v45, %v8886_v47 }
 0x122   :  { %v8889_v51 = vpop.f32.mrf.mxu0 }
 0x123   :  { %12025 = vst [vmem:[#allocation7_spill] sm:$0xff] %v8889_v51  ;;  %v720_v53 = vadd.f32 %v8883_v43, %v719_v49 }
 0x124   :  { %v8892_v55 = vpop.f32.mrf.mxu0 }
 0x125   :  { %12026 = vst [vmem:[#allocation8_spill] sm:$0xff] %v8892_v55  ;;  %v721_v57 = vadd.f32 %v720_v53, %v8892_v55 }
 0x126   :  { %v7862_v59 = vpop.f32.mrf.mxu0 }
 0x127   :  { %v722_v61 = vadd.f32 %v8889_v51, %v721_v57 }
 0x128   :  { %v8896_v63 = vpop.f32.mrf.mxu0 }
 0x129   :  { %12027 = vst [vmem:[#allocation9_spill] sm:$0xff] %v8896_v63  ;;  %v723_v1 = vadd.f32 %v722_v61, %v8896_v63 }
 0x12a   :  { %v7865_v3 = vpop.f32.mrf.mxu0 }
 0x12b   :  { %v724_v9 = vadd.f32 %v7862_v59, %v723_v1 }
 0x12c   :  { %v8899_v13 = vpop.f32.mrf.mxu0 }
 0x12d   :  { %12028 = vst [vmem:[#allocation10_spill] sm:$0xff] %v8899_v13  ;;  %v725_v17 = vadd.f32 %v724_v9, %v8899_v13 }
 0x12e   :  { %v7868_v21 = vpop.f32.mrf.mxu0 }
 0x12f   :  { %v726_v25 = vadd.f32 %v7865_v3, %v725_v17 }
 0x130   :  { %v8902_v29 = vpop.f32.mrf.mxu0 }
 0x131   :  { %12029 = vst [vmem:[#allocation11_spill] sm:$0xff] %v8902_v29  ;;  %v727_v33 = vadd.f32 %v726_v25, %v8902_v29 }
 0x132   :  { %v7871_v37 = vpop.f32.mrf.mxu0 }
 0x133   :  { %v728_v41 = vadd.f32 %v7868_v21, %v727_v33 }
 0x134   :  { %v8905_v45 = vpop.f32.mrf.mxu0 }
 0x135   :  { %12030 = vst [vmem:[#allocation12_spill] sm:$0xff] %v8905_v45  ;;  %v729_v49 = vadd.f32 %v728_v41, %v8905_v45 }
 0x136   :  { %v7874_v53 = vpop.f32.mrf.mxu0 }
 0x137   :  { %v730_v57 = vadd.f32 %v7871_v37, %v729_v49 }
 0x138   :  { %v8908_v61 = vpop.f32.mrf.mxu0 }
 0x139   :  { %12031 = vst [vmem:[#allocation13_spill] sm:$0xff] %v8908_v61  ;;  %v731_v1 = vadd.f32 %v730_v57, %v8908_v61 }
 0x13a   :  { %v7877_v63 = vpop.f32.mrf.mxu0 }
 0x13b   :  { %v732_v9 = vadd.f32 %v7874_v53, %v731_v1 }
 0x13c   :  { %v8911_v13 = vpop.f32.mrf.mxu0 }
 0x13d   :  { %12032 = vst [vmem:[#allocation14_spill] sm:$0xff] %v8911_v13  ;;  %v733_v17 = vadd.f32 %v732_v9, %v8911_v13 }
 0x13e   :  { %v7880_v51 = vpop.f32.mrf.mxu0 }
 0x13f   :  { %v734_v25 = vadd.f32 %v7877_v63, %v733_v17 }
 0x140   :  { %v8914_v29 = vpop.f32.mrf.mxu0 }
 0x141   :  { %v735_v33 = vadd.f32 %v734_v25, %v8914_v29 }
 0x142   :  { %v7883_v55 = vpop.f32.mrf.mxu0 }
 0x143   :  { %v736_v41 = vadd.f32 %v7880_v51, %v735_v33 }
 0x144   :  { %v8917_v45 = vpop.f32.mrf.mxu0 }
 0x145   :  { %v737_v49 = vadd.f32 %v736_v41, %v8917_v45 }
 0x146   :  { %v7886_v43 = vpop.f32.mrf.mxu0 }
 0x147   :  { %v738_v57 = vadd.f32 %v7883_v55, %v737_v49 }
 0x148   :  { %v8920_v61 = vpop.f32.mrf.mxu0 }
 0x149   :  { %v739_v1 = vadd.f32 %v738_v57, %v8920_v61 }
 0x14b   :  { %v740_v47 = vadd.f32 %v7886_v43, %v739_v1 }
 0x14d   :  { %v741_v9 = vrot.slane %v740_v47, 4 }
 0x14f   :  { %v742_v13 = vadd.f32 %v741_v9, %v740_v47 }
 0x151   :  { %v743_v17 = vrot.slane %v742_v13, 2 }
 0x153   :  { %v744_v35 = vadd.f32 %v743_v17, %v742_v13 }
 0x155   :  { %v745_v39 = vrot.slane %v744_v35, 1 }
 0x157   :  { %v746_v27 = vadd.f32 %v745_v39, %v744_v35 }
 0x159   :  { %v8923_v25 = vmul.f32 0.001953125, %v746_v27 }
 0x15b   :  { %v8926_v33 = vsub.f32 %v7862_v59, %v8923_v25  ;;  %v8929_v41 = vsub.f32 %v7865_v3, %v8923_v25  ;;  %v8932_v49 = vsub.f32 %v7868_v21, %v8923_v25  ;;  %v8935_v57 = vsub.f32 %v7871_v37, %v8923_v25 }
 0x15c   :  { %v8938_v47 = vsub.f32 %v7874_v53, %v8923_v25  ;;  %v8941_v13 = vsub.f32 %v7877_v63, %v8923_v25  ;;  %v8944_v27 = vsub.f32 %v7880_v51, %v8923_v25  ;;  %v8947_v35 = vsub.f32 %v7883_v55, %v8923_v25 }
 0x15d   :  { %v8950_v39 = vsub.f32 %v7886_v43, %v8923_v25  ;;  %v8954_v59 = vsub.f32 %v8760_v5, %v8923_v25  ;;  %v8958_v3 = vsub.f32 %v8758_v4, %v8923_v25  ;;  %v8962_v63 = vsub.f32 %v8766_v8, %v8923_v25 }
 0x15e   :  { %v8970_v43 = vsub.f32 %v8762_v6, %v8923_v25  ;;  %v8974_v5 = vsub.f32 %v8772_v12, %v8923_v25  ;;  %v8980_v8 = vsub.f32 %v8769_v10, %v8923_v25  ;;  %v8986_v6 = vsub.f32 %v8778_v16, %v8923_v25 }
 0x15f   :  { %12033 = vst [vmem:[#allocation15_spill] sm:$0xff] %v8954_v59  ;;  %12034 = vst [vmem:[#allocation16_spill] sm:$0xff] %v8958_v3  ;;  %v813_v51 = vmul.f32 %v8954_v59, %v8954_v59  ;;  %v814_v55 = vmul.f32 %v8958_v3, %v8958_v3  ;;  %v815_v4 = vmul.f32 %v8962_v63, %v8962_v63 }
 0x160   :  { %12035 = vst [vmem:[#allocation17_spill] sm:$0xff] %v8962_v63  ;;  %12036 = vst [vmem:[#allocation18_spill] sm:$0xff] %v8970_v43  ;;  %v816_v37 = vmul.f32 %v8970_v43, %v8970_v43  ;;  %v817_v12 = vmul.f32 %v8974_v5, %v8974_v5  ;;  %v8992_v9 = vsub.f32 %v8775_v14, %v8923_v25 }
 0x161   :  { %12037 = vst [vmem:[#allocation19_spill] sm:$0xff] %v8974_v5  ;;  %v877_v21 = vadd.f32 %v814_v55, %v813_v51  ;;  %12038 = vst [vmem:[#allocation20_spill] sm:$0xff] %v8980_v8  ;;  %v818_v10 = vmul.f32 %v8980_v8, %v8980_v8  ;;  %v8998_v51 = vsub.f32 %v8784_v20, %v8923_v25  ;;  %v12060_v5 = vld [vmem:[#allocation11_spill] sm:$0xff] }
 0x162   :  { %12039 = vst [vmem:[#allocation21_spill] sm:$0xff] %v8986_v6  ;;  %12040 = vst [vmem:[#allocation22_spill] sm:$0xff] %v8992_v9  ;;  %v819_v16 = vmul.f32 %v8986_v6, %v8986_v6  ;;  %v820_v14 = vmul.f32 %v8992_v9, %v8992_v9 }
 0x163   :  { %v878_v53 = vadd.f32 %v877_v21, %v815_v4  ;;  %12041 = vst [vmem:[#allocation23_spill] sm:$0xff] %v8998_v51  ;;  %v9004_v4 = vsub.f32 %v8781_v18, %v8923_v25  ;;  %v821_v20 = vmul.f32 %v8998_v51, %v8998_v51 }
 0x165   :  { %v879_v1 = vadd.f32 %v878_v53, %v816_v37  ;;  %v9010_v37 = vsub.f32 %v8790_v24, %v8923_v25  ;;  %v822_v18 = vmul.f32 %v9004_v4, %v9004_v4 }
 0x167   :  { %v880_v17 = vadd.f32 %v879_v1, %v817_v12  ;;  %v9016_v12 = vsub.f32 %v8787_v22, %v8923_v25  ;;  %v823_v24 = vmul.f32 %v9010_v37, %v9010_v37 }
 0x169   :  { %v881_v55 = vadd.f32 %v880_v17, %v818_v10  ;;  %v9022_v10 = vsub.f32 %v8796_v28, %v8923_v25  ;;  %v824_v22 = vmul.f32 %v9016_v12, %v9016_v12 }
 0x16b   :  { %v882_v21 = vadd.f32 %v881_v55, %v819_v16  ;;  %v9028_v16 = vsub.f32 %v8793_v26, %v8923_v25  ;;  %v825_v28 = vmul.f32 %v9022_v10, %v9022_v10 }
 0x16d   :  { %v883_v53 = vadd.f32 %v882_v21, %v820_v14  ;;  %v9034_v14 = vsub.f32 %v8802_v32, %v8923_v25  ;;  %v826_v26 = vmul.f32 %v9028_v16, %v9028_v16 }
 0x16f   :  { %v884_v1 = vadd.f32 %v883_v53, %v821_v20  ;;  %v9040_v20 = vsub.f32 %v8799_v30, %v8923_v25  ;;  %v827_v32 = vmul.f32 %v9034_v14, %v9034_v14 }
 0x171   :  { %v885_v17 = vadd.f32 %v884_v1, %v822_v18  ;;  %v9046_v18 = vsub.f32 %v8808_v36, %v8923_v25  ;;  %v828_v30 = vmul.f32 %v9040_v20, %v9040_v20 }
 0x173   :  { %v886_v55 = vadd.f32 %v885_v17, %v823_v24  ;;  %12042 = vst [vmem:[#allocation24_spill] sm:$0xff] %v9046_v18  ;;  %v9052_v24 = vsub.f32 %v8805_v34, %v8923_v25  ;;  %v829_v36 = vmul.f32 %v9046_v18, %v9046_v18 }
 0x175   :  { %v887_v21 = vadd.f32 %v886_v55, %v824_v22  ;;  %12043 = vst [vmem:[#allocation25_spill] sm:$0xff] %v9052_v24  ;;  %v9058_v22 = vsub.f32 %v8814_v40, %v8923_v25  ;;  %v830_v34 = vmul.f32 %v9052_v24, %v9052_v24 }
 0x177   :  { %v888_v53 = vadd.f32 %v887_v21, %v825_v28  ;;  %12044 = vst [vmem:[#allocation26_spill] sm:$0xff] %v9058_v22  ;;  %v9064_v28 = vsub.f32 %v8811_v38, %v8923_v25  ;;  %v831_v40 = vmul.f32 %v9058_v22, %v9058_v22 }
 0x179   :  { %v889_v1 = vadd.f32 %v888_v53, %v826_v26  ;;  %12045 = vst [vmem:[#allocation27_spill] sm:$0xff] %v9064_v28  ;;  %v9070_v26 = vsub.f32 %v8820_v44, %v8923_v25  ;;  %v832_v38 = vmul.f32 %v9064_v28, %v9064_v28 }
 0x17b   :  { %v890_v17 = vadd.f32 %v889_v1, %v827_v32  ;;  %12046 = vst [vmem:[#allocation28_spill] sm:$0xff] %v9070_v26  ;;  %v9076_v32 = vsub.f32 %v8817_v42, %v8923_v25  ;;  %v833_v44 = vmul.f32 %v9070_v26, %v9070_v26  ;;  %v9242_v26 = vsub.f32 %v12060_v5, %v8923_v25 }
 0x17c   :  { %v864_v5 = vmul.f32 %v8932_v49, %v8932_v49 }
 0x17d   :  { %v891_v55 = vadd.f32 %v890_v17, %v828_v30  ;;  %12047 = vst [vmem:[#allocation29_spill] sm:$0xff] %v9076_v32  ;;  %v9082_v30 = vsub.f32 %v8826_v48, %v8923_v25  ;;  %v834_v42 = vmul.f32 %v9076_v32, %v9076_v32 }
 0x17f   :  { %v892_v21 = vadd.f32 %v891_v55, %v829_v36  ;;  %12048 = vst [vmem:[#allocation30_spill] sm:$0xff] %v9082_v30  ;;  %v9088_v36 = vsub.f32 %v8823_v46, %v8923_v25  ;;  %v835_v48 = vmul.f32 %v9082_v30, %v9082_v30 }
 0x181   :  { %v893_v53 = vadd.f32 %v892_v21, %v830_v34  ;;  %12049 = vst [vmem:[#allocation31_spill] sm:$0xff] %v9088_v36  ;;  %v9094_v34 = vsub.f32 %v8832_v52, %v8923_v25  ;;  %v836_v46 = vmul.f32 %v9088_v36, %v9088_v36 }
 0x183   :  { %v894_v1 = vadd.f32 %v893_v53, %v831_v40  ;;  %12050 = vst [vmem:[#allocation32_spill] sm:$0xff] %v9094_v34  ;;  %v9100_v40 = vsub.f32 %v8829_v50, %v8923_v25  ;;  %v837_v52 = vmul.f32 %v9094_v34, %v9094_v34 }
 0x185   :  { %v895_v17 = vadd.f32 %v894_v1, %v832_v38  ;;  %v9106_v38 = vsub.f32 %v8838_v56, %v8923_v25  ;;  %v838_v50 = vmul.f32 %v9100_v40, %v9100_v40 }
 0x187   :  { %v896_v55 = vadd.f32 %v895_v17, %v833_v44  ;;  %v9112_v44 = vsub.f32 %v8835_v54, %v8923_v25  ;;  %v839_v56 = vmul.f32 %v9106_v38, %v9106_v38 }
 0x189   :  { %v897_v21 = vadd.f32 %v896_v55, %v834_v42  ;;  %v9118_v42 = vsub.f32 %v8844_v60, %v8923_v25  ;;  %v840_v54 = vmul.f32 %v9112_v44, %v9112_v44 }
 0x18b   :  { %v898_v53 = vadd.f32 %v897_v21, %v835_v48  ;;  %v9124_v48 = vsub.f32 %v8841_v58, %v8923_v25  ;;  %v841_v60 = vmul.f32 %v9118_v42, %v9118_v42 }
 0x18d   :  { %v899_v1 = vadd.f32 %v898_v53, %v836_v46  ;;  %v9130_v46 = vsub.f32 %v8850_v0, %v8923_v25  ;;  %v842_v58 = vmul.f32 %v9124_v48, %v9124_v48 }
 0x18f   :  { %v900_v17 = vadd.f32 %v899_v1, %v837_v52  ;;  %v9136_v52 = vsub.f32 %v8847_v62, %v8923_v25  ;;  %v843_v0 = vmul.f32 %v9130_v46, %v9130_v46 }
 0x191   :  { %v901_v55 = vadd.f32 %v900_v17, %v838_v50  ;;  %v9142_v50 = vsub.f32 %v8856_v7, %v8923_v25  ;;  %v844_v62 = vmul.f32 %v9136_v52, %v9136_v52 }
 0x193   :  { %v902_v21 = vadd.f32 %v901_v55, %v839_v56  ;;  %v9148_v56 = vsub.f32 %v8853_v2, %v8923_v25  ;;  %v845_v7 = vmul.f32 %v9142_v50, %v9142_v50 }
 0x195   :  { %v903_v53 = vadd.f32 %v902_v21, %v840_v54  ;;  %v9154_v54 = vsub.f32 %v8862_v15, %v8923_v25  ;;  %v846_v2 = vmul.f32 %v9148_v56, %v9148_v56 }
 0x197   :  { %v904_v1 = vadd.f32 %v903_v53, %v841_v60  ;;  %v9160_v60 = vsub.f32 %v8859_v11, %v8923_v25  ;;  %v847_v15 = vmul.f32 %v9154_v54, %v9154_v54 }
 0x199   :  { %v905_v17 = vadd.f32 %v904_v1, %v842_v58  ;;  %v9166_v58 = vsub.f32 %v8868_v23, %v8923_v25  ;;  %v848_v11 = vmul.f32 %v9160_v60, %v9160_v60 }
 0x19b   :  { %v906_v55 = vadd.f32 %v905_v17, %v843_v0  ;;  %v9172_v0 = vsub.f32 %v8865_v19, %v8923_v25  ;;  %v849_v23 = vmul.f32 %v9166_v58, %v9166_v58 }
 0x19d   :  { %v907_v21 = vadd.f32 %v906_v55, %v844_v62  ;;  %v9178_v62 = vsub.f32 %v8874_v31, %v8923_v25  ;;  %v850_v19 = vmul.f32 %v9172_v0, %v9172_v0 }
 0x19f   :  { %v908_v53 = vadd.f32 %v907_v21, %v845_v7  ;;  %v12051_v7 = vld [vmem:[#allocation2_spill] sm:$0xff]  ;;  %v851_v31 = vmul.f32 %v9178_v62, %v9178_v62 }
 0x1a0   :  { %v9184_v21 = vsub.f32 %v12051_v7, %v8923_v25  ;;  %v12054_v7 = vld [vmem:[#allocation6_spill] sm:$0xff] }
 0x1a1   :  { %v909_v1 = vadd.f32 %v908_v53, %v846_v2  ;;  %v12052_v53 = vld [vmem:[#allocation4_spill] sm:$0xff]  ;;  %v9202_v3 = vsub.f32 %v12054_v7, %v8923_v25  ;;  %v12057_v7 = vld [vmem:[#allocation7_spill] sm:$0xff] }
 0x1a2   :  { %v9190_v59 = vsub.f32 %v12052_v53, %v8923_v25  ;;  %v12055_v53 = vld [vmem:[#allocation5_spill] sm:$0xff]  ;;  %v9220_v22 = vsub.f32 %v12057_v7, %v8923_v25 }
 0x1a3   :  { %v910_v17 = vadd.f32 %v909_v1, %v847_v15  ;;  %v12053_v1 = vld [vmem:[#allocation3_spill] sm:$0xff]  ;;  %v9208_v24 = vsub.f32 %v12055_v53, %v8923_v25  ;;  %v12058_v53 = vld [vmem:[#allocation9_spill] sm:$0xff] }
 0x1a4   :  { %v9196_v18 = vsub.f32 %v12053_v1, %v8923_v25  ;;  %v12056_v1 = vld [vmem:[#allocation8_spill] sm:$0xff]  ;;  %v9226_v43 = vsub.f32 %v12058_v53, %v8923_v25 }
 0x1a5   :  { %v911_v55 = vadd.f32 %v910_v17, %v848_v11  ;;  %v852_v11 = vmul.f32 %v9184_v21, %v9184_v21  ;;  %v9214_v63 = vsub.f32 %v12056_v1, %v8923_v25  ;;  %v858_v1 = vmul.f32 %v9220_v22, %v9220_v22 }
 0x1a6   :  { %v859_v28 = vmul.f32 %v9226_v43, %v9226_v43 }
 0x1a7   :  { %v912_v2 = vadd.f32 %v911_v55, %v849_v23  ;;  %v853_v23 = vmul.f32 %v9190_v59, %v9190_v59 }
 0x1a9   :  { %v913_v15 = vadd.f32 %v912_v2, %v850_v19  ;;  %v854_v19 = vmul.f32 %v9196_v18, %v9196_v18 }
 0x1ab   :  { %v914_v17 = vadd.f32 %v913_v15, %v851_v31  ;;  %v855_v31 = vmul.f32 %v9202_v3, %v9202_v3 }
 0x1ad   :  { %v915_v55 = vadd.f32 %v914_v17, %v852_v11  ;;  %v856_v11 = vmul.f32 %v9208_v24, %v9208_v24 }
 0x1af   :  { %v916_v2 = vadd.f32 %v915_v55, %v853_v23  ;;  %v857_v23 = vmul.f32 %v9214_v63, %v9214_v63 }
 0x1b1   :  { %v917_v15 = vadd.f32 %v916_v2, %v854_v19  ;;  %v12059_v2 = vld [vmem:[#allocation10_spill] sm:$0xff] }
 0x1b2   :  { %v9234_v7 = vsub.f32 %v12059_v2, %v8923_v25  ;;  %v12061_v2 = vld [vmem:[#allocation12_spill] sm:$0xff] }
 0x1b3   :  { %v918_v17 = vadd.f32 %v917_v15, %v855_v31  ;;  %v860_v15 = vmul.f32 %v8926_v33, %v8926_v33  ;;  %v9250_v8 = vsub.f32 %v12061_v2, %v8923_v25  ;;  %v12063_v2 = vld [vmem:[#allocation14_spill] sm:$0xff] }
 0x1b4   :  { %v9266_v6 = vsub.f32 %v12063_v2, %v8923_v25  ;;  %v9282_v2 = vsub.f32 %v8917_v45, %v8923_v25 }
 0x1b5   :  { %v919_v55 = vadd.f32 %v918_v17, %v856_v11  ;;  %v861_v11 = vmul.f32 %v9234_v7, %v9234_v7 }
 0x1b7   :  { %v920_v19 = vadd.f32 %v919_v55, %v857_v23  ;;  %v862_v23 = vmul.f32 %v8929_v41, %v8929_v41 }
 0x1b9   :  { %v921_v31 = vadd.f32 %v920_v19, %v858_v1  ;;  %v863_v1 = vmul.f32 %v9242_v26, %v9242_v26 }
 0x1bb   :  { %v922_v53 = vadd.f32 %v921_v31, %v859_v28  ;;  %v12062_v31 = vld [vmem:[#allocation13_spill] sm:$0xff] }
 0x1bc   :  { %v9258_v32 = vsub.f32 %v12062_v31, %v8923_v25  ;;  %v9274_v31 = vsub.f32 %v8914_v29, %v8923_v25  ;;  %v872_v29 = vmul.f32 %v8944_v27, %v8944_v27 }
 0x1bd   :  { %v923_v17 = vadd.f32 %v922_v53, %v860_v15  ;;  %v865_v15 = vmul.f32 %v9250_v8, %v9250_v8 }
 0x1bf   :  { %v924_v55 = vadd.f32 %v923_v17, %v861_v11  ;;  %v866_v11 = vmul.f32 %v8935_v57, %v8935_v57 }
 0x1c1   :  { %v925_v28 = vadd.f32 %v924_v55, %v862_v23  ;;  %v867_v23 = vmul.f32 %v9258_v32, %v9258_v32 }
 0x1c3   :  { %v926_v19 = vadd.f32 %v925_v28, %v863_v1  ;;  %v868_v1 = vmul.f32 %v8938_v47, %v8938_v47 }
 0x1c5   :  { %v927_v53 = vadd.f32 %v926_v19, %v864_v5  ;;  %v869_v5 = vmul.f32 %v9266_v6, %v9266_v6 }
 0x1c7   :  { %v928_v17 = vadd.f32 %v927_v53, %v865_v15  ;;  %v870_v15 = vmul.f32 %v8941_v13, %v8941_v13 }
 0x1c9   :  { %v929_v55 = vadd.f32 %v928_v17, %v866_v11  ;;  %v871_v11 = vmul.f32 %v9274_v31, %v9274_v31 }
 0x1cb   :  { %v930_v28 = vadd.f32 %v929_v55, %v867_v23  ;;  %v811_v55 = vsub.f32 %v8920_v61, %v8923_v25  ;;  %v876_v25 = vmul.f32 %v8950_v39, %v8950_v39 }
 0x1cd   :  { %v931_v19 = vadd.f32 %v930_v28, %v868_v1  ;;  %v873_v1 = vmul.f32 %v9282_v2, %v9282_v2 }
 0x1cf   :  { %v932_v53 = vadd.f32 %v931_v19, %v869_v5  ;;  %v874_v5 = vmul.f32 %v8947_v35, %v8947_v35  ;;  %v1220_v19 = vld [vmem:[%s11979_s4 + $0x8] sm:$0xff] }
 0x1d0   :  { %1297 = vmatprep.mubr.f32.mxu1 %v1220_v19  ;;  %v9313_v19 = vld [vmem:[%s11981_s3] ss:$0 sm:$0xff] }
 0x1d1   :  { %v933_v17 = vadd.f32 %v932_v53, %v870_v15  ;;  %v6378_v15 = vld [vmem:[%s11979_s4 + $0x1c8] sm:$0xff]  ;;  %v875_v53 = vmul.f32 %v811_v55, %v811_v55 }
 0x1d2   :  { %1778 = vmatprep.mubr.f32.mxu0 %v6378_v15 }
 0x1d3   :  { %v934_v23 = vadd.f32 %v933_v17, %v871_v11 }
 0x1d5   :  { %v935_v28 = vadd.f32 %v934_v23, %v872_v29 }
 0x1d7   :  { %v936_v45 = vadd.f32 %v935_v28, %v873_v1 }
 0x1d9   :  { %v937_v61 = vadd.f32 %v936_v45, %v874_v5  ;;  %v9307_v5 = vld [vmem:[%s11980_s2] ss:$0 sm:$0xff] }
 0x1db   :  { %v938_v11 = vadd.f32 %v937_v61, %v875_v53 }
 0x1dd   :  { %v939_v17 = vadd.f32 %v938_v11, %v876_v25 }
 0x1df   :  { %v940_v29 = vrot.slane %v939_v17, 4 }
 0x1e1   :  { %v941_v23 = vadd.f32 %v940_v29, %v939_v17 }
 0x1e3   :  { %v942_v1 = vrot.slane %v941_v23, 2 }
 0x1e5   :  { %v943_v28 = vadd.f32 %v942_v1, %v941_v23 }
 0x1e7   :  { %v944_v30 = vrot.slane %v943_v28, 1 }
 0x1e9   :  { %v945_v9 = vadd.f32 %v944_v30, %v943_v28 }
 0x1eb   :  { %v946_v36 = vmul.f32 0.001953125, %v945_v9 }
 0x1ed   :  { %v947_v51 = vadd.f32 1e-05, %v946_v36 }
 0x1ef   :  { %8283 = vrsqrt.f32 %v947_v51 }
 0x1fc   :  { %v9302_v34 = vpop.eup %8283 }
 0x1fd   :  { %v1011_v45 = vmul.f32 %v9302_v34, %v811_v55  ;;  %v981_v51 = vmul.f32 %v9302_v34, %v9142_v50  ;;  %v982_v30 = vmul.f32 %v9302_v34, %v9148_v56  ;;  %v983_v36 = vmul.f32 %v9302_v34, %v9154_v54 }
 0x1fe   :  { %v984_v55 = vmul.f32 %v9302_v34, %v9160_v60  ;;  %v985_v53 = vmul.f32 %v9302_v34, %v9166_v58  ;;  %v986_v61 = vmul.f32 %v9302_v34, %v9172_v0  ;;  %v987_v25 = vmul.f32 %v9302_v34, %v9178_v62 }
 0x1ff   :  { %v1082_v15 = vmul.f32 %v9307_v5, %v1011_v45  ;;  %v988_v50 = vmul.f32 %v9302_v34, %v9184_v21  ;;  %v989_v56 = vmul.f32 %v9302_v34, %v9190_v59  ;;  %v990_v54 = vmul.f32 %v9302_v34, %v9196_v18 }
 0x200   :  { %v991_v60 = vmul.f32 %v9302_v34, %v9202_v3  ;;  %v992_v58 = vmul.f32 %v9302_v34, %v9208_v24  ;;  %v993_v0 = vmul.f32 %v9302_v34, %v9214_v63  ;;  %v994_v62 = vmul.f32 %v9302_v34, %v9220_v22 }
 0x201   :  { %v9317_v9 = vadd.f32 %v9313_v19, %v1082_v15  ;;  %v995_v21 = vmul.f32 %v9302_v34, %v9226_v43  ;;  %v996_v59 = vmul.f32 %v9302_v34, %v8926_v33  ;;  %v997_v18 = vmul.f32 %v9302_v34, %v9234_v7 }
 0x202   :  { %v998_v3 = vmul.f32 %v9302_v34, %v8929_v41  ;;  %v999_v24 = vmul.f32 %v9302_v34, %v9242_v26  ;;  %v1000_v63 = vmul.f32 %v9302_v34, %v8932_v49  ;;  %v1001_v22 = vmul.f32 %v9302_v34, %v9250_v8 }
 0x203   :  { %12064 = vst [vmem:[#allocation2_spill] sm:$0xff] %v9317_v9  ;;  %v1002_v43 = vmul.f32 %v9302_v34, %v8935_v57  ;;  %v1003_v33 = vmul.f32 %v9302_v34, %v9258_v32  ;;  %v1004_v7 = vmul.f32 %v9302_v34, %v8938_v47  ;;  %v1005_v41 = vmul.f32 %v9302_v34, %v9266_v6 }
 0x204   :  { %v1006_v26 = vmul.f32 %v9302_v34, %v8941_v13  ;;  %v1007_v49 = vmul.f32 %v9302_v34, %v9274_v31  ;;  %v1008_v8 = vmul.f32 %v9302_v34, %v8944_v27  ;;  %v1009_v57 = vmul.f32 %v9302_v34, %v9282_v2 }
 0x205   :  { %v1010_v32 = vmul.f32 %v9302_v34, %v8947_v35  ;;  %v1012_v47 = vmul.f32 %v9302_v34, %v8950_v39  ;;  %v1052_v6 = vmul.f32 %v9307_v5, %v981_v51  ;;  %v1053_v11 = vmul.f32 %v9307_v5, %v982_v30 }
 0x206   :  { %v1054_v13 = vmul.f32 %v9307_v5, %v983_v36  ;;  %v1055_v31 = vmul.f32 %v9307_v5, %v984_v55  ;;  %v1056_v17 = vmul.f32 %v9307_v5, %v985_v53  ;;  %v1057_v27 = vmul.f32 %v9307_v5, %v986_v61 }
 0x207   :  { %v1058_v2 = vmul.f32 %v9307_v5, %v987_v25  ;;  %v1059_v29 = vmul.f32 %v9307_v5, %v988_v50  ;;  %v1060_v35 = vmul.f32 %v9307_v5, %v989_v56  ;;  %v1061_v39 = vmul.f32 %v9307_v5, %v990_v54 }
 0x208   :  { %v1062_v23 = vmul.f32 %v9307_v5, %v991_v60  ;;  %v1063_v1 = vmul.f32 %v9307_v5, %v992_v58  ;;  %v1064_v28 = vmul.f32 %v9307_v5, %v993_v0  ;;  %v1065_v45 = vmul.f32 %v9307_v5, %v994_v62 }
 0x209   :  { %v1066_v15 = vmul.f32 %v9307_v5, %v995_v21  ;;  %v1067_v51 = vmul.f32 %v9307_v5, %v996_v59  ;;  %v1068_v30 = vmul.f32 %v9307_v5, %v997_v18  ;;  %v1069_v36 = vmul.f32 %v9307_v5, %v998_v3 }
 0x20a   :  { %v1070_v55 = vmul.f32 %v9307_v5, %v999_v24  ;;  %v1071_v53 = vmul.f32 %v9307_v5, %v1000_v63  ;;  %v1072_v61 = vmul.f32 %v9307_v5, %v1001_v22  ;;  %v1073_v25 = vmul.f32 %v9307_v5, %v1002_v43 }
 0x20b   :  { %v1074_v50 = vmul.f32 %v9307_v5, %v1003_v33  ;;  %v1075_v56 = vmul.f32 %v9307_v5, %v1004_v7  ;;  %v1076_v54 = vmul.f32 %v9307_v5, %v1005_v41  ;;  %v1077_v60 = vmul.f32 %v9307_v5, %v1006_v26 }
 0x20c   :  { %v1078_v58 = vmul.f32 %v9307_v5, %v1007_v49  ;;  %v1079_v0 = vmul.f32 %v9307_v5, %v1008_v8  ;;  %v1080_v62 = vmul.f32 %v9307_v5, %v1009_v57  ;;  %v1081_v21 = vmul.f32 %v9307_v5, %v1010_v32 }
 0x20d   :  { %v1083_v59 = vmul.f32 %v9307_v5, %v1012_v47  ;;  %v964_v18 = vmul.f32 %v9302_v34, %v9040_v20  ;;  %v963_v3 = vmul.f32 %v9302_v34, %v9034_v14  ;;  %v979_v24 = vmul.f32 %v9302_v34, %v9130_v46 }
 0x20e   :  { %v980_v63 = vmul.f32 %v9302_v34, %v9136_v52  ;;  %v9422_v43 = vadd.f32 %v9313_v19, %v1052_v6  ;;  %v9425_v33 = vadd.f32 %v9313_v19, %v1053_v11  ;;  %v9428_v7 = vadd.f32 %v9313_v19, %v1054_v13 }
 0x20f   :  { %v1035_v22 = vmul.f32 %v9307_v5, %v964_v18  ;;  %v9431_v20 = vadd.f32 %v9313_v19, %v1055_v31  ;;  %v9434_v14 = vadd.f32 %v9313_v19, %v1056_v17  ;;  %v9437_v46 = vadd.f32 %v9313_v19, %v1057_v27 }
 0x210   :  { %12065 = vst [vmem:[#allocation4_spill] sm:$0xff] %v9422_v43  ;;  %12066 = vst [vmem:[#allocation3_spill] sm:$0xff] %v9425_v33  ;;  %v9440_v52 = vadd.f32 %v9313_v19, %v1058_v2  ;;  %v9443_v41 = vadd.f32 %v9313_v19, %v1059_v29  ;;  %v9446_v26 = vadd.f32 %v9313_v19, %v1060_v35 }
 0x211   :  { %12067 = vst [vmem:[#allocation6_spill] sm:$0xff] %v9428_v7  ;;  %12068 = vst [vmem:[#allocation5_spill] sm:$0xff] %v9431_v20  ;;  %v9449_v49 = vadd.f32 %v9313_v19, %v1061_v39  ;;  %v9452_v8 = vadd.f32 %v9313_v19, %v1062_v23  ;;  %v9455_v57 = vadd.f32 %v9313_v19, %v1063_v1 }
 0x212   :  { %12069 = vst [vmem:[#allocation8_spill] sm:$0xff] %v9434_v14  ;;  %12070 = vst [vmem:[#allocation7_spill] sm:$0xff] %v9437_v46  ;;  %v9458_v32 = vadd.f32 %v9313_v19, %v1064_v28  ;;  %v9461_v47 = vadd.f32 %v9313_v19, %v1065_v45  ;;  %v9464_v6 = vadd.f32 %v9313_v19, %v1066_v15 }
 0x213   :  { %12071 = vst [vmem:[#allocation9_spill] sm:$0xff] %v9440_v52  ;;  %12072 = vst [vmem:[#allocation10_spill] sm:$0xff] %v9443_v41  ;;  %v9467_v11 = vadd.f32 %v9313_v19, %v1067_v51  ;;  %v9470_v13 = vadd.f32 %v9313_v19, %v1068_v30  ;;  %v9473_v31 = vadd.f32 %v9313_v19, %v1069_v36 }
 0x214   :  { %12073 = vst [vmem:[#allocation11_spill] sm:$0xff] %v9446_v26  ;;  %12074 = vst [vmem:[#allocation12_spill] sm:$0xff] %v9449_v49  ;;  %v9476_v17 = vadd.f32 %v9313_v19, %v1070_v55  ;;  %v9479_v27 = vadd.f32 %v9313_v19, %v1071_v53  ;;  %v9482_v2 = vadd.f32 %v9313_v19, %v1072_v61 }
 0x215   :  { %12075 = vst [vmem:[#allocation13_spill] sm:$0xff] %v9452_v8  ;;  %12076 = vst [vmem:[#allocation14_spill] sm:$0xff] %v9455_v57  ;;  %v9485_v29 = vadd.f32 %v9313_v19, %v1073_v25  ;;  %v9488_v35 = vadd.f32 %v9313_v19, %v1074_v50  ;;  %v9491_v39 = vadd.f32 %v9313_v19, %v1075_v56 }
 0x216   :  { %12077 = vst [vmem:[#allocation33_spill] sm:$0xff] %v9458_v32  ;;  %12078 = vst [vmem:[#allocation34_spill] sm:$0xff] %v9461_v47  ;;  %v9494_v23 = vadd.f32 %v9313_v19, %v1076_v54  ;;  %v9497_v1 = vadd.f32 %v9313_v19, %v1077_v60  ;;  %v9500_v28 = vadd.f32 %v9313_v19, %v1078_v58 }
 0x217   :  { %12079 = vst [vmem:[#allocation35_spill] sm:$0xff] %v9464_v6  ;;  %12080 = vst [vmem:[#allocation36_spill] sm:$0xff] %v9467_v11  ;;  %v9503_v45 = vadd.f32 %v9313_v19, %v1079_v0  ;;  %v9506_v15 = vadd.f32 %v9313_v19, %v1080_v62  ;;  %v9509_v51 = vadd.f32 %v9313_v19, %v1081_v21 }
 0x218   :  { %12081 = vst [vmem:[#allocation37_spill] sm:$0xff] %v9470_v13  ;;  %12082 = vst [vmem:[#allocation38_spill] sm:$0xff] %v9473_v31  ;;  %v978_v30 = vmul.f32 %v9302_v34, %v9124_v48  ;;  %v1051_v36 = vmul.f32 %v9307_v5, %v980_v63  ;;  %v9515_v55 = vadd.f32 %v9313_v19, %v1083_v59 }
 0x219   :  { %12083 = vst [vmem:[#allocation39_spill] sm:$0xff] %v9476_v17  ;;  %12084 = vst [vmem:[#allocation40_spill] sm:$0xff] %v9479_v27  ;;  %v962_v53 = vmul.f32 %v9302_v34, %v9028_v16  ;;  %v977_v61 = vmul.f32 %v9302_v34, %v9118_v42  ;;  %v1050_v25 = vmul.f32 %v9307_v5, %v979_v24 }
 0x21a   :  { %12085 = vst [vmem:[#allocation41_spill] sm:$0xff] %v9482_v2  ;;  %12086 = vst [vmem:[#allocation42_spill] sm:$0xff] %v9485_v29  ;;  %v961_v50 = vmul.f32 %v9302_v34, %v9022_v10  ;;  %v1034_v56 = vmul.f32 %v9307_v5, %v963_v3  ;;  %v1106_v48 = vadd.f32 %v9313_v19, %v1035_v22 }
 0x21b   :  { %12087 = vst [vmem:[#allocation43_spill] sm:$0xff] %v9488_v35  ;;  %12088 = vst [vmem:[#allocation44_spill] sm:$0xff] %v9491_v39  ;;  %v976_v54 = vmul.f32 %v9302_v34, %v9112_v44  ;;  %v1049_v60 = vmul.f32 %v9307_v5, %v978_v30  ;;  %v1122_v58 = vadd.f32 %v9313_v19, %v1051_v36  ;;  %v12096_v30 = vld [vmem:[#allocation32_spill] sm:$0xff] }
 0x21c   :  { %12089 = vst [vmem:[#allocation45_spill] sm:$0xff] %v9494_v23  ;;  %12090 = vst [vmem:[#allocation46_spill] sm:$0xff] %v9497_v1  ;;  %v960_v16 = vmul.f32 %v9302_v34, %v9016_v12  ;;  %v1033_v42 = vmul.f32 %v9307_v5, %v962_v53  ;;  %v975_v0 = vmul.f32 %v9302_v34, %v9106_v38  ;;  %v9541_v18 = vmax.f32 %v1106_v48, 0.0 }
 0x21d   :  { %12091 = vst [vmem:[#allocation47_spill] sm:$0xff] %v9500_v28  ;;  %12092 = vst [vmem:[#allocation48_spill] sm:$0xff] %v9503_v45  ;;  %v1048_v10 = vmul.f32 %v9307_v5, %v977_v61  ;;  %v1121_v62 = vadd.f32 %v9313_v19, %v1050_v25  ;;  %v959_v21 = vmul.f32 %v9302_v34, %v9010_v37  ;;  %v9547_v24 = vmax.f32 %v1122_v58, 0.0  ;;  %v12097_v25 = vld [vmem:[#allocation23_spill] sm:$0xff] }
 0x21e   :  { %12093 = vst [vmem:[#allocation49_spill] sm:$0xff] %v9506_v15  ;;  %12094 = vst [vmem:[#allocation50_spill] sm:$0xff] %v9509_v51  ;;  %v1032_v44 = vmul.f32 %v9307_v5, %v961_v50  ;;  %v1105_v59 = vadd.f32 %v9313_v19, %v1034_v56  ;;  %v974_v12 = vmul.f32 %v9302_v34, %v9100_v40 }
 0x21f   :  { %12095 = vst [vmem:[#allocation51_spill] sm:$0xff] %v9515_v55  ;;  %v1047_v3 = vmul.f32 %v9307_v5, %v976_v54  ;;  %v1120_v38 = vadd.f32 %v9313_v19, %v1049_v60  ;;  %v958_v63 = vmul.f32 %v9302_v34, %v9004_v4  ;;  %v1031_v37 = vmul.f32 %v9307_v5, %v960_v16  ;;  %v12098_v54 = vld [vmem:[#allocation31_spill] sm:$0xff] }
 0x220   :  { %v1104_v22 = vadd.f32 %v9313_v19, %v1033_v42  ;;  %v973_v36 = vmul.f32 %v9302_v34, %v12096_v30  ;;  %v1046_v53 = vmul.f32 %v9307_v5, %v975_v0  ;;  %v1119_v40 = vadd.f32 %v9313_v19, %v1048_v10  ;;  %6613 = vmatprep.subr.mxu1 %v9547_v24  ;;  %v12099_v0 = vld [vmem:[#allocation22_spill] sm:$0xff] }
 0x221   :  { %v9557_v61 = vmax.f32 %v1121_v62, 0.0  ;;  %6825 = vmatprep.subr.mxu0 %v9547_v24  ;;  %v957_v4 = vmul.f32 %v9302_v34, %v12097_v25  ;;  %v1030_v50 = vmul.f32 %v9307_v5, %v959_v21  ;;  %v1103_v56 = vadd.f32 %v9313_v19, %v1032_v44  ;;  %6614 = vmatpush3.msra.mxu1 %v9541_v18 }
 0x222   :  { %v9565_v48 = vmax.f32 %v1105_v59, 0.0  ;;  %6826 = vmatpush3.msra.mxu0 %v9541_v18  ;;  %v972_v60 = vmul.f32 %v9302_v34, %v12098_v54  ;;  %v1045_v58 = vmul.f32 %v9307_v5, %v974_v12  ;;  %v1118_v16 = vadd.f32 %v9313_v19, %v1047_v3  ;;  %v12100_v59 = vld [vmem:[#allocation30_spill] sm:$0xff] }
 0x223   :  { %v9573_v42 = vmax.f32 %v1120_v38, 0.0  ;;  %6615 = vmatprep.subr.mxu1 %v9557_v61  ;;  %6827 = vmatprep.subr.mxu0 %v9557_v61  ;;  %v956_v10 = vmul.f32 %v9302_v34, %v12099_v0  ;;  %v1029_v62 = vmul.f32 %v9307_v5, %v958_v63  ;;  %v1102_v21 = vadd.f32 %v9313_v19, %v1031_v37  ;;  %v12101_v63 = vld [vmem:[#allocation21_spill] sm:$0xff] }
 0x224   :  { %v9581_v44 = vmax.f32 %v1104_v22, 0.0  ;;  %6616 = vmatpush3.msra.mxu1 %v9565_v48  ;;  %6828 = vmatpush3.msra.mxu0 %v9565_v48  ;;  %v971_v12 = vmul.f32 %v9302_v34, %v12100_v59  ;;  %v1044_v3 = vmul.f32 %v9307_v5, %v973_v36  ;;  %v1117_v38 = vadd.f32 %v9313_v19, %v1046_v53  ;;  %v12102_v36 = vld [vmem:[#allocation29_spill] sm:$0xff] }
 0x225   :  { %v9589_v30 = vmax.f32 %v1119_v40, 0.0  ;;  %6617 = vmatprep.subr.mxu1 %v9573_v42  ;;  %6829 = vmatprep.subr.mxu0 %v9573_v42  ;;  %v955_v37 = vmul.f32 %v9302_v34, %v12101_v63  ;;  %v1028_v22 = vmul.f32 %v9307_v5, %v957_v4  ;;  %v1101_v25 = vadd.f32 %v9313_v19, %v1030_v50  ;;  %v12103_v4 = vld [vmem:[#allocation20_spill] sm:$0xff] }
 0x226   :  { %v9597_v54 = vmax.f32 %v1103_v56, 0.0  ;;  %6618 = vmatpush3.msra.mxu1 %v9581_v44  ;;  %6830 = vmatpush3.msra.mxu0 %v9581_v44  ;;  %v970_v53 = vmul.f32 %v9302_v34, %v12102_v36  ;;  %v1043_v40 = vmul.f32 %v9307_v5, %v972_v60  ;;  %v1116_v0 = vadd.f32 %v9313_v19, %v1045_v58  ;;  %v12104_v60 = vld [vmem:[#allocation28_spill] sm:$0xff] }
 0x227   :  { %v9605_v59 = vmax.f32 %v1118_v16, 0.0  ;;  %6619 = vmatprep.subr.mxu1 %v9589_v30  ;;  %6831 = vmatprep.subr.mxu0 %v9589_v30  ;;  %v954_v50 = vmul.f32 %v9302_v34, %v12103_v4  ;;  %v1027_v56 = vmul.f32 %v9307_v5, %v956_v10  ;;  %v1100_v63 = vadd.f32 %v9313_v19, %v1029_v62  ;;  %v12105_v10 = vld [vmem:[#allocation19_spill] sm:$0xff] }
 0x228   :  { %v9613_v43 = vmax.f32 %v1102_v21, 0.0  ;;  %6620 = vmatpush3.msra.mxu1 %v9597_v54  ;;  %6832 = vmatpush3.msra.mxu0 %v9597_v54  ;;  %v969_v58 = vmul.f32 %v9302_v34, %v12104_v60  ;;  %v1042_v16 = vmul.f32 %v9307_v5, %v971_v12  ;;  %v1115_v36 = vadd.f32 %v9313_v19, %v1044_v3  ;;  %v12106_v12 = vld [vmem:[#allocation27_spill] sm:$0xff] }
 0x229   :  { %v9621_v13 = vmax.f32 %v1117_v38, 0.0  ;;  %6621 = vmatprep.subr.mxu1 %v9605_v59  ;;  %6833 = vmatprep.subr.mxu0 %v9605_v59  ;;  %v953_v62 = vmul.f32 %v9302_v34, %v12105_v10  ;;  %v1026_v21 = vmul.f32 %v9307_v5, %v955_v37  ;;  %v1099_v4 = vadd.f32 %v9313_v19, %v1028_v22  ;;  %v12107_v37 = vld [vmem:[#allocation18_spill] sm:$0xff] }
 0x22a   :  { %v9629_v33 = vmax.f32 %v1101_v25, 0.0  ;;  %6622 = vmatpush3.msra.mxu1 %v9613_v43  ;;  %6834 = vmatpush3.msra.mxu0 %v9613_v43  ;;  %v968_v3 = vmul.f32 %v9302_v34, %v12106_v12  ;;  %v1041_v38 = vmul.f32 %v9307_v5, %v970_v53  ;;  %v1114_v60 = vadd.f32 %v9313_v19, %v1043_v40  ;;  %v12108_v53 = vld [vmem:[#allocation26_spill] sm:$0xff] }
 0x22b   :  { %v9637_v31 = vmax.f32 %v1116_v0, 0.0  ;;  %6623 = vmatprep.subr.mxu1 %v9621_v13  ;;  %6835 = vmatprep.subr.mxu0 %v9621_v13  ;;  %v952_v22 = vmul.f32 %v9302_v34, %v12107_v37  ;;  %v1025_v25 = vmul.f32 %v9307_v5, %v954_v50  ;;  %v1098_v10 = vadd.f32 %v9313_v19, %v1027_v56  ;;  %v12109_v50 = vld [vmem:[#allocation17_spill] sm:$0xff] }
 0x22c   :  { %v9645_v7 = vmax.f32 %v1100_v63, 0.0  ;;  %6624 = vmatpush3.msra.mxu1 %v9629_v33  ;;  %6836 = vmatpush3.msra.mxu0 %v9629_v33  ;;  %v967_v40 = vmul.f32 %v9302_v34, %v12108_v53  ;;  %v1040_v0 = vmul.f32 %v9307_v5, %v969_v58  ;;  %v1113_v12 = vadd.f32 %v9313_v19, %v1042_v16  ;;  %v12110_v58 = vld [vmem:[#allocation25_spill] sm:$0xff] }
 0x22d   :  { %v9653_v17 = vmax.f32 %v1115_v36, 0.0  ;;  %6625 = vmatprep.subr.mxu1 %v9637_v31  ;;  %6837 = vmatprep.subr.mxu0 %v9637_v31  ;;  %v951_v56 = vmul.f32 %v9302_v34, %v12109_v50  ;;  %v1024_v63 = vmul.f32 %v9307_v5, %v953_v62  ;;  %v1097_v37 = vadd.f32 %v9313_v19, %v1026_v21  ;;  %v12111_v62 = vld [vmem:[#allocation16_spill] sm:$0xff] }
 0x22e   :  { %v9661_v20 = vmax.f32 %v1099_v4, 0.0  ;;  %6626 = vmatpush3.msra.mxu1 %v9645_v7  ;;  %6838 = vmatpush3.msra.mxu0 %v9645_v7  ;;  %v966_v16 = vmul.f32 %v9302_v34, %v12110_v58  ;;  %v1039_v36 = vmul.f32 %v9307_v5, %v968_v3  ;;  %v1112_v53 = vadd.f32 %v9313_v19, %v1041_v38  ;;  %v12112_v3 = vld [vmem:[#allocation24_spill] sm:$0xff] }
 0x22f   :  { %v9669_v27 = vmax.f32 %v1114_v60, 0.0  ;;  %6627 = vmatprep.subr.mxu1 %v9653_v17  ;;  %6839 = vmatprep.subr.mxu0 %v9653_v17  ;;  %v950_v21 = vmul.f32 %v9302_v34, %v12111_v62  ;;  %v1023_v4 = vmul.f32 %v9307_v5, %v952_v22  ;;  %v1096_v50 = vadd.f32 %v9313_v19, %v1025_v25  ;;  %v12113_v22 = vld [vmem:[#allocation15_spill] sm:$0xff] }
 0x230   :  { %v9677_v14 = vmax.f32 %v1098_v10, 0.0  ;;  %6628 = vmatpush3.msra.mxu1 %v9661_v20  ;;  %6840 = vmatpush3.msra.mxu0 %v9661_v20  ;;  %v965_v38 = vmul.f32 %v9302_v34, %v12112_v3  ;;  %v1038_v60 = vmul.f32 %v9307_v5, %v967_v40  ;;  %v1111_v58 = vadd.f32 %v9313_v19, %v1040_v0 }
 0x231   :  { %v9685_v2 = vmax.f32 %v1113_v12, 0.0  ;;  %6629 = vmatprep.subr.mxu1 %v9669_v27  ;;  %6841 = vmatprep.subr.mxu0 %v9669_v27  ;;  %v949_v25 = vmul.f32 %v9302_v34, %v12113_v22  ;;  %v1022_v10 = vmul.f32 %v9307_v5, %v951_v56  ;;  %v1095_v62 = vadd.f32 %v9313_v19, %v1024_v63 }
 0x232   :  { %v9693_v46 = vmax.f32 %v1097_v37, 0.0  ;;  %6630 = vmatpush3.msra.mxu1 %v9677_v14  ;;  %6842 = vmatpush3.msra.mxu0 %v9677_v14  ;;  %v1037_v40 = vmul.f32 %v9307_v5, %v966_v16  ;;  %v1110_v0 = vadd.f32 %v9313_v19, %v1039_v36  ;;  %v9699_v12 = vmax.f32 %v1112_v53, 0.0 }
 0x233   :  { %6631 = vmatprep.subr.mxu1 %v9685_v2  ;;  %6843 = vmatprep.subr.mxu0 %v9685_v2  ;;  %v1021_v34 = vmul.f32 %v9307_v5, %v950_v21  ;;  %v1094_v56 = vadd.f32 %v9313_v19, %v1023_v4  ;;  %v9705_v63 = vmax.f32 %v1096_v50, 0.0  ;;  %v1036_v37 = vmul.f32 %v9307_v5, %v965_v38 }
 0x234   :  { %6632 = vmatpush3.msra.mxu1 %v9693_v46  ;;  %6844 = vmatpush3.msra.mxu0 %v9693_v46  ;;  %v1109_v16 = vadd.f32 %v9313_v19, %v1038_v60  ;;  %v9711_v36 = vmax.f32 %v1111_v58, 0.0  ;;  %v1020_v53 = vmul.f32 %v9307_v5, %v949_v25  ;;  %v1093_v21 = vadd.f32 %v9313_v19, %v1022_v10 }
 0x235   :  { %6633 = vmatprep.subr.mxu1 %v9699_v12  ;;  %6845 = vmatprep.subr.mxu0 %v9699_v12  ;;  %v9717_v4 = vmax.f32 %v1095_v62, 0.0  ;;  %v1108_v50 = vadd.f32 %v9313_v19, %v1037_v40  ;;  %v9722_v3 = vmax.f32 %v1110_v0, 0.0  ;;  %v1092_v38 = vadd.f32 %v9313_v19, %v1021_v34  ;;  %v1219_v0 = vld [vmem:[%s11979_s4] sm:$0xff] }
 0x236   :  { %6634 = vmatpush3.msra.mxu1 %v9705_v63  ;;  %6846 = vmatpush3.msra.mxu0 %v9705_v63  ;;  %v9727_v60 = vmax.f32 %v1094_v56, 0.0  ;;  %v1107_v5 = vadd.f32 %v9313_v19, %v1036_v37  ;;  %v9732_v58 = vmax.f32 %v1109_v16, 0.0  ;;  %v1091_v22 = vadd.f32 %v9313_v19, %v1020_v53  ;;  %v6377_v34 = vld [vmem:[%s11979_s4 + $0x1c0] sm:$0xff]  ;;  %v1222_v56 = vld [vmem:[%s11979_s4 + $0x18] sm:$0xff]  ;;  %v1221_v37 = vld [vmem:[%s11979_s4 + $0x10] sm:$0xff] }
 0x237   :  { %6635 = vmatprep.subr.mxu1 %v9711_v36  ;;  %6847 = vmatprep.subr.mxu0 %v9711_v36  ;;  %v9737_v25 = vmax.f32 %v1093_v21, 0.0  ;;  %v9741_v10 = vmax.f32 %v1108_v50, 0.0  ;;  %v9745_v62 = vmax.f32 %v1092_v38, 0.0  ;;  %v6380_v16 = vld [vmem:[%s11979_s4 + $0x1d8] sm:$0xff]  ;;  %v6379_v53 = vld [vmem:[%s11979_s4 + $0x1d0] sm:$0xff]  ;;  %v1224_v21 = vld [vmem:[%s11979_s4 + $0x28] sm:$0xff] }
 0x238   :  { %6636 = vmatpush3.msra.mxu1 %v9717_v4  ;;  %6848 = vmatpush3.msra.mxu0 %v9717_v4  ;;  %v9749_v40 = vmax.f32 %v1107_v5, 0.0  ;;  %v9753_v19 = vmax.f32 %v1091_v22, 0.0  ;;  %v1223_v50 = vld [vmem:[%s11979_s4 + $0x20] sm:$0xff]  ;;  %v6382_v38 = vld [vmem:[%s11979_s4 + $0x1e8] sm:$0xff]  ;;  %v1226_v22 = vld [vmem:[%s11979_s4 + $0x38] sm:$0xff] }
 0x239   :  { %6637 = vmatprep.subr.mxu1 %v9722_v3  ;;  %6849 = vmatprep.subr.mxu0 %v9722_v3  ;;  %v6381_v5 = vld [vmem:[%s11979_s4 + $0x1e0] sm:$0xff] }
 0x23a   :  { %6638 = vmatpush3.msra.mxu1 %v9727_v60  ;;  %6850 = vmatpush3.msra.mxu0 %v9727_v60 }
 0x23b   :  { %6639 = vmatprep.subr.mxu1 %v9732_v58  ;;  %6851 = vmatprep.subr.mxu0 %v9732_v58 }
 0x23c   :  { %6640 = vmatpush3.msra.mxu1 %v9737_v25  ;;  %6852 = vmatpush3.msra.mxu0 %v9737_v25 }
 0x23d   :  { %6641 = vmatprep.subr.mxu1 %v9741_v10  ;;  %6853 = vmatprep.subr.mxu0 %v9741_v10 }
 0x23e   :  { %6642 = vmatpush3.msra.mxu1 %v9745_v62  ;;  %6854 = vmatpush3.msra.mxu0 %v9745_v62 }
 0x23f   :  { %6643 = vmatprep.subr.mxu1 %v9749_v40  ;;  %6855 = vmatprep.subr.mxu0 %v9749_v40 }
 0x240   :  { %6644 = vmatpush3.msra.mxu1 %v9753_v19  ;;  %6856 = vmatpush3.msra.mxu0 %v9753_v19 }
 0x241   :  { %1298 = vmatmul.mubr.f32.vlgmr.msra.gmra.mxu1 %v1219_v0  ;;  %6666 = vmatprep.subr.mxu1 %v9547_v24  ;;  %v1225_v0 = vld [vmem:[%s11979_s4 + $0x30] sm:$0xff] }
 0x242   :  { %6931 = vmatprep.subr.mxu0 %v9547_v24  ;;  %6667 = vmatpush3.msra.mxu1 %v9541_v18 }
 0x243   :  { %1779 = vmatmul.mubr.f32.vlgmr.msra.gmra.mxu0 %v6377_v34  ;;  %6668 = vmatprep.subr.mxu1 %v9557_v61  ;;  %v6384_v34 = vld [vmem:[%s11979_s4 + $0x1f8] sm:$0xff] }
 0x244   :  { %6932 = vmatpush3.msra.mxu0 %v9541_v18  ;;  %6669 = vmatpush3.msra.mxu1 %v9565_v48 }
 0x245   :  { %6933 = vmatprep.subr.mxu0 %v9557_v61  ;;  %6670 = vmatprep.subr.mxu1 %v9573_v42 }
 0x246   :  { %6934 = vmatpush3.msra.mxu0 %v9565_v48  ;;  %6671 = vmatpush3.msra.mxu1 %v9581_v44 }
 0x247   :  { %6935 = vmatprep.subr.mxu0 %v9573_v42  ;;  %1302 = vmatprep.mubr.f32.mxu1 %v1222_v56  ;;  %v6383_v56 = vld [vmem:[%s11979_s4 + $0x1f0] sm:$0xff] }
 0x248   :  { %6936 = vmatpush3.msra.mxu0 %v9581_v44  ;;  %6672 = vmatprep.subr.mxu1 %v9589_v30 }
 0x249   :  { %6937 = vmatprep.subr.mxu0 %v9589_v30  ;;  %1303 = vmatmul.mubr.f32.gmra.mxu1 %v1221_v37  ;;  %v1228_v37 = vld [vmem:[%s11979_s4 + $0x48] sm:$0xff] }
 0x24a   :  { %6673 = vmatpush3.msra.mxu1 %v9597_v54  ;;  %6938 = vmatpush3.msra.mxu0 %v9597_v54 }
 0x24b   :  { %6674 = vmatprep.subr.mxu1 %v9605_v59  ;;  %1783 = vmatprep.mubr.f32.mxu0 %v6380_v16  ;;  %v1227_v16 = vld [vmem:[%s11979_s4 + $0x40] sm:$0xff] }
 0x24c   :  { %6939 = vmatprep.subr.mxu0 %v9605_v59  ;;  %6675 = vmatpush3.msra.mxu1 %v9613_v43 }
 0x24d   :  { %1784 = vmatmul.mubr.f32.gmra.mxu0 %v6379_v53  ;;  %1307 = vmatprep.mubr.f32.mxu1 %v1224_v21  ;;  %v6386_v53 = vld [vmem:[%s11979_s4 + $0x208] sm:$0xff]  ;;  %v6385_v21 = vld [vmem:[%s11979_s4 + $0x200] sm:$0xff] }
 0x24e   :  { %6940 = vmatpush3.msra.mxu0 %v9613_v43  ;;  %6676 = vmatprep.subr.mxu1 %v9621_v13 }
 0x24f   :  { %6941 = vmatprep.subr.mxu0 %v9621_v13  ;;  %1308 = vmatmul.mubr.f32.gmra.mxu1 %v1223_v50  ;;  %v1230_v50 = vld [vmem:[%s11979_s4 + $0x58] sm:$0xff] }
 0x250   :  { %6677 = vmatpush3.msra.mxu1 %v9629_v33  ;;  %6942 = vmatpush3.msra.mxu0 %v9629_v33 }
 0x251   :  { %6678 = vmatprep.subr.mxu1 %v9637_v31  ;;  %1788 = vmatprep.mubr.f32.mxu0 %v6382_v38  ;;  %v1229_v38 = vld [vmem:[%s11979_s4 + $0x50] sm:$0xff] }
 0x252   :  { %6943 = vmatprep.subr.mxu0 %v9637_v31  ;;  %6679 = vmatpush3.msra.mxu1 %v9645_v7 }
 0x253   :  { %1789 = vmatmul.mubr.f32.gmra.mxu0 %v6381_v5  ;;  %1312 = vmatprep.mubr.f32.mxu1 %v1226_v22  ;;  %v6388_v5 = vld [vmem:[%s11979_s4 + $0x218] sm:$0xff]  ;;  %v6387_v22 = vld [vmem:[%s11979_s4 + $0x210] sm:$0xff] }
 0x254   :  { %6944 = vmatpush3.msra.mxu0 %v9645_v7  ;;  %6680 = vmatprep.subr.mxu1 %v9653_v17 }
 0x255   :  { %6945 = vmatprep.subr.mxu0 %v9653_v17  ;;  %1313 = vmatmul.mubr.f32.gmra.mxu1 %v1225_v0  ;;  %v1232_v0 = vld [vmem:[%s11979_s4 + $0x68] sm:$0xff] }
 0x256   :  { %6681 = vmatpush3.msra.mxu1 %v9661_v20  ;;  %6946 = vmatpush3.msra.mxu0 %v9661_v20 }
 0x257   :  { %6682 = vmatprep.subr.mxu1 %v9669_v27  ;;  %1793 = vmatprep.mubr.f32.mxu0 %v6384_v34  ;;  %v1231_v34 = vld [vmem:[%s11979_s4 + $0x60] sm:$0xff] }
 0x258   :  { %6947 = vmatprep.subr.mxu0 %v9669_v27  ;;  %6683 = vmatpush3.msra.mxu1 %v9677_v14 }
 0x259   :  { %1794 = vmatmul.mubr.f32.gmra.mxu0 %v6383_v56  ;;  %1317 = vmatprep.mubr.f32.mxu1 %v1228_v37  ;;  %v6390_v56 = vld [vmem:[%s11979_s4 + $0x228] sm:$0xff]  ;;  %v6389_v37 = vld [vmem:[%s11979_s4 + $0x220] sm:$0xff] }
 0x25a   :  { %6948 = vmatpush3.msra.mxu0 %v9677_v14  ;;  %6684 = vmatprep.subr.mxu1 %v9685_v2 }
 0x25b   :  { %6949 = vmatprep.subr.mxu0 %v9685_v2  ;;  %1318 = vmatmul.mubr.f32.gmra.mxu1 %v1227_v16  ;;  %v6336_v16 = vld [vmem:[%s11979_s4 + $0x78] sm:$0xff] }
 0x25c   :  { %6685 = vmatpush3.msra.mxu1 %v9693_v46  ;;  %6950 = vmatpush3.msra.mxu0 %v9693_v46 }
 0x25d   :  { %6686 = vmatprep.subr.mxu1 %v9699_v12  ;;  %1798 = vmatprep.mubr.f32.mxu0 %v6386_v53  ;;  %v6335_v53 = vld [vmem:[%s11979_s4 + $0x70] sm:$0xff] }
 0x25e   :  { %6951 = vmatprep.subr.mxu0 %v9699_v12  ;;  %6687 = vmatpush3.msra.mxu1 %v9705_v63 }
 0x25f   :  { %1799 = vmatmul.mubr.f32.gmra.mxu0 %v6385_v21  ;;  %1322 = vmatprep.mubr.f32.mxu1 %v1230_v50  ;;  %v6406_v21 = vld [vmem:[%s11979_s4 + $0x2a8] sm:$0xff]  ;;  %v6405_v50 = vld [vmem:[%s11979_s4 + $0x2a0] sm:$0xff] }
 0x260   :  { %6952 = vmatpush3.msra.mxu0 %v9705_v63  ;;  %6688 = vmatprep.subr.mxu1 %v9711_v36 }
 0x261   :  { %6953 = vmatprep.subr.mxu0 %v9711_v36  ;;  %1323 = vmatmul.mubr.f32.gmra.mxu1 %v1229_v38  ;;  %v6338_v38 = vld [vmem:[%s11979_s4 + $0x88] sm:$0xff] }
 0x262   :  { %6689 = vmatpush3.msra.mxu1 %v9717_v4  ;;  %6954 = vmatpush3.msra.mxu0 %v9717_v4 }
 0x263   :  { %6690 = vmatprep.subr.mxu1 %v9722_v3  ;;  %1803 = vmatprep.mubr.f32.mxu0 %v6388_v5  ;;  %v6337_v5 = vld [vmem:[%s11979_s4 + $0x80] sm:$0xff] }
 0x264   :  { %6955 = vmatprep.subr.mxu0 %v9722_v3  ;;  %6691 = vmatpush3.msra.mxu1 %v9727_v60 }
 0x265   :  { %1804 = vmatmul.mubr.f32.gmra.mxu0 %v6387_v22  ;;  %1327 = vmatprep.mubr.f32.mxu1 %v1232_v0  ;;  %v6340_v22 = vld [vmem:[%s11979_s4 + $0x98] sm:$0xff]  ;;  %v6339_v0 = vld [vmem:[%s11979_s4 + $0x90] sm:$0xff] }
 0x266   :  { %6956 = vmatpush3.msra.mxu0 %v9727_v60  ;;  %6692 = vmatprep.subr.mxu1 %v9732_v58 }
 0x267   :  { %6957 = vmatprep.subr.mxu0 %v9732_v58  ;;  %1328 = vmatmul.mubr.f32.gmra.mxu1 %v1231_v34  ;;  %v6342_v34 = vld [vmem:[%s11979_s4 + $0xa8] sm:$0xff] }
 0x268   :  { %6693 = vmatpush3.msra.mxu1 %v9737_v25  ;;  %6958 = vmatpush3.msra.mxu0 %v9737_v25 }
 0x269   :  { %6694 = vmatprep.subr.mxu1 %v9741_v10  ;;  %1808 = vmatprep.mubr.f32.mxu0 %v6390_v56  ;;  %v6341_v56 = vld [vmem:[%s11979_s4 + $0xa0] sm:$0xff] }
 0x26a   :  { %6959 = vmatprep.subr.mxu0 %v9741_v10  ;;  %6695 = vmatpush3.msra.mxu1 %v9745_v62 }
 0x26b   :  { %1809 = vmatmul.mubr.f32.gmra.mxu0 %v6389_v37  ;;  %6696 = vmatprep.subr.mxu1 %v9749_v40  ;;  %v6344_v37 = vld [vmem:[%s11979_s4 + $0xb8] sm:$0xff] }
 0x26c   :  { %6960 = vmatpush3.msra.mxu0 %v9745_v62  ;;  %6697 = vmatpush3.msra.mxu1 %v9753_v19 }
 0x26d   :  { %6961 = vmatprep.subr.mxu0 %v9749_v40  ;;  %1412 = vmatprep.mubr.f32.mxu1 %v6336_v16  ;;  %v6343_v16 = vld [vmem:[%s11979_s4 + $0xb0] sm:$0xff] }
 0x26e   :  { %6962 = vmatpush3.msra.mxu0 %v9753_v19  ;;  %1413 = vmatmul.mubr.f32.vlgmr.msra.gmra.mxu1 %v6335_v53  ;;  %v6346_v53 = vld [vmem:[%s11979_s4 + $0xc8] sm:$0xff] }
 0x26f   :  { %6719 = vmatprep.subr.mxu1 %v9547_v24  ;;  %2022 = vmatprep.mubr.f32.mxu0 %v6406_v21  ;;  %v6345_v21 = vld [vmem:[%s11979_s4 + $0xc0] sm:$0xff] }
 0x270   :  { %7037 = vmatprep.subr.mxu0 %v9547_v24  ;;  %6720 = vmatpush3.msra.mxu1 %v9541_v18 }
 0x271   :  { %2023 = vmatmul.mubr.f32.vlgmr.msra.gmra.mxu0 %v6405_v50  ;;  %6721 = vmatprep.subr.mxu1 %v9557_v61  ;;  %v6348_v50 = vld [vmem:[%s11979_s4 + $0xd8] sm:$0xff] }
 0x272   :  { %7038 = vmatpush3.msra.mxu0 %v9541_v18  ;;  %1417 = vmatprep.mubr.f32.mxu1 %v6338_v38  ;;  %v6347_v38 = vld [vmem:[%s11979_s4 + $0xd0] sm:$0xff] }
 0x273   :  { %7039 = vmatprep.subr.mxu0 %v9557_v61  ;;  %6722 = vmatpush3.msra.mxu1 %v9565_v48 }
 0x274   :  { %7040 = vmatpush3.msra.mxu0 %v9565_v48  ;;  %1418 = vmatmul.mubr.f32.gmra.mxu1 %v6337_v5  ;;  %v6350_v5 = vld [vmem:[%s11979_s4 + $0xe8] sm:$0xff] }
 0x275   :  { %6723 = vmatprep.subr.mxu1 %v9573_v42  ;;  %7041 = vmatprep.subr.mxu0 %v9573_v42 }
 0x276   :  { %6724 = vmatpush3.msra.mxu1 %v9581_v44  ;;  %7042 = vmatpush3.msra.mxu0 %v9581_v44 }
 0x277   :  { %6725 = vmatprep.subr.mxu1 %v9589_v30  ;;  %7043 = vmatprep.subr.mxu0 %v9589_v30 }
 0x278   :  { %1422 = vmatprep.mubr.f32.mxu1 %v6340_v22  ;;  %6726 = vmatpush3.msra.mxu1 %v9597_v54  ;;  %v6349_v22 = vld [vmem:[%s11979_s4 + $0xe0] sm:$0xff] }
 0x279   :  { %7044 = vmatpush3.msra.mxu0 %v9597_v54  ;;  %1423 = vmatmul.mubr.f32.gmra.mxu1 %v6339_v0  ;;  %v6352_v0 = vld [vmem:[%s11979_s4 + $0xf8] sm:$0xff] }
 0x27a   :  { %6727 = vmatprep.subr.mxu1 %v9605_v59  ;;  %7045 = vmatprep.subr.mxu0 %v9605_v59 }
 0x27b   :  { %6728 = vmatpush3.msra.mxu1 %v9613_v43  ;;  %7046 = vmatpush3.msra.mxu0 %v9613_v43 }
 0x27c   :  { %6729 = vmatprep.subr.mxu1 %v9621_v13  ;;  %7047 = vmatprep.subr.mxu0 %v9621_v13 }
 0x27d   :  { %1427 = vmatprep.mubr.f32.mxu1 %v6342_v34  ;;  %6730 = vmatpush3.msra.mxu1 %v9629_v33  ;;  %v6408_v34 = vld [vmem:[%s11979_s4 + $0x2b8] sm:$0xff] }
 0x27e   :  { %7048 = vmatpush3.msra.mxu0 %v9629_v33  ;;  %1428 = vmatmul.mubr.f32.gmra.mxu1 %v6341_v56  ;;  %v6407_v56 = vld [vmem:[%s11979_s4 + $0x2b0] sm:$0xff] }
 0x27f   :  { %6731 = vmatprep.subr.mxu1 %v9637_v31  ;;  %7049 = vmatprep.subr.mxu0 %v9637_v31 }
 0x280   :  { %6732 = vmatpush3.msra.mxu1 %v9645_v7  ;;  %7050 = vmatpush3.msra.mxu0 %v9645_v7 }
 0x281   :  { %6733 = vmatprep.subr.mxu1 %v9653_v17  ;;  %7051 = vmatprep.subr.mxu0 %v9653_v17 }
 0x282   :  { %1432 = vmatprep.mubr.f32.mxu1 %v6344_v37  ;;  %6734 = vmatpush3.msra.mxu1 %v9661_v20  ;;  %v6410_v37 = vld [vmem:[%s11979_s4 + $0x2c8] sm:$0xff] }
 0x283   :  { %7052 = vmatpush3.msra.mxu0 %v9661_v20  ;;  %1433 = vmatmul.mubr.f32.gmra.mxu1 %v6343_v16  ;;  %v6351_v16 = vld [vmem:[%s11979_s4 + $0xf0] sm:$0xff] }
 0x284   :  { %6735 = vmatprep.subr.mxu1 %v9669_v27  ;;  %7053 = vmatprep.subr.mxu0 %v9669_v27 }
 0x285   :  { %6736 = vmatpush3.msra.mxu1 %v9677_v14  ;;  %7054 = vmatpush3.msra.mxu0 %v9677_v14 }
 0x286   :  { %6737 = vmatprep.subr.mxu1 %v9685_v2  ;;  %7055 = vmatprep.subr.mxu0 %v9685_v2 }
 0x287   :  { %1437 = vmatprep.mubr.f32.mxu1 %v6346_v53  ;;  %6738 = vmatpush3.msra.mxu1 %v9693_v46  ;;  %v6354_v53 = vld [vmem:[%s11979_s4 + $0x108] sm:$0xff] }
 0x288   :  { %7056 = vmatpush3.msra.mxu0 %v9693_v46  ;;  %1438 = vmatmul.mubr.f32.gmra.mxu1 %v6345_v21  ;;  %v6409_v21 = vld [vmem:[%s11979_s4 + $0x2c0] sm:$0xff] }
 0x289   :  { %6739 = vmatprep.subr.mxu1 %v9699_v12  ;;  %7057 = vmatprep.subr.mxu0 %v9699_v12 }
 0x28a   :  { %6740 = vmatpush3.msra.mxu1 %v9705_v63  ;;  %7058 = vmatpush3.msra.mxu0 %v9705_v63 }
 0x28b   :  { %6741 = vmatprep.subr.mxu1 %v9711_v36  ;;  %7059 = vmatprep.subr.mxu0 %v9711_v36 }
 0x28c   :  { %1442 = vmatprep.mubr.f32.mxu1 %v6348_v50  ;;  %6742 = vmatpush3.msra.mxu1 %v9717_v4  ;;  %v6412_v50 = vld [vmem:[%s11979_s4 + $0x2d8] sm:$0xff] }
 0x28d   :  { %7060 = vmatpush3.msra.mxu0 %v9717_v4  ;;  %1443 = vmatmul.mubr.f32.gmra.mxu1 %v6347_v38  ;;  %v6353_v38 = vld [vmem:[%s11979_s4 + $0x100] sm:$0xff] }
 0x28e   :  { %6743 = vmatprep.subr.mxu1 %v9722_v3  ;;  %7061 = vmatprep.subr.mxu0 %v9722_v3 }
 0x28f   :  { %6744 = vmatpush3.msra.mxu1 %v9727_v60  ;;  %7062 = vmatpush3.msra.mxu0 %v9727_v60 }
 0x290   :  { %6745 = vmatprep.subr.mxu1 %v9732_v58  ;;  %7063 = vmatprep.subr.mxu0 %v9732_v58 }
 0x291   :  { %6746 = vmatpush3.msra.mxu1 %v9737_v25  ;;  %7064 = vmatpush3.msra.mxu0 %v9737_v25 }
 0x292   :  { %6747 = vmatprep.subr.mxu1 %v9741_v10  ;;  %7065 = vmatprep.subr.mxu0 %v9741_v10 }
 0x293   :  { %6748 = vmatpush3.msra.mxu1 %v9745_v62  ;;  %7066 = vmatpush3.msra.mxu0 %v9745_v62 }
 0x294   :  { %6749 = vmatprep.subr.mxu1 %v9749_v40  ;;  %7067 = vmatprep.subr.mxu0 %v9749_v40 }
 0x295   :  { %6750 = vmatpush3.msra.mxu1 %v9753_v19  ;;  %1534 = vmatprep.mubr.f32.mxu1 %v6350_v5  ;;  %v6356_v5 = vld [vmem:[%s11979_s4 + $0x118] sm:$0xff] }
 0x296   :  { %7068 = vmatpush3.msra.mxu0 %v9753_v19  ;;  %1535 = vmatmul.mubr.f32.vlgmr.msra.gmra.mxu1 %v6349_v22  ;;  %v6411_v22 = vld [vmem:[%s11979_s4 + $0x2d0] sm:$0xff] }
 0x297   :  { %6772 = vmatprep.subr.mxu1 %v9547_v24  ;;  %1539 = vmatprep.mubr.f32.mxu1 %v6352_v0  ;;  %v6414_v0 = vld [vmem:[%s11979_s4 + $0x2e8] sm:$0xff] }
 0x298   :  { %6773 = vmatpush3.msra.mxu1 %v9541_v18  ;;  %2027 = vmatprep.mubr.f32.mxu0 %v6408_v34  ;;  %v6355_v34 = vld [vmem:[%s11979_s4 + $0x110] sm:$0xff] }
 0x299   :  { %6774 = vmatprep.subr.mxu1 %v9557_v61  ;;  %2028 = vmatmul.mubr.f32.gmra.mxu0 %v6407_v56  ;;  %v6358_v56 = vld [vmem:[%s11979_s4 + $0x128] sm:$0xff] }
 0x29a   :  { %6775 = vmatpush3.msra.mxu1 %v9565_v48  ;;  %2032 = vmatprep.mubr.f32.mxu0 %v6410_v37  ;;  %v6413_v37 = vld [vmem:[%s11979_s4 + $0x2e0] sm:$0xff] }
 0x29b   :  { %1540 = vmatmul.mubr.f32.gmra.mxu1 %v6351_v16  ;;  %6776 = vmatprep.subr.mxu1 %v9573_v42  ;;  %v6416_v16 = vld [vmem:[%s11979_s4 + $0x2f8] sm:$0xff] }
 0x29c   :  { %6777 = vmatpush3.msra.mxu1 %v9581_v44  ;;  %1544 = vmatprep.mubr.f32.mxu1 %v6354_v53  ;;  %v6357_v53 = vld [vmem:[%s11979_s4 + $0x120] sm:$0xff] }
 0x29d   :  { %6778 = vmatprep.subr.mxu1 %v9589_v30  ;;  %2033 = vmatmul.mubr.f32.gmra.mxu0 %v6409_v21  ;;  %v6360_v21 = vld [vmem:[%s11979_s4 + $0x138] sm:$0xff] }
 0x29e   :  { %6779 = vmatpush3.msra.mxu1 %v9597_v54  ;;  %2037 = vmatprep.mubr.f32.mxu0 %v6412_v50  ;;  %v6415_v50 = vld [vmem:[%s11979_s4 + $0x2f0] sm:$0xff] }
 0x29f   :  { %1545 = vmatmul.mubr.f32.gmra.mxu1 %v6353_v38  ;;  %6780 = vmatprep.subr.mxu1 %v9605_v59  ;;  %v6418_v38 = vld [vmem:[%s11979_s4 + $0x308] sm:$0xff] }
 0x2a0   :  { %6781 = vmatpush3.msra.mxu1 %v9613_v43  ;;  %1549 = vmatprep.mubr.f32.mxu1 %v6356_v5  ;;  %v6359_v5 = vld [vmem:[%s11979_s4 + $0x130] sm:$0xff] }
 0x2a1   :  { %6782 = vmatprep.subr.mxu1 %v9621_v13  ;;  %2038 = vmatmul.mubr.f32.gmra.mxu0 %v6411_v22  ;;  %v6362_v22 = vld [vmem:[%s11979_s4 + $0x148] sm:$0xff] }
 0x2a2   :  { %6783 = vmatpush3.msra.mxu1 %v9629_v33  ;;  %2042 = vmatprep.mubr.f32.mxu0 %v6414_v0  ;;  %v6417_v0 = vld [vmem:[%s11979_s4 + $0x300] sm:$0xff] }
 0x2a3   :  { %1550 = vmatmul.mubr.f32.gmra.mxu1 %v6355_v34  ;;  %6784 = vmatprep.subr.mxu1 %v9637_v31  ;;  %v6434_v34 = vld [vmem:[%s11979_s4 + $0x388] sm:$0xff] }
 0x2a4   :  { %6785 = vmatpush3.msra.mxu1 %v9645_v7  ;;  %1554 = vmatprep.mubr.f32.mxu1 %v6358_v56  ;;  %v6361_v56 = vld [vmem:[%s11979_s4 + $0x140] sm:$0xff] }
 0x2a5   :  { %6786 = vmatprep.subr.mxu1 %v9653_v17  ;;  %2043 = vmatmul.mubr.f32.gmra.mxu0 %v6413_v37  ;;  %v6364_v37 = vld [vmem:[%s11979_s4 + $0x158] sm:$0xff] }
 0x2a6   :  { %6787 = vmatpush3.msra.mxu1 %v9661_v20  ;;  %2047 = vmatprep.mubr.f32.mxu0 %v6416_v16  ;;  %v6433_v16 = vld [vmem:[%s11979_s4 + $0x380] sm:$0xff] }
 0x2a7   :  { %1555 = vmatmul.mubr.f32.gmra.mxu1 %v6357_v53  ;;  %6788 = vmatprep.subr.mxu1 %v9669_v27  ;;  %v6436_v53 = vld [vmem:[%s11979_s4 + $0x398] sm:$0xff] }
 0x2a8   :  { %6789 = vmatpush3.msra.mxu1 %v9677_v14  ;;  %1559 = vmatprep.mubr.f32.mxu1 %v6360_v21  ;;  %v6435_v21 = vld [vmem:[%s11979_s4 + $0x390] sm:$0xff] }
 0x2a9   :  { %6790 = vmatprep.subr.mxu1 %v9685_v2  ;;  %2048 = vmatmul.mubr.f32.gmra.mxu0 %v6415_v50  ;;  %v6438_v50 = vld [vmem:[%s11979_s4 + $0x3a8] sm:$0xff] }
 0x2aa   :  { %6791 = vmatpush3.msra.mxu1 %v9693_v46  ;;  %2052 = vmatprep.mubr.f32.mxu0 %v6418_v38  ;;  %v6363_v38 = vld [vmem:[%s11979_s4 + $0x150] sm:$0xff] }
 0x2ab   :  { %1560 = vmatmul.mubr.f32.gmra.mxu1 %v6359_v5  ;;  %6792 = vmatprep.subr.mxu1 %v9699_v12  ;;  %v6366_v5 = vld [vmem:[%s11979_s4 + $0x168] sm:$0xff] }
 0x2ac   :  { %6793 = vmatpush3.msra.mxu1 %v9705_v63  ;;  %1564 = vmatprep.mubr.f32.mxu1 %v6362_v22  ;;  %v6437_v22 = vld [vmem:[%s11979_s4 + $0x3a0] sm:$0xff] }
 0x2ad   :  { %6794 = vmatprep.subr.mxu1 %v9711_v36  ;;  %2053 = vmatmul.mubr.f32.gmra.mxu0 %v6417_v0  ;;  %v6440_v0 = vld [vmem:[%s11979_s4 + $0x3b8] sm:$0xff] }
 0x2ae   :  { %6795 = vmatpush3.msra.mxu1 %v9717_v4  ;;  %2266 = vmatprep.mubr.f32.mxu0 %v6434_v34  ;;  %v6365_v34 = vld [vmem:[%s11979_s4 + $0x160] sm:$0xff] }
 0x2af   :  { %1565 = vmatmul.mubr.f32.gmra.mxu1 %v6361_v56  ;;  %6796 = vmatprep.subr.mxu1 %v9722_v3  ;;  %v6368_v56 = vld [vmem:[%s11979_s4 + $0x178] sm:$0xff] }
 0x2b0   :  { %6797 = vmatpush3.msra.mxu1 %v9727_v60  ;;  %1656 = vmatprep.mubr.f32.mxu1 %v6364_v37  ;;  %v6439_v37 = vld [vmem:[%s11979_s4 + $0x3b0] sm:$0xff] }
 0x2b1   :  { %6798 = vmatprep.subr.mxu1 %v9732_v58  ;;  %2267 = vmatmul.mubr.f32.vlgmr.msra.gmra.mxu0 %v6433_v16  ;;  %v6442_v16 = vld [vmem:[%s11979_s4 + $0x3c8] sm:$0xff] }
 0x2b2   :  { %6799 = vmatpush3.msra.mxu1 %v9737_v25  ;;  %2271 = vmatprep.mubr.f32.mxu0 %v6436_v53  ;;  %v6367_v53 = vld [vmem:[%s11979_s4 + $0x170] sm:$0xff] }
 0x2b3   :  { %6800 = vmatprep.subr.mxu1 %v9741_v10 }
 0x2b4   :  { %6801 = vmatpush3.msra.mxu1 %v9745_v62 }
 0x2b5   :  { %6802 = vmatprep.subr.mxu1 %v9749_v40  ;;  %2272 = vmatmul.mubr.f32.gmra.mxu0 %v6435_v21  ;;  %v6370_v21 = vld [vmem:[%s11979_s4 + $0x188] sm:$0xff] }
 0x2b6   :  { %6803 = vmatpush3.msra.mxu1 %v9753_v19  ;;  %2276 = vmatprep.mubr.f32.mxu0 %v6438_v50  ;;  %v6441_v50 = vld [vmem:[%s11979_s4 + $0x3c0] sm:$0xff] }
 0x2b7   :  { %1657 = vmatmul.mubr.f32.vlgmr.msra.gmra.mxu1 %v6363_v38  ;;  %6878 = vmatprep.subr.mxu1 %v9547_v24  ;;  %v6444_v38 = vld [vmem:[%s11979_s4 + $0x3d8] sm:$0xff] }
 0x2b8   :  { %6879 = vmatpush3.msra.mxu1 %v9541_v18  ;;  %1661 = vmatprep.mubr.f32.mxu1 %v6366_v5  ;;  %v6369_v5 = vld [vmem:[%s11979_s4 + $0x180] sm:$0xff] }
 0x2b9   :  { %6880 = vmatprep.subr.mxu1 %v9557_v61  ;;  %2277 = vmatmul.mubr.f32.gmra.mxu0 %v6437_v22  ;;  %v6372_v22 = vld [vmem:[%s11979_s4 + $0x198] sm:$0xff] }
 0x2ba   :  { %6881 = vmatpush3.msra.mxu1 %v9565_v48  ;;  %2281 = vmatprep.mubr.f32.mxu0 %v6440_v0  ;;  %v6443_v0 = vld [vmem:[%s11979_s4 + $0x3d0] sm:$0xff] }
 0x2bb   :  { %1662 = vmatmul.mubr.f32.gmra.mxu1 %v6365_v34  ;;  %6882 = vmatprep.subr.mxu1 %v9573_v42  ;;  %v6446_v34 = vld [vmem:[%s11979_s4 + $0x3e8] sm:$0xff] }
 0x2bc   :  { %6883 = vmatpush3.msra.mxu1 %v9581_v44  ;;  %1666 = vmatprep.mubr.f32.mxu1 %v6368_v56  ;;  %v6371_v56 = vld [vmem:[%s11979_s4 + $0x190] sm:$0xff] }
 0x2bd   :  { %6884 = vmatprep.subr.mxu1 %v9589_v30  ;;  %2282 = vmatmul.mubr.f32.gmra.mxu0 %v6439_v37  ;;  %v6374_v37 = vld [vmem:[%s11979_s4 + $0x1a8] sm:$0xff] }
 0x2be   :  { %6885 = vmatpush3.msra.mxu1 %v9597_v54  ;;  %2286 = vmatprep.mubr.f32.mxu0 %v6442_v16  ;;  %v6445_v16 = vld [vmem:[%s11979_s4 + $0x3e0] sm:$0xff] }
 0x2bf   :  { %1667 = vmatmul.mubr.f32.gmra.mxu1 %v6367_v53  ;;  %6886 = vmatprep.subr.mxu1 %v9605_v59  ;;  %v6373_v53 = vld [vmem:[%s11979_s4 + $0x1a0] sm:$0xff] }
 0x2c0   :  { %6887 = vmatpush3.msra.mxu1 %v9613_v43  ;;  %1671 = vmatprep.mubr.f32.mxu1 %v6370_v21  ;;  %v6376_v21 = vld [vmem:[%s11979_s4 + $0x1b8] sm:$0xff] }
 0x2c1   :  { %6888 = vmatprep.subr.mxu1 %v9621_v13  ;;  %2287 = vmatmul.mubr.f32.gmra.mxu0 %v6441_v50  ;;  %v6375_v50 = vld [vmem:[%s11979_s4 + $0x1b0] sm:$0xff] }
 0x2c2   :  { %6889 = vmatpush3.msra.mxu1 %v9629_v33  ;;  %2291 = vmatprep.mubr.f32.mxu0 %v6444_v38  ;;  %v6392_v38 = vld [vmem:[%s11979_s4 + $0x238] sm:$0xff] }
 0x2c3   :  { %1672 = vmatmul.mubr.f32.gmra.mxu1 %v6369_v5  ;;  %6890 = vmatprep.subr.mxu1 %v9637_v31  ;;  %v6391_v5 = vld [vmem:[%s11979_s4 + $0x230] sm:$0xff] }
 0x2c4   :  { %6891 = vmatpush3.msra.mxu1 %v9645_v7  ;;  %1676 = vmatprep.mubr.f32.mxu1 %v6372_v22  ;;  %v6394_v22 = vld [vmem:[%s11979_s4 + $0x248] sm:$0xff] }
 0x2c5   :  { %6892 = vmatprep.subr.mxu1 %v9653_v17  ;;  %2292 = vmatmul.mubr.f32.gmra.mxu0 %v6443_v0  ;;  %v6393_v0 = vld [vmem:[%s11979_s4 + $0x240] sm:$0xff] }
 0x2c6   :  { %6893 = vmatpush3.msra.mxu1 %v9661_v20  ;;  %2296 = vmatprep.mubr.f32.mxu0 %v6446_v34  ;;  %v6396_v34 = vld [vmem:[%s11979_s4 + $0x258] sm:$0xff] }
 0x2c7   :  { %1677 = vmatmul.mubr.f32.gmra.mxu1 %v6371_v56  ;;  %6894 = vmatprep.subr.mxu1 %v9669_v27 }
 0x2c8   :  { %6895 = vmatpush3.msra.mxu1 %v9677_v14  ;;  %1681 = vmatprep.mubr.f32.mxu1 %v6374_v37 }
 0x2c9   :  { %6896 = vmatprep.subr.mxu1 %v9685_v2  ;;  %2297 = vmatmul.mubr.f32.gmra.mxu0 %v6445_v16 }
 0x2ca   :  { %6897 = vmatpush3.msra.mxu1 %v9693_v46 }
 0x2cb   :  { %1682 = vmatmul.mubr.f32.gmra.mxu1 %v6373_v53  ;;  %6898 = vmatprep.subr.mxu1 %v9699_v12 }
 0x2cc   :  { %6899 = vmatpush3.msra.mxu1 %v9705_v63  ;;  %1686 = vmatprep.mubr.f32.mxu1 %v6376_v21 }
 0x2cd   :  { %6900 = vmatprep.subr.mxu1 %v9711_v36 }
 0x2ce   :  { %6901 = vmatpush3.msra.mxu1 %v9717_v4 }
 0x2cf   :  { %1687 = vmatmul.mubr.f32.gmra.mxu1 %v6375_v50  ;;  %6902 = vmatprep.subr.mxu1 %v9722_v3 }
 0x2d0   :  { %6903 = vmatpush3.msra.mxu1 %v9727_v60  ;;  %1900 = vmatprep.mubr.f32.mxu1 %v6392_v38 }
 0x2d1   :  { %6904 = vmatprep.subr.mxu1 %v9732_v58 }
 0x2d2   :  { %6905 = vmatpush3.msra.mxu1 %v9737_v25 }
 0x2d3   :  { %6906 = vmatprep.subr.mxu1 %v9741_v10 }
 0x2d4   :  { %6907 = vmatpush3.msra.mxu1 %v9745_v62 }
 0x2d5   :  { %6908 = vmatprep.subr.mxu1 %v9749_v40 }
 0x2d6   :  { %6909 = vmatpush3.msra.mxu1 %v9753_v19 }
 0x2d7   :  { %1901 = vmatmul.mubr.f32.vlgmr.msra.gmra.mxu1 %v6391_v5  ;;  %6984 = vmatprep.subr.mxu1 %v9547_v24  ;;  %v6398_v24 = vld [vmem:[%s11979_s4 + $0x268] sm:$0xff] }
 0x2d8   :  { %6985 = vmatpush3.msra.mxu1 %v9541_v18  ;;  %1905 = vmatprep.mubr.f32.mxu1 %v6394_v22  ;;  %v6395_v18 = vld [vmem:[%s11979_s4 + $0x250] sm:$0xff] }
 0x2d9   :  { %6986 = vmatprep.subr.mxu1 %v9557_v61  ;;  %v6397_v61 = vld [vmem:[%s11979_s4 + $0x260] sm:$0xff] }
 0x2da   :  { %6987 = vmatpush3.msra.mxu1 %v9565_v48  ;;  %v6400_v48 = vld [vmem:[%s11979_s4 + $0x278] sm:$0xff] }
 0x2db   :  { %1906 = vmatmul.mubr.f32.gmra.mxu1 %v6393_v0  ;;  %6988 = vmatprep.subr.mxu1 %v9573_v42  ;;  %v6426_v42 = vld [vmem:[%s11979_s4 + $0x348] sm:$0xff] }
 0x2dc   :  { %6989 = vmatpush3.msra.mxu1 %v9581_v44  ;;  %1910 = vmatprep.mubr.f32.mxu1 %v6396_v34  ;;  %v6425_v44 = vld [vmem:[%s11979_s4 + $0x340] sm:$0xff] }
 0x2dd   :  { %6990 = vmatprep.subr.mxu1 %v9589_v30  ;;  %v6428_v30 = vld [vmem:[%s11979_s4 + $0x358] sm:$0xff] }
 0x2de   :  { %6991 = vmatpush3.msra.mxu1 %v9597_v54 }
 0x2df   :  { %1911 = vmatmul.mubr.f32.gmra.mxu1 %v6395_v18  ;;  %6992 = vmatprep.subr.mxu1 %v9605_v59  ;;  %v6427_v59 = vld [vmem:[%s11979_s4 + $0x350] sm:$0xff] }
 0x2e0   :  { %6993 = vmatpush3.msra.mxu1 %v9613_v43  ;;  %1915 = vmatprep.mubr.f32.mxu1 %v6398_v24  ;;  %v6399_v43 = vld [vmem:[%s11979_s4 + $0x270] sm:$0xff] }
 0x2e1   :  { %6994 = vmatprep.subr.mxu1 %v9621_v13  ;;  %v6402_v13 = vld [vmem:[%s11979_s4 + $0x288] sm:$0xff] }
 0x2e2   :  { %6995 = vmatpush3.msra.mxu1 %v9629_v33  ;;  %v6401_v33 = vld [vmem:[%s11979_s4 + $0x280] sm:$0xff] }
 0x2e3   :  { %1916 = vmatmul.mubr.f32.gmra.mxu1 %v6397_v61  ;;  %6996 = vmatprep.subr.mxu1 %v9637_v31  ;;  %v6422_v31 = vld [vmem:[%s11979_s4 + $0x328] sm:$0xff] }
 0x2e4   :  { %6997 = vmatpush3.msra.mxu1 %v9645_v7  ;;  %1920 = vmatprep.mubr.f32.mxu1 %v6400_v48  ;;  %v6404_v7 = vld [vmem:[%s11979_s4 + $0x298] sm:$0xff] }
 0x2e5   :  { %6998 = vmatprep.subr.mxu1 %v9653_v17  ;;  %v6421_v17 = vld [vmem:[%s11979_s4 + $0x320] sm:$0xff] }
 0x2e6   :  { %6999 = vmatpush3.msra.mxu1 %v9661_v20  ;;  %v6403_v20 = vld [vmem:[%s11979_s4 + $0x290] sm:$0xff] }
 0x2e7   :  { %1921 = vmatmul.mubr.f32.gmra.mxu1 %v6399_v43  ;;  %7000 = vmatprep.subr.mxu1 %v9669_v27  ;;  %v6424_v27 = vld [vmem:[%s11979_s4 + $0x338] sm:$0xff] }
 0x2e8   :  { %7001 = vmatpush3.msra.mxu1 %v9677_v14  ;;  %1925 = vmatprep.mubr.f32.mxu1 %v6402_v13  ;;  %v6420_v14 = vld [vmem:[%s11979_s4 + $0x318] sm:$0xff] }
 0x2e9   :  { %7002 = vmatprep.subr.mxu1 %v9685_v2  ;;  %v6423_v2 = vld [vmem:[%s11979_s4 + $0x330] sm:$0xff] }
 0x2ea   :  { %7003 = vmatpush3.msra.mxu1 %v9693_v46  ;;  %v6419_v46 = vld [vmem:[%s11979_s4 + $0x310] sm:$0xff] }
 0x2eb   :  { %1926 = vmatmul.mubr.f32.gmra.mxu1 %v6401_v33  ;;  %7004 = vmatprep.subr.mxu1 %v9699_v12  ;;  %v6430_v12 = vld [vmem:[%s11979_s4 + $0x368] sm:$0xff] }
 0x2ec   :  { %7005 = vmatpush3.msra.mxu1 %v9705_v63  ;;  %1930 = vmatprep.mubr.f32.mxu1 %v6404_v7 }
 0x2ed   :  { %7006 = vmatprep.subr.mxu1 %v9711_v36  ;;  %v6429_v36 = vld [vmem:[%s11979_s4 + $0x360] sm:$0xff] }
 0x2ee   :  { %7007 = vmatpush3.msra.mxu1 %v9717_v4  ;;  %v6432_v4 = vld [vmem:[%s11979_s4 + $0x378] sm:$0xff] }
 0x2ef   :  { %1931 = vmatmul.mubr.f32.gmra.mxu1 %v6403_v20  ;;  %7008 = vmatprep.subr.mxu1 %v9722_v3 }
 0x2f0   :  { %7009 = vmatpush3.msra.mxu1 %v9727_v60  ;;  %2144 = vmatprep.mubr.f32.mxu1 %v6420_v14 }
 0x2f1   :  { %7010 = vmatprep.subr.mxu1 %v9732_v58  ;;  %v6431_v58 = vld [vmem:[%s11979_s4 + $0x370] sm:$0xff] }
 0x2f2   :  { %7011 = vmatpush3.msra.mxu1 %v9737_v25 }
 0x2f3   :  { %7012 = vmatprep.subr.mxu1 %v9741_v10 }
 0x2f4   :  { %7013 = vmatpush3.msra.mxu1 %v9745_v62 }
 0x2f5   :  { %7014 = vmatprep.subr.mxu1 %v9749_v40 }
 0x2f6   :  { %7015 = vmatpush3.msra.mxu1 %v9753_v19 }
 0x2f7   :  { %2145 = vmatmul.mubr.f32.vlgmr.msra.gmra.mxu1 %v6419_v46 }
 0x2f8   :  { %2149 = vmatprep.mubr.f32.mxu1 %v6422_v31 }
 0x2fb   :  { %2150 = vmatmul.mubr.f32.gmra.mxu1 %v6421_v17 }
 0x2fc   :  { %2154 = vmatprep.mubr.f32.mxu1 %v6424_v27 }
 0x2ff   :  { %2155 = vmatmul.mubr.f32.gmra.mxu1 %v6423_v2 }
 0x300   :  { %2159 = vmatprep.mubr.f32.mxu1 %v6426_v42 }
 0x301   :  { %v6645_v54 = vpop.f32.mrf.mxu1 }
 0x303   :  { %2160 = vmatmul.mubr.f32.gmra.mxu1 %v6425_v44  ;;  %v6646_v63 = vpop.f32.mrf.mxu1  ;;  %v10357_v5 = vpop.f32.mrf.mxu0 }
 0x304   :  { %2164 = vmatprep.mubr.f32.mxu1 %v6428_v30  ;;  %v6647_v22 = vadd.f32 %v6646_v63, %v6645_v54 }
 0x305   :  { %v10359_v24 = vpop.f32.mrf.mxu0 }
 0x307   :  { %2165 = vmatmul.mubr.f32.gmra.mxu1 %v6427_v59 }
 0x308   :  { %2169 = vmatprep.mubr.f32.mxu1 %v6430_v12 }
 0x309   :  { %v6648_v3 = vpop.f32.mrf.mxu1 }
 0x30b   :  { %2170 = vmatmul.mubr.f32.gmra.mxu1 %v6429_v36  ;;  %v6649_v60 = vpop.f32.mrf.mxu1 }
 0x30c   :  { %2174 = vmatprep.mubr.f32.mxu1 %v6432_v4  ;;  %v6650_v48 = vadd.f32 %v6649_v60, %v6648_v3 }
 0x30d   :  { %v10361_v13 = vpop.f32.mrf.mxu0 }
 0x30f   :  { %2175 = vmatmul.mubr.f32.gmra.mxu1 %v6431_v58  ;;  %v6651_v25 = vpop.f32.mrf.mxu1  ;;  %v10363_v31 = vpop.f32.mrf.mxu0 }
 0x311   :  { %v6652_v10 = vpop.f32.mrf.mxu1 }
 0x312   :  { %v6653_v14 = vadd.f32 %v6652_v10, %v6651_v25 }
 0x313   :  { %v10365_v42 = vpop.f32.mrf.mxu0 }
 0x315   :  { %v6654_v62 = vpop.f32.mrf.mxu1  ;;  %v10367_v12 = vpop.f32.mrf.mxu0 }
 0x317   :  { %v6655_v40 = vpop.f32.mrf.mxu1 }
 0x318   :  { %v6656_v44 = vadd.f32 %v6655_v40, %v6654_v62 }
 0x319   :  { %v10369_v58 = vpop.f32.mrf.mxu0 }
 0x31b   :  { %v6657_v19 = vpop.f32.mrf.mxu1 }
 0x31d   :  { %v6658_v56 = vpop.f32.mrf.mxu1 }
 0x31e   :  { %v6659_v36 = vadd.f32 %v6658_v56, %v6657_v19 }
 0x321   :  { %v6660_v37 = vpop.f32.mrf.mxu1 }
 0x323   :  { %v6661_v16 = vpop.f32.mrf.mxu1 }
 0x324   :  { %v6662_v10 = vadd.f32 %v6661_v16, %v6660_v37 }
 0x327   :  { %v6663_v53 = vpop.f32.mrf.mxu1 }
 0x329   :  { %v6664_v21 = vpop.f32.mrf.mxu1 }
 0x32a   :  { %v6665_v40 = vadd.f32 %v6664_v21, %v6663_v53 }
 0x32e   :  { %v6698_v50 = vpop.f32.mrf.mxu1 }
 0x330   :  { %v6699_v38 = vpop.f32.mrf.mxu1 }
 0x331   :  { %v6700_v0 = vadd.f32 %v6699_v38, %v6698_v50  ;;  %v10371_v38 = vpop.f32.mrf.mxu0 }
 0x333   :  { %v1448_v34 = vmax.f32 %v6647_v22, %v6700_v0 }
 0x334   :  { %v6701_v18 = vpop.f32.mrf.mxu1 }
 0x336   :  { %v6702_v61 = vpop.f32.mrf.mxu1 }
 0x337   :  { %v6703_v43 = vadd.f32 %v6702_v61, %v6701_v18  ;;  %v10373_v61 = vpop.f32.mrf.mxu0 }
 0x339   :  { %v1449_v33 = vmax.f32 %v6650_v48, %v6703_v43  ;;  %v6704_v7 = vpop.f32.mrf.mxu1  ;;  %v10375_v43 = vpop.f32.mrf.mxu0 }
 0x33b   :  { %v6705_v20 = vpop.f32.mrf.mxu1 }
 0x33c   :  { %v6706_v46 = vadd.f32 %v6705_v20, %v6704_v7  ;;  %v10377_v7 = vpop.f32.mrf.mxu0 }
 0x33e   :  { %v1450_v17 = vmax.f32 %v6653_v14, %v6706_v46  ;;  %v6707_v27 = vpop.f32.mrf.mxu1  ;;  %v10379_v16 = vpop.f32.mrf.mxu0 }
 0x340   :  { %v6708_v2 = vpop.f32.mrf.mxu1  ;;  %v10381_v53 = vpop.f32.mrf.mxu0 }
 0x341   :  { %v6709_v30 = vadd.f32 %v6708_v2, %v6707_v27 }
 0x343   :  { %v1451_v54 = vmax.f32 %v6656_v44, %v6709_v30  ;;  %v6710_v59 = vpop.f32.mrf.mxu1 }
 0x345   :  { %v6711_v63 = vpop.f32.mrf.mxu1 }
 0x346   :  { %v6712_v4 = vadd.f32 %v6711_v63, %v6710_v59 }
 0x348   :  { %v1452_v3 = vmax.f32 %v6659_v36, %v6712_v4  ;;  %v6713_v60 = vpop.f32.mrf.mxu1  ;;  %v10383_v36 = vpop.f32.mrf.mxu0 }
 0x34a   :  { %v6714_v25 = vpop.f32.mrf.mxu1 }
 0x34b   :  { %v6715_v50 = vadd.f32 %v6714_v25, %v6713_v60  ;;  %v10389_v25 = vpop.f32.mrf.mxu0 }
 0x34c   :  { %12114 = vst [vmem:[#allocation32_spill] sm:$0xff] %v10389_v25 }
 0x34d   :  { %v1453_v22 = vmax.f32 %v6662_v10, %v6715_v50  ;;  %v6716_v0 = vpop.f32.mrf.mxu1  ;;  %v2309_v50 = vld [vmem:[%s11982_s5] sm:$0xff] }
 0x34e   :  { %7901 = vmatprep.mubr.msk.f32.mxu1 %vm2311_vm1, %v2309_v50 }
 0x34f   :  { %v6717_v62 = vpop.f32.mrf.mxu1 }
 0x350   :  { %v6718_v18 = vadd.f32 %v6717_v62, %v6716_v0  ;;  %v10395_v62 = vpop.f32.mrf.mxu0 }
 0x351   :  { %12115 = vst [vmem:[#allocation23_spill] sm:$0xff] %v10395_v62 }
 0x352   :  { %v1454_v48 = vmax.f32 %v6665_v40, %v6718_v18 }
 0x356   :  { %v6751_v19 = vpop.f32.mrf.mxu1 }
 0x358   :  { %v6752_v56 = vpop.f32.mrf.mxu1 }
 0x359   :  { %v6753_v20 = vadd.f32 %v6752_v56, %v6751_v19 }
 0x35b   :  { %v1570_v14 = vmax.f32 %v1448_v34, %v6753_v20  ;;  %v6754_v37 = vpop.f32.mrf.mxu1  ;;  %v6449_v34 = vld [vmem:[%s11982_s5 + $0x10] sm:$0xff]  ;;  %v10399_v20 = vpop.f32.mrf.mxu0 }
 0x35c   :  { %7918 = vmatprep.mubr.msk.f32.mxu0 %vm2311_vm1, %v6449_v34 }
 0x35d   :  { %v6755_v46 = vpop.f32.mrf.mxu1 }
 0x35e   :  { %v6756_v27 = vadd.f32 %v6755_v46, %v6754_v37 }
 0x35f   :  { %v6757_v2 = vpop.f32.mrf.mxu1 }
 0x360   :  { %v1571_v44 = vmax.f32 %v1449_v33, %v6756_v27 }
 0x361   :  { %v6758_v21 = vpop.f32.mrf.mxu1 }
 0x362   :  { %v6759_v30 = vadd.f32 %v6758_v21, %v6757_v2  ;;  %v10403_v2 = vpop.f32.mrf.mxu0 }
 0x363   :  { %v6760_v59 = vpop.f32.mrf.mxu1 }
 0x364   :  { %v1572_v63 = vmax.f32 %v1450_v17, %v6759_v30  ;;  %v10407_v30 = vpop.f32.mrf.mxu0 }
 0x365   :  { %v6761_v4 = vpop.f32.mrf.mxu1 }
 0x366   :  { %v6762_v60 = vadd.f32 %v6761_v4, %v6760_v59 }
 0x367   :  { %v6763_v33 = vpop.f32.mrf.mxu1 }
 0x368   :  { %v1573_v10 = vmax.f32 %v1451_v54, %v6762_v60  ;;  %v10411_v60 = vpop.f32.mrf.mxu0 }
 0x369   :  { %v6764_v17 = vpop.f32.mrf.mxu1 }
 0x36a   :  { %v6765_v0 = vadd.f32 %v6764_v17, %v6763_v33 }
 0x36b   :  { %v6766_v40 = vpop.f32.mrf.mxu1 }
 0x36c   :  { %v10397_v18 = vmax.f32 %v1452_v3, %v6765_v0  ;;  %v6859_v3 = vadd.f32 %v10359_v24, %v10357_v5  ;;  %v6865_v5 = vadd.f32 %v10367_v12, %v10365_v42 }
 0x36d   :  { %v6767_v19 = vpop.f32.mrf.mxu1 }
 0x36e   :  { %v6768_v56 = vadd.f32 %v6767_v19, %v6766_v40  ;;  %v10417_v40 = vpop.f32.mrf.mxu0 }
 0x36f   :  { %v6769_v37 = vpop.f32.mrf.mxu1 }
 0x370   :  { %v10401_v46 = vmax.f32 %v1453_v22, %v6768_v56  ;;  %v10423_v24 = vpop.f32.mrf.mxu0 }
 0x371   :  { %v6770_v54 = vpop.f32.mrf.mxu1 }
 0x372   :  { %v6771_v27 = vadd.f32 %v6770_v54, %v6769_v37 }
 0x374   :  { %v10405_v21 = vmax.f32 %v1454_v48, %v6771_v27  ;;  %v6862_v48 = vadd.f32 %v10363_v31, %v10361_v13  ;;  %v6868_v13 = vadd.f32 %v10371_v38, %v10369_v58  ;;  %v10429_v31 = vpop.f32.mrf.mxu0 }
 0x377   :  { %v6804_v59 = vpop.f32.mrf.mxu1 }
 0x379   :  { %v6805_v34 = vpop.f32.mrf.mxu1 }
 0x37a   :  { %v6806_v4 = vadd.f32 %v6805_v34, %v6804_v59 }
 0x37b   :  { %v6807_v33 = vpop.f32.mrf.mxu1 }
 0x37c   :  { %v1692_v50 = vmax.f32 %v1570_v14, %v6806_v4 }
 0x37d   :  { %v6808_v22 = vpop.f32.mrf.mxu1 }
 0x37e   :  { %v10413_v17 = vmax.f32 %v1692_v50, %v6859_v3  ;;  %v6809_v0 = vadd.f32 %v6808_v22, %v6807_v33 }
 0x37f   :  { %v6810_v19 = vpop.f32.mrf.mxu1 }
 0x380   :  { %v1693_v56 = vmax.f32 %v1571_v44, %v6809_v0  ;;  %v10433_v0 = vpop.f32.mrf.mxu0 }
 0x381   :  { %v6811_v37 = vpop.f32.mrf.mxu1 }
 0x382   :  { %v10419_v54 = vmax.f32 %v1693_v56, %v6862_v48  ;;  %v6812_v27 = vadd.f32 %v6811_v37, %v6810_v19  ;;  %v6978_v48 = vpop.f32.mrf.mxu0 }
 0x383   :  { %v6813_v14 = vpop.f32.mrf.mxu1 }
 0x384   :  { %v1694_v59 = vmax.f32 %v1572_v63, %v6812_v27  ;;  %v6979_v19 = vpop.f32.mrf.mxu0 }
 0x385   :  { %v6814_v34 = vpop.f32.mrf.mxu1 }
 0x386   :  { %v10425_v4 = vmax.f32 %v1694_v59, %v6865_v5  ;;  %v6815_v3 = vadd.f32 %v6814_v34, %v6813_v14  ;;  %v6981_v37 = vpop.f32.mrf.mxu0 }
 0x387   :  { %v6816_v44 = vpop.f32.mrf.mxu1 }
 0x388   :  { %v1695_v33 = vmax.f32 %v1573_v10, %v6815_v3  ;;  %v6982_v58 = vpop.f32.mrf.mxu0 }
 0x389   :  { %v6817_v50 = vpop.f32.mrf.mxu1 }
 0x38a   :  { %v10431_v22 = vmax.f32 %v1695_v33, %v6868_v13  ;;  %v10441_v10 = vpop.f32.mrf.mxu0 }
 0x38b   :  { %v6819_v42 = vpop.f32.mrf.mxu1  ;;  %12116 = vst [vmem:[#allocation31_spill] sm:$0xff] %v10441_v10 }
 0x38c   :  { %v10443_v34 = vpop.f32.mrf.mxu0 }
 0x38d   :  { %v6820_v12 = vpop.f32.mrf.mxu1  ;;  %12117 = vst [vmem:[#allocation22_spill] sm:$0xff] %v10443_v34 }
 0x38e   :  { %v10445_v33 = vpop.f32.mrf.mxu0  ;;  %v6821_v34 = vadd.f32 %v6820_v12, %v6819_v42  ;;  %v6871_v42 = vadd.f32 %v10375_v43, %v10373_v61  ;;  %v6977_v61 = vadd.f32 %v10433_v0, %v10429_v31  ;;  %v6971_v43 = vadd.f32 %v10411_v60, %v10407_v30  ;;  %v12131_v30 = vld [vmem:[#allocation23_spill] sm:$0xff] }
 0x38f   :  { %v6822_v63 = vpop.f32.mrf.mxu1  ;;  %12118 = vst [vmem:[#allocation30_spill] sm:$0xff] %v10445_v33 }
 0x390   :  { %v10447_v35 = vpop.f32.mrf.mxu0 }
 0x391   :  { %v6823_v56 = vpop.f32.mrf.mxu1  ;;  %12119 = vst [vmem:[#allocation21_spill] sm:$0xff] %v10447_v35 }
 0x392   :  { %v10449_v26 = vpop.f32.mrf.mxu0  ;;  %v6824_v10 = vadd.f32 %v6823_v56, %v6822_v63 }
 0x393   :  { %12120 = vst [vmem:[#allocation29_spill] sm:$0xff] %v10449_v26 }
 0x394   :  { %v10451_v49 = vpop.f32.mrf.mxu0 }
 0x395   :  { %12121 = vst [vmem:[#allocation20_spill] sm:$0xff] %v10451_v49  ;;  %v6818_v49 = vadd.f32 %v6817_v50, %v6816_v44 }
 0x396   :  { %v10453_v8 = vpop.f32.mrf.mxu0 }
 0x397   :  { %v10435_v27 = vpop.f32.mrf.mxu1  ;;  %12122 = vst [vmem:[#allocation28_spill] sm:$0xff] %v10453_v8  ;;  %v6877_v8 = vadd.f32 %v10383_v36, %v10381_v53  ;;  %v6983_v36 = vadd.f32 %v6982_v58, %v6981_v37 }
 0x398   :  { %v10457_v45 = vpop.f32.mrf.mxu0 }
 0x399   :  { %v10437_v5 = vpop.f32.mrf.mxu1  ;;  %12124 = vst [vmem:[#allocation27_spill] sm:$0xff] %v10457_v45  ;;  %v1698_v45 = vmax.f32 %v10405_v21, %v6824_v10 }
 0x39a   :  { %v10463_v47 = vpop.f32.mrf.mxu0 }
 0x39b   :  { %v10439_v38 = vpop.f32.mrf.mxu1  ;;  %12127 = vst [vmem:[#allocation17_spill] sm:$0xff] %v10463_v47 }
 0x39c   :  { %v10467_v9 = vpop.f32.mrf.mxu0 }
 0x39d   :  { %v6914_v14 = vpop.f32.mrf.mxu1  ;;  %12129 = vst [vmem:[#allocation16_spill] sm:$0xff] %v10467_v9  ;;  %v1696_v9 = vmax.f32 %v10397_v18, %v6818_v49 }
 0x39e   :  { %v7084_v35 = vpop.f32.mrf.mxu0 }
 0x39f   :  { %v6916_v59 = vpop.f32.mrf.mxu1  ;;  %v1818_v10 = vmax.f32 %v1696_v9, %v6871_v42  ;;  %v12141_v42 = vld [vmem:[#allocation20_spill] sm:$0xff] }
 0x3a1   :  { %v6917_v3 = vpop.f32.mrf.mxu1 }
 0x3a2   :  { %v6918_v62 = vadd.f32 %v6917_v3, %v6916_v59 }
 0x3a3   :  { %v6919_v13 = vpop.f32.mrf.mxu1 }
 0x3a5   :  { %v6920_v29 = vpop.f32.mrf.mxu1 }
 0x3a7   :  { %v6922_v52 = vpop.f32.mrf.mxu1 }
 0x3a9   :  { %v6923_v41 = vpop.f32.mrf.mxu1 }
 0x3aa   :  { %v6924_v56 = vadd.f32 %v6923_v41, %v6922_v52  ;;  %v6974_v41 = vadd.f32 %v10423_v24, %v10417_v40 }
 0x3ab   :  { %v6925_v39 = vpop.f32.mrf.mxu1 }
 0x3ac   :  { %v1940_v49 = vmax.f32 %v1818_v10, %v6924_v56  ;;  %v12142_v56 = vld [vmem:[#allocation30_spill] sm:$0xff] }
 0x3ad   :  { %v6926_v23 = vpop.f32.mrf.mxu1  ;;  %v12145_v10 = vld [vmem:[#allocation22_spill] sm:$0xff] }
 0x3ae   :  { %v6927_v12 = vadd.f32 %v6926_v23, %v6925_v39  ;;  %v2062_v31 = vmax.f32 %v1940_v49, %v6977_v61  ;;  %v6450_v61 = vld [vmem:[%s11982_s5 + $0x18] sm:$0xff] }
 0x3af   :  { %v6928_v1 = vpop.f32.mrf.mxu1 }
 0x3b1   :  { %v6929_v28 = vpop.f32.mrf.mxu1 }
 0x3b2   :  { %v6930_v44 = vadd.f32 %v6929_v28, %v6928_v1  ;;  %v6912_v28 = vadd.f32 %v10437_v5, %v10435_v27  ;;  %v12133_v27 = vld [vmem:[#allocation16_spill] sm:$0xff] }
 0x3b7   :  { %v10455_v57 = vpop.f32.mrf.mxu1 }
 0x3b8   :  { %12123 = vst [vmem:[#allocation19_spill] sm:$0xff] %v10455_v57  ;;  %v1697_v57 = vmax.f32 %v10401_v46, %v6821_v34  ;;  %v1820_v46 = vmax.f32 %v1698_v45, %v6877_v8  ;;  %v1938_v45 = vmax.f32 %v10425_v4, %v6918_v62  ;;  %v1936_v62 = vmax.f32 %v10413_v17, %v6912_v28  ;;  %v12130_v4 = vld [vmem:[#allocation32_spill] sm:$0xff] }
 0x3b9   :  { %v10459_v32 = vpop.f32.mrf.mxu1  ;;  %v6965_v60 = vadd.f32 %v12131_v30, %v12130_v4  ;;  %v6462_v28 = vld [vmem:[%s11983_s6 + $0x10] sm:$0xff] }
 0x3ba   :  { %12125 = vst [vmem:[#allocation18_spill] sm:$0xff] %v10459_v32  ;;  %v6874_v32 = vadd.f32 %v10379_v16, %v10377_v7  ;;  %v6921_v7 = vadd.f32 %v6920_v29, %v6919_v13  ;;  %v6980_v16 = vadd.f32 %v6979_v19, %v6978_v48  ;;  %v1942_v53 = vmax.f32 %v1820_v46, %v6930_v44 }
 0x3bb   :  { %v10461_v15 = vpop.f32.mrf.mxu1  ;;  %v2060_v37 = vmax.f32 %v1938_v45, %v6971_v43  ;;  %v2058_v44 = vmax.f32 %v1936_v62, %v6965_v60 }
 0x3bc   :  { %12126 = vst [vmem:[#allocation26_spill] sm:$0xff] %v10461_v15  ;;  %v1819_v63 = vmax.f32 %v1697_v57, %v6874_v32  ;;  %v6915_v57 = vadd.f32 %v6914_v14, %v10439_v38  ;;  %v1939_v52 = vmax.f32 %v10431_v22, %v6921_v7  ;;  %v2064_v32 = vmax.f32 %v1942_v53, %v6983_v36 }
 0x3bd   :  { %v10465_v51 = vpop.f32.mrf.mxu1 }
 0x3be   :  { %12128 = vst [vmem:[#allocation25_spill] sm:$0xff] %v10465_v51  ;;  %v7085_v51 = vpop.f32.mrf.mxu0  ;;  %v1941_v47 = vmax.f32 %v1819_v63, %v6927_v12  ;;  %v1937_v40 = vmax.f32 %v10419_v54, %v6915_v57  ;;  %v6459_v57 = vld [vmem:[%s11982_s5 + $0x28] sm:$0xff] }
 0x3bf   :  { %v7022_v6 = vpop.f32.mrf.mxu1 }
 0x3c0   :  { %v7087_v34 = vpop.f32.mrf.mxu0  ;;  %v2063_v9 = vmax.f32 %v1941_v47, %v6980_v16  ;;  %v6968_v47 = vadd.f32 %v10403_v2, %v10399_v20  ;;  %v12138_v2 = vld [vmem:[#allocation19_spill] sm:$0xff] }
 0x3c1   :  { %v7023_v11 = vpop.f32.mrf.mxu1  ;;  %v12139_v17 = vld [vmem:[#allocation18_spill] sm:$0xff] }
 0x3c2   :  { %v7088_v23 = vpop.f32.mrf.mxu0  ;;  %v7018_v59 = vadd.f32 %v12139_v17, %v12138_v2 }
 0x3c3   :  { %v7025_v55 = vpop.f32.mrf.mxu1  ;;  %v7089_v18 = vadd.f32 %v7088_v23, %v7087_v34  ;;  %v12134_v58 = vld [vmem:[#allocation26_spill] sm:$0xff]  ;;  %v12143_v34 = vld [vmem:[#allocation21_spill] sm:$0xff] }
 0x3c4   :  { %v2180_v46 = vmax.f32 %v2058_v44, %v7018_v59  ;;  %v7074_v7 = vadd.f32 %v12143_v34, %v12142_v56  ;;  %v6458_v23 = vld [vmem:[%s11982_s5 + $0x20] sm:$0xff]  ;;  %v6487_v44 = vld [vmem:[%s11982_s5 + $0x68] sm:$0xff] }
 0x3c5   :  { %v7026_v33 = vpop.f32.mrf.mxu1  ;;  %v12135_v54 = vld [vmem:[#allocation25_spill] sm:$0xff] }
 0x3c6   :  { %v7027_v0 = vadd.f32 %v7026_v33, %v7025_v55  ;;  %v12132_v55 = vld [vmem:[#allocation17_spill] sm:$0xff]  ;;  %v7021_v38 = vadd.f32 %v12135_v54, %v12134_v58 }
 0x3c7   :  { %v7028_v26 = vpop.f32.mrf.mxu1  ;;  %v7083_v5 = vadd.f32 %v12133_v27, %v12132_v55  ;;  %v12140_v33 = vld [vmem:[#allocation29_spill] sm:$0xff]  ;;  %v6473_v55 = vld [vmem:[%s11982_s5 + $0x48] sm:$0xff] }
 0x3c8   :  { %v7077_v12 = vadd.f32 %v12141_v42, %v12140_v33  ;;  %v6483_v27 = vld [vmem:[%s11983_s6 + $0x28] sm:$0xff] }
 0x3c9   :  { %v7029_v15 = vpop.f32.mrf.mxu1 }
 0x3ca   :  { %v7030_v29 = vadd.f32 %v7029_v15, %v7028_v26  ;;  %v7086_v26 = vadd.f32 %v7085_v51, %v7084_v35  ;;  %v2061_v15 = vmax.f32 %v1939_v52, %v6974_v41  ;;  %v12137_v35 = vld [vmem:[#allocation27_spill] sm:$0xff]  ;;  %v6469_v52 = vld [vmem:[%s11983_s6 + $0x18] sm:$0xff] }
 0x3cb   :  { %v7031_v50 = vpop.f32.mrf.mxu1  ;;  %v6453_v41 = vld [vmem:[%s11983_s6 + $0x8] sm:$0xff] }
 0x3cc   :  { %v2184_v24 = vmax.f32 %v2062_v31, %v7030_v29  ;;  %v2183_v14 = vmax.f32 %v2061_v15, %v7027_v0  ;;  %v6466_v31 = vld [vmem:[%s11982_s5 + $0x38] sm:$0xff]  ;;  %v6476_v0 = vld [vmem:[%s11983_s6 + $0x20] sm:$0xff] }
 0x3cd   :  { %v7032_v21 = vpop.f32.mrf.mxu1 }
 0x3ce   :  { %v7033_v39 = vadd.f32 %v7032_v21, %v7031_v50  ;;  %v10511_v13 = vmax.f32 %v2184_v24, %v7083_v5  ;;  %v12144_v21 = vld [vmem:[#allocation31_spill] sm:$0xff] }
 0x3cf   :  { %v7034_v25 = vpop.f32.mrf.mxu1  ;;  %v7071_v53 = vadd.f32 %v12145_v10, %v12144_v21 }
 0x3d0   :  { %v2185_v22 = vmax.f32 %v2063_v9, %v7033_v39  ;;  %v2310_v39 = vld [vmem:[%s11982_s5 + $0x8] sm:$0xff] }
 0x3d1   :  { %v7035_v8 = vpop.f32.mrf.mxu1  ;;  %v10541_v49 = vmax.f32 %v2180_v46, %v7071_v53  ;;  %v6493_v53 = vld [vmem:[%s11982_s5 + $0x70] sm:$0xff] }
 0x3d2   :  { %v7036_v1 = vadd.f32 %v7035_v8, %v7034_v25  ;;  %v7024_v25 = vadd.f32 %v7023_v11, %v7022_v6  ;;  %v10501_v20 = vmax.f32 %v2185_v22, %v7086_v26  ;;  %v2059_v6 = vmax.f32 %v1937_v40, %v6968_v47  ;;  %v12136_v11 = vld [vmem:[#allocation28_spill] sm:$0xff]  ;;  %v2393_v8 = vld [vmem:[%s11983_s6] sm:$0xff] }
 0x3d3   :  { %v7080_v51 = vadd.f32 %v12137_v35, %v12136_v11  ;;  %v6479_v11 = vld [vmem:[%s11982_s5 + $0x50] sm:$0xff]  ;;  %v6480_v35 = vld [vmem:[%s11982_s5 + $0x58] sm:$0xff] }
 0x3d4   :  { %v2186_v48 = vmax.f32 %v2064_v32, %v7036_v1  ;;  %v2182_v3 = vmax.f32 %v2060_v37, %v7024_v25  ;;  %v2181_v50 = vmax.f32 %v2059_v6, %v7021_v38  ;;  %v6472_v37 = vld [vmem:[%s11982_s5 + $0x40] sm:$0xff] }
 0x3d5   :  { %v10519_v63 = vmax.f32 %v2183_v14, %v7080_v51  ;;  %v6490_v51 = vld [vmem:[%s11983_s6 + $0x30] sm:$0xff] }
 0x3d6   :  { %v10492_v19 = vmax.f32 %v2186_v48, %v7089_v18  ;;  %v10527_v16 = vmax.f32 %v2182_v3, %v7077_v12  ;;  %v10535_v36 = vmax.f32 %v2181_v50, %v7074_v7  ;;  %v6465_v18 = vld [vmem:[%s11982_s5 + $0x30] sm:$0xff]  ;;  %v6486_v12 = vld [vmem:[%s11982_s5 + $0x60] sm:$0xff]  ;;  %v6497_v50 = vld [vmem:[%s11983_s6 + $0x38] sm:$0xff] }
 0x3d8   :  { %7887 = vmatprep.subr.mxu1 %v10492_v19  ;;  %7904 = vmatprep.subr.mxu0 %v10492_v19 }
 0x3d9   :  { %7888 = vmatpush3.msra.mxu1 %v10492_v19  ;;  %7905 = vmatpush3.msra.mxu0 %v10492_v19 }
 0x3da   :  { %7889 = vmatprep.subr.mxu1 %v10501_v20  ;;  %7906 = vmatprep.subr.mxu0 %v10501_v20 }
 0x3db   :  { %7890 = vmatpush3.msra.mxu1 %v10501_v20  ;;  %7907 = vmatpush3.msra.mxu0 %v10501_v20 }
 0x3dc   :  { %7891 = vmatprep.subr.mxu1 %v10511_v13  ;;  %7908 = vmatprep.subr.mxu0 %v10511_v13 }
 0x3dd   :  { %7892 = vmatpush3.msra.mxu1 %v10511_v13  ;;  %7909 = vmatpush3.msra.mxu0 %v10511_v13 }
 0x3de   :  { %7893 = vmatprep.subr.mxu1 %v10519_v63  ;;  %7910 = vmatprep.subr.mxu0 %v10519_v63 }
 0x3df   :  { %7894 = vmatpush3.msra.mxu1 %v10519_v63  ;;  %7911 = vmatpush3.msra.mxu0 %v10519_v63 }
 0x3e0   :  { %7895 = vmatprep.subr.mxu1 %v10527_v16  ;;  %7912 = vmatprep.subr.mxu0 %v10527_v16 }
 0x3e1   :  { %7896 = vmatpush3.msra.mxu1 %v10527_v16  ;;  %7913 = vmatpush3.msra.mxu0 %v10527_v16 }
 0x3e2   :  { %7897 = vmatprep.subr.mxu1 %v10535_v36  ;;  %7914 = vmatprep.subr.mxu0 %v10535_v36 }
 0x3e3   :  { %7898 = vmatpush3.msra.mxu1 %v10535_v36  ;;  %7915 = vmatpush3.msra.mxu0 %v10535_v36 }
 0x3e4   :  { %7899 = vmatprep.subr.mxu1 %v10541_v49  ;;  %7916 = vmatprep.subr.mxu0 %v10541_v49 }
 0x3e5   :  { %7900 = vmatpush3.msra.mxu1 %v10541_v49  ;;  %7917 = vmatpush3.msra.mxu0 %v10541_v49 }
 0x3e6   :  { %7919 = vmatmul.mubr.msk.f32.vlgmr.msra.gmra.mxu0 %vm2311_vm1, %v6450_v61  ;;  %7931 = vmatprep.subr.mxu0 %v10492_v19  ;;  %v6494_v61 = vld [vmem:[%s11982_s5 + $0x78] sm:$0xff] }
 0x3e7   :  { %7932 = vmatpush3.msra.mxu0 %v10492_v19  ;;  %7902 = vmatmul.mubr.msk.f32.vlgmr.msra.gmra.mxu1 %vm2311_vm1, %v2310_v39  ;;  %v6504_v39 = vld [vmem:[%s11983_s6 + $0x40] sm:$0xff] }
 0x3e8   :  { %7933 = vmatprep.subr.mxu0 %v10501_v20  ;;  %7945 = vmatprep.mubr.msk.f32.mxu0 %vm2311_vm1, %v6458_v23  ;;  %v12146_v23 = vld [vmem:[#allocation51_spill] sm:$0xff] }
 0x3e9   :  { %7934 = vmatpush3.msra.mxu0 %v10501_v20  ;;  %7921 = vmatprep.subr.mxu1 %v6453_v41 }
 0x3ea   :  { %7935 = vmatprep.subr.mxu0 %v10511_v13  ;;  %7922 = vmatpush3.msra.mxu1 %v6453_v41 }
 0x3eb   :  { %7936 = vmatpush3.msra.mxu0 %v10511_v13  ;;  %7926 = vmatprep.subr.mxu1 %v2393_v8 }
 0x3ec   :  { %7937 = vmatprep.subr.mxu0 %v10519_v63 }
 0x3ed   :  { %7938 = vmatpush3.msra.mxu0 %v10519_v63 }
 0x3ee   :  { %7939 = vmatprep.subr.mxu0 %v10527_v16 }
 0x3ef   :  { %7940 = vmatpush3.msra.mxu0 %v10527_v16 }
 0x3f0   :  { %7941 = vmatprep.subr.mxu0 %v10535_v36 }
 0x3f1   :  { %7942 = vmatpush3.msra.mxu0 %v10535_v36 }
 0x3f2   :  { %7943 = vmatprep.subr.mxu0 %v10541_v49 }
 0x3f3   :  { %7944 = vmatpush3.msra.mxu0 %v10541_v49 }
 0x3f4   :  { %7946 = vmatmul.mubr.msk.f32.vlgmr.msra.gmra.mxu0 %vm2311_vm1, %v6459_v57  ;;  %7970 = vmatprep.subr.mxu0 %v6469_v52  ;;  %v10733_v57 = vmax.f32 %v12146_v23, 0.0 }
 0x3f5   :  { %7971 = vmatpush3.msra.mxu0 %v6469_v52 }
 0x3f6   :  { %7975 = vmatprep.subr.mxu0 %v10492_v19 }
 0x4a6   :  { %v7920_v9 = vpop.f32.mrf.mxu0 }
 0x4a7   :  { %v7903_v32 = vpop.f32.mrf.mxu1 }
 0x4a8   :  { %v2469_v29 = vpop.f32.mrf.mxu0 }
 0x4a9   :  { %7923 = vmatprep.mubr.msk.f32.mxu1 %vm2480_vm2, %v2469_v29  ;;  %v2384_v1 = vpop.f32.mrf.mxu1 }
 0x4aa   :  { %7924 = vmatmul.mubr.msk.f32.vlgmr.msra.gmra.mxu1 %vm2480_vm2, %v7920_v9 }
 0x4ab   :  { %7927 = vmatpush3.msra.mxu1 %v2393_v8  ;;  %7928 = vmatprep.mubr.msk.f32.mxu1 %vm2480_vm2, %v2384_v1  ;;  %v6500_v1 = vld [vmem:[%s11982_s5 + $0x80] sm:$0xff] }
 0x4ac   :  { %7948 = vmatprep.subr.mxu1 %v6462_v28 }
 0x4ae   :  { %7929 = vmatmul.mubr.msk.f32.vlgmr.msra.gmra.mxu1 %vm2480_vm2, %v7903_v32 }
 0x4af   :  { %7949 = vmatpush3.msra.mxu1 %v6462_v28 }
 0x4b0   :  { %7953 = vmatprep.subr.mxu1 %v10492_v19 }
 0x4b4   :  { %v7947_v45 = vpop.f32.mrf.mxu0 }
 0x4b6   :  { %v2718_v43 = vpop.f32.mrf.mxu0 }
 0x4b7   :  { %7950 = vmatprep.mubr.msk.f32.mxu1 %vm2480_vm2, %v2718_v43  ;;  %v12150_v43 = vld [vmem:[#allocation50_spill] sm:$0xff] }
 0x4b8   :  { %7951 = vmatmul.mubr.msk.f32.vlgmr.msra.gmra.mxu1 %vm2480_vm2, %v7947_v45  ;;  %v8287_v45 = vld [vmem:[%s11979_s4 + $0x78] sm:$0xff] }
 0x4b9   :  { %7954 = vmatpush3.msra.mxu1 %v10492_v19  ;;  %7967 = vmatprep.mubr.msk.f32.mxu1 %vm2311_vm1, %v6465_v18  ;;  %v10779_v18 = vmax.f32 %v12150_v43, 0.0  ;;  %v8290_v43 = vld [vmem:[%s11979_s4 + $0x80] sm:$0xff] }
 0x4ba   :  { %7955 = vmatprep.subr.mxu1 %v10501_v20 }
 0x4bb   :  { %7956 = vmatpush3.msra.mxu1 %v10501_v20 }
 0x4bc   :  { %7957 = vmatprep.subr.mxu1 %v10511_v13 }
 0x4bd   :  { %7958 = vmatpush3.msra.mxu1 %v10511_v13 }
 0x4be   :  { %7959 = vmatprep.subr.mxu1 %v10519_v63 }
 0x4bf   :  { %7960 = vmatpush3.msra.mxu1 %v10519_v63 }
 0x4c0   :  { %7961 = vmatprep.subr.mxu1 %v10527_v16 }
 0x4c1   :  { %7962 = vmatpush3.msra.mxu1 %v10527_v16 }
 0x4c2   :  { %7963 = vmatprep.subr.mxu1 %v10535_v36 }
 0x4c3   :  { %7964 = vmatpush3.msra.mxu1 %v10535_v36 }
 0x4c4   :  { %7965 = vmatprep.subr.mxu1 %v10541_v49 }
 0x4c5   :  { %7966 = vmatpush3.msra.mxu1 %v10541_v49 }
 0x4c6   :  { %7968 = vmatmul.mubr.msk.f32.vlgmr.msra.gmra.mxu1 %vm2311_vm1, %v6466_v31  ;;  %7992 = vmatprep.subr.mxu1 %v6476_v0 }
 0x4c7   :  { %7993 = vmatpush3.msra.mxu1 %v6476_v0  ;;  %v12152_v0 = vld [vmem:[#allocation49_spill] sm:$0xff] }
 0x4c8   :  { %7997 = vmatprep.subr.mxu1 %v10492_v19 }
 0x56a   :  { %v7925_v22 = vpop.f32.mrf.mxu1 }
 0x56c   :  { %v2553_v48 = vpop.f32.mrf.mxu1 }
 0x56e   :  { %v7930_v40 = vpop.f32.mrf.mxu1 }
 0x56f   :  { %v2640_v47 = vadd.f32 %v7930_v40, %v7925_v22  ;;  %v10787_v22 = vmax.f32 %v12152_v0, 0.0  ;;  %v8292_v0 = vld [vmem:[%s11979_s4 + $0x90] sm:$0xff] }
 0x570   :  { %v2634_v26 = vpop.f32.mrf.mxu1 }
 0x571   :  { %v2635_v15 = vadd.f32 %v2634_v26, %v2553_v48  ;;  %v12153_v48 = vld [vmem:[#allocation33_spill] sm:$0xff] }
 0x572   :  { %v10791_v40 = vmax.f32 %v12153_v48, 0.0  ;;  %v8293_v48 = vld [vmem:[%s11979_s4 + $0xa8] sm:$0xff] }
 0x578   :  { %v7952_v25 = vpop.f32.mrf.mxu1 }
 0x579   :  { %v2811_v24 = vadd.f32 %v7952_v25, %v2640_v47  ;;  %v12154_v47 = vld [vmem:[#allocation48_spill] sm:$0xff] }
 0x57a   :  { %v2801_v62 = vpop.f32.mrf.mxu1  ;;  %v10795_v26 = vmax.f32 %v12154_v47, 0.0  ;;  %v8294_v47 = vld [vmem:[%s11979_s4 + $0xa0] sm:$0xff] }
 0x57b   :  { %v2810_v4 = vadd.f32 %v2801_v62, %v2635_v15  ;;  %v12155_v15 = vld [vmem:[#allocation14_spill] sm:$0xff] }
 0x57c   :  { %v10799_v25 = vmax.f32 %v12155_v15, 0.0  ;;  %v8295_v15 = vld [vmem:[%s11979_s4 + $0xb8] sm:$0xff] }
 0x586   :  { %v7969_v30 = vpop.f32.mrf.mxu1 }
 0x588   :  { %v2887_v60 = vpop.f32.mrf.mxu1 }
 0x589   :  { %7972 = vmatprep.mubr.msk.f32.mxu0 %vm2480_vm2, %v2887_v60  ;;  %v12158_v60 = vld [vmem:[#allocation46_spill] sm:$0xff] }
 0x58a   :  { %7973 = vmatmul.mubr.msk.f32.vlgmr.msra.gmra.mxu0 %vm2480_vm2, %v7969_v30 }
 0x58b   :  { %7976 = vmatpush3.msra.mxu0 %v10492_v19  ;;  %7989 = vmatprep.mubr.msk.f32.mxu0 %vm2311_vm1, %v6472_v37  ;;  %v10811_v37 = vmax.f32 %v12158_v60, 0.0  ;;  %v8298_v60 = vld [vmem:[%s11979_s4 + $0xc0] sm:$0xff] }
 0x58c   :  { %7977 = vmatprep.subr.mxu0 %v10501_v20 }
 0x58d   :  { %7978 = vmatpush3.msra.mxu0 %v10501_v20 }
 0x58e   :  { %7979 = vmatprep.subr.mxu0 %v10511_v13 }
 0x58f   :  { %7980 = vmatpush3.msra.mxu0 %v10511_v13 }
 0x590   :  { %7981 = vmatprep.subr.mxu0 %v10519_v63 }
 0x591   :  { %7982 = vmatpush3.msra.mxu0 %v10519_v63 }
 0x592   :  { %7983 = vmatprep.subr.mxu0 %v10527_v16 }
 0x593   :  { %7984 = vmatpush3.msra.mxu0 %v10527_v16 }
 0x594   :  { %7985 = vmatprep.subr.mxu0 %v10535_v36 }
 0x595   :  { %7986 = vmatpush3.msra.mxu0 %v10535_v36 }
 0x596   :  { %7987 = vmatprep.subr.mxu0 %v10541_v49 }
 0x597   :  { %7988 = vmatpush3.msra.mxu0 %v10541_v49 }
 0x598   :  { %7990 = vmatmul.mubr.msk.f32.vlgmr.msra.gmra.mxu0 %vm2311_vm1, %v6473_v55  ;;  %8014 = vmatprep.subr.mxu0 %v6483_v27  ;;  %v12159_v55 = vld [vmem:[#allocation12_spill] sm:$0xff] }
 0x599   :  { %8015 = vmatpush3.msra.mxu0 %v6483_v27  ;;  %v10815_v27 = vmax.f32 %v12159_v55, 0.0  ;;  %v8299_v55 = vld [vmem:[%s11979_s4 + $0xd8] sm:$0xff] }
 0x59a   :  { %8019 = vmatprep.subr.mxu0 %v10492_v19 }
 0x64a   :  { %v7974_v5 = vpop.f32.mrf.mxu0 }
 0x64b   :  { %v2980_v58 = vadd.f32 %v7974_v5, %v2811_v24  ;;  %v12156_v24 = vld [vmem:[#allocation47_spill] sm:$0xff]  ;;  %v12160_v5 = vld [vmem:[#allocation45_spill] sm:$0xff] }
 0x64c   :  { %v2970_v54 = vpop.f32.mrf.mxu0  ;;  %v10803_v62 = vmax.f32 %v12156_v24, 0.0  ;;  %v8296_v24 = vld [vmem:[%s11979_s4 + $0xb0] sm:$0xff] }
 0x64d   :  { %v2979_v38 = vadd.f32 %v2970_v54, %v2810_v4  ;;  %v12157_v4 = vld [vmem:[#allocation13_spill] sm:$0xff]  ;;  %v12161_v54 = vld [vmem:[#allocation11_spill] sm:$0xff] }
 0x64e   :  { %v10807_v30 = vmax.f32 %v12157_v4, 0.0  ;;  %v8297_v4 = vld [vmem:[%s11979_s4 + $0xc8] sm:$0xff] }
 0x658   :  { %v7991_v14 = vpop.f32.mrf.mxu0 }
 0x65a   :  { %v3056_v6 = vpop.f32.mrf.mxu0 }
 0x65b   :  { %7994 = vmatprep.mubr.msk.f32.mxu1 %vm2480_vm2, %v3056_v6 }
 0x65c   :  { %7995 = vmatmul.mubr.msk.f32.vlgmr.msra.gmra.mxu1 %vm2480_vm2, %v7991_v14  ;;  %v12162_v14 = vld [vmem:[#allocation44_spill] sm:$0xff] }
 0x65d   :  { %7998 = vmatpush3.msra.mxu1 %v10492_v19  ;;  %8011 = vmatprep.mubr.msk.f32.mxu1 %vm2311_vm1, %v6479_v11  ;;  %v10827_v6 = vmax.f32 %v12162_v14, 0.0  ;;  %v12163_v11 = vld [vmem:[#allocation10_spill] sm:$0xff]  ;;  %v8302_v14 = vld [vmem:[%s11979_s4 + $0x150] sm:$0xff] }
 0x65e   :  { %7999 = vmatprep.subr.mxu1 %v10501_v20 }
 0x65f   :  { %8000 = vmatpush3.msra.mxu1 %v10501_v20 }
 0x660   :  { %8001 = vmatprep.subr.mxu1 %v10511_v13 }
 0x661   :  { %8002 = vmatpush3.msra.mxu1 %v10511_v13 }
 0x662   :  { %8003 = vmatprep.subr.mxu1 %v10519_v63 }
 0x663   :  { %8004 = vmatpush3.msra.mxu1 %v10519_v63 }
 0x664   :  { %8005 = vmatprep.subr.mxu1 %v10527_v16 }
 0x665   :  { %8006 = vmatpush3.msra.mxu1 %v10527_v16 }
 0x666   :  { %8007 = vmatprep.subr.mxu1 %v10535_v36 }
 0x667   :  { %8008 = vmatpush3.msra.mxu1 %v10535_v36 }
 0x668   :  { %8009 = vmatprep.subr.mxu1 %v10541_v49 }
 0x669   :  { %8010 = vmatpush3.msra.mxu1 %v10541_v49 }
 0x66a   :  { %8012 = vmatmul.mubr.msk.f32.vlgmr.msra.gmra.mxu1 %vm2311_vm1, %v6480_v35  ;;  %8036 = vmatprep.subr.mxu1 %v6490_v51  ;;  %v10831_v35 = vmax.f32 %v12163_v11, 0.0  ;;  %v8303_v11 = vld [vmem:[%s11979_s4 + $0x168] sm:$0xff] }
 0x66b   :  { %8037 = vmatpush3.msra.mxu1 %v6490_v51  ;;  %v12164_v51 = vld [vmem:[#allocation43_spill] sm:$0xff] }
 0x66c   :  { %8041 = vmatprep.subr.mxu1 %v10492_v19 }
 0x71c   :  { %v7996_v2 = vpop.f32.mrf.mxu1 }
 0x71d   :  { %v3149_v17 = vadd.f32 %v7996_v2, %v2980_v58  ;;  %v10819_v58 = vmax.f32 %v12160_v5, 0.0  ;;  %v10835_v2 = vmax.f32 %v12164_v51, 0.0  ;;  %v8300_v5 = vld [vmem:[%s11979_s4 + $0xd0] sm:$0xff]  ;;  %v8304_v51 = vld [vmem:[%s11979_s4 + $0x160] sm:$0xff] }
 0x71e   :  { %v3139_v59 = vpop.f32.mrf.mxu1 }
 0x71f   :  { %v3148_v3 = vadd.f32 %v3139_v59, %v2979_v38  ;;  %v10823_v38 = vmax.f32 %v12161_v54, 0.0  ;;  %v8301_v54 = vld [vmem:[%s11979_s4 + $0x158] sm:$0xff] }
 0x72a   :  { %v8013_v33 = vpop.f32.mrf.mxu1 }
 0x72c   :  { %v3225_v42 = vpop.f32.mrf.mxu1 }
 0x72d   :  { %8016 = vmatprep.mubr.msk.f32.mxu0 %vm2480_vm2, %v3225_v42  ;;  %v12167_v42 = vld [vmem:[#allocation7_spill] sm:$0xff] }
 0x72e   :  { %8017 = vmatmul.mubr.msk.f32.vlgmr.msra.gmra.mxu0 %vm2480_vm2, %v8013_v33 }
 0x72f   :  { %8020 = vmatpush3.msra.mxu0 %v10492_v19  ;;  %8033 = vmatprep.mubr.msk.f32.mxu0 %vm2311_vm1, %v6486_v12  ;;  %v10847_v12 = vmax.f32 %v12167_v42, 0.0  ;;  %v8307_v42 = vld [vmem:[%s11979_s4 + $0x188] sm:$0xff] }
 0x730   :  { %8021 = vmatprep.subr.mxu0 %v10501_v20 }
 0x731   :  { %8022 = vmatpush3.msra.mxu0 %v10501_v20 }
 0x732   :  { %8023 = vmatprep.subr.mxu0 %v10511_v13 }
 0x733   :  { %8024 = vmatpush3.msra.mxu0 %v10511_v13 }
 0x734   :  { %8025 = vmatprep.subr.mxu0 %v10519_v63 }
 0x735   :  { %8026 = vmatpush3.msra.mxu0 %v10519_v63 }
 0x736   :  { %8027 = vmatprep.subr.mxu0 %v10527_v16 }
 0x737   :  { %8028 = vmatpush3.msra.mxu0 %v10527_v16 }
 0x738   :  { %8029 = vmatprep.subr.mxu0 %v10535_v36 }
 0x739   :  { %8030 = vmatpush3.msra.mxu0 %v10535_v36 }
 0x73a   :  { %8031 = vmatprep.subr.mxu0 %v10541_v49 }
 0x73b   :  { %8032 = vmatpush3.msra.mxu0 %v10541_v49 }
 0x73c   :  { %8034 = vmatmul.mubr.msk.f32.vlgmr.msra.gmra.mxu0 %vm2311_vm1, %v6487_v44  ;;  %8058 = vmatprep.subr.mxu0 %v6497_v50  ;;  %v12168_v44 = vld [vmem:[#allocation41_spill] sm:$0xff] }
 0x73d   :  { %8059 = vmatpush3.msra.mxu0 %v6497_v50  ;;  %v10851_v50 = vmax.f32 %v12168_v44, 0.0  ;;  %v8308_v44 = vld [vmem:[%s11979_s4 + $0x180] sm:$0xff] }
 0x73e   :  { %8063 = vmatprep.subr.mxu0 %v10492_v19 }
 0x7ee   :  { %v8018_v46 = vpop.f32.mrf.mxu0 }
 0x7ef   :  { %v3318_v56 = vadd.f32 %v8018_v46, %v3149_v17  ;;  %v12165_v17 = vld [vmem:[#allocation9_spill] sm:$0xff]  ;;  %v12169_v46 = vld [vmem:[#allocation8_spill] sm:$0xff] }
 0x7f0   :  { %v3308_v34 = vpop.f32.mrf.mxu0  ;;  %v10839_v59 = vmax.f32 %v12165_v17, 0.0  ;;  %v8305_v17 = vld [vmem:[%s11979_s4 + $0x178] sm:$0xff] }
 0x7f1   :  { %v3317_v7 = vadd.f32 %v3308_v34, %v3148_v3  ;;  %v12166_v3 = vld [vmem:[#allocation42_spill] sm:$0xff]  ;;  %v12170_v34 = vld [vmem:[#allocation40_spill] sm:$0xff] }
 0x7f2   :  { %v10843_v33 = vmax.f32 %v12166_v3, 0.0  ;;  %v8306_v3 = vld [vmem:[%s11979_s4 + $0x170] sm:$0xff] }
 0x7fc   :  { %v8035_v21 = vpop.f32.mrf.mxu0 }
 0x7fe   :  { %v3394_v10 = vpop.f32.mrf.mxu0 }
 0x7ff   :  { %8038 = vmatprep.mubr.msk.f32.mxu1 %vm2480_vm2, %v3394_v10 }
 0x800   :  { %8039 = vmatmul.mubr.msk.f32.vlgmr.msra.gmra.mxu1 %vm2480_vm2, %v8035_v21  ;;  %v12171_v21 = vld [vmem:[#allocation5_spill] sm:$0xff] }
 0x801   :  { %8042 = vmatpush3.msra.mxu1 %v10492_v19  ;;  %8055 = vmatprep.mubr.msk.f32.mxu1 %vm2311_vm1, %v6493_v53  ;;  %v10863_v10 = vmax.f32 %v12171_v21, 0.0  ;;  %v12172_v53 = vld [vmem:[#allocation39_spill] sm:$0xff] }
 0x802   :  { %8043 = vmatprep.subr.mxu1 %v10501_v20  ;;  %v8311_v21 = vld [vmem:[%s11979_s4 + $0x1a8] sm:$0xff] }
 0x803   :  { %8044 = vmatpush3.msra.mxu1 %v10501_v20 }
 0x804   :  { %8045 = vmatprep.subr.mxu1 %v10511_v13 }
 0x805   :  { %8046 = vmatpush3.msra.mxu1 %v10511_v13 }
 0x806   :  { %8047 = vmatprep.subr.mxu1 %v10519_v63 }
 0x807   :  { %8048 = vmatpush3.msra.mxu1 %v10519_v63 }
 0x808   :  { %8049 = vmatprep.subr.mxu1 %v10527_v16 }
 0x809   :  { %8050 = vmatpush3.msra.mxu1 %v10527_v16 }
 0x80a   :  { %8051 = vmatprep.subr.mxu1 %v10535_v36 }
 0x80b   :  { %8052 = vmatpush3.msra.mxu1 %v10535_v36 }
 0x80c   :  { %8053 = vmatprep.subr.mxu1 %v10541_v49 }
 0x80d   :  { %8054 = vmatpush3.msra.mxu1 %v10541_v49 }
 0x80e   :  { %8056 = vmatmul.mubr.msk.f32.vlgmr.msra.gmra.mxu1 %vm2311_vm1, %v6494_v61  ;;  %8080 = vmatprep.subr.mxu1 %v6504_v39  ;;  %v10867_v61 = vmax.f32 %v12172_v53, 0.0  ;;  %v8312_v53 = vld [vmem:[%s11979_s4 + $0x1a0] sm:$0xff] }
 0x80f   :  { %8081 = vmatpush3.msra.mxu1 %v6504_v39  ;;  %v12173_v39 = vld [vmem:[#allocation6_spill] sm:$0xff] }
 0x810   :  { %7198 = vmatprep.subr.mxu1 %v10733_v57  ;;  %v10871_v23 = vmax.f32 %v12173_v39, 0.0  ;;  %v8313_v39 = vld [vmem:[%s11979_s4 + $0x1b8] sm:$0xff] }
 0x8c0   :  { %v8040_v52 = vpop.f32.mrf.mxu1 }
 0x8c1   :  { %v10737_v41 = vadd.f32 %v8040_v52, %v3318_v56  ;;  %v10855_v56 = vmax.f32 %v12169_v46, 0.0  ;;  %v12174_v52 = vld [vmem:[#allocation38_spill] sm:$0xff]  ;;  %v8309_v46 = vld [vmem:[%s11979_s4 + $0x198] sm:$0xff] }
 0x8c2   :  { %v3477_v8 = vpop.f32.mrf.mxu1 }
 0x8c3   :  { %v10739_v9 = vadd.f32 %v3477_v8, %v3317_v7  ;;  %v10859_v7 = vmax.f32 %v12170_v34, 0.0  ;;  %v10875_v8 = vmax.f32 %v12174_v52, 0.0  ;;  %v8310_v34 = vld [vmem:[%s11979_s4 + $0x190] sm:$0xff] }
 0x8c4   :  { %v8314_v52 = vld [vmem:[%s11979_s4 + $0x1b0] sm:$0xff] }
 0x8ce   :  { %v8057_v32 = vpop.f32.mrf.mxu1 }
 0x8d0   :  { %v3563_v29 = vpop.f32.mrf.mxu1 }
 0x8d1   :  { %8060 = vmatprep.mubr.msk.f32.mxu0 %vm2480_vm2, %v3563_v29 }
 0x8d2   :  { %8061 = vmatmul.mubr.msk.f32.vlgmr.msra.gmra.mxu0 %vm2480_vm2, %v8057_v32  ;;  %v12175_v32 = vld [vmem:[#allocation3_spill] sm:$0xff] }
 0x8d3   :  { %8064 = vmatpush3.msra.mxu0 %v10492_v19  ;;  %8077 = vmatprep.mubr.msk.f32.mxu0 %vm2311_vm1, %v6500_v1  ;;  %v6501_v19 = vld [vmem:[%s11982_s5 + $0x88] sm:$0xff]  ;;  %v10879_v29 = vmax.f32 %v12175_v32, 0.0  ;;  %v12176_v1 = vld [vmem:[#allocation37_spill] sm:$0xff] }
 0x8d4   :  { %8065 = vmatprep.subr.mxu0 %v10501_v20  ;;  %v8315_v32 = vld [vmem:[%s11979_s4 + $0x238] sm:$0xff] }
 0x8d5   :  { %8066 = vmatpush3.msra.mxu0 %v10501_v20  ;;  %v12147_v20 = vld [vmem:[#allocation36_spill] sm:$0xff] }
 0x8d6   :  { %8067 = vmatprep.subr.mxu0 %v10511_v13 }
 0x8d7   :  { %8068 = vmatpush3.msra.mxu0 %v10511_v13  ;;  %v10763_v13 = vmax.f32 %v12147_v20, 0.0  ;;  %v12177_v20 = vld [vmem:[#allocation4_spill] sm:$0xff] }
 0x8d8   :  { %8069 = vmatprep.subr.mxu0 %v10519_v63 }
 0x8d9   :  { %8070 = vmatpush3.msra.mxu0 %v10519_v63  ;;  %v12148_v63 = vld [vmem:[#allocation2_spill] sm:$0xff] }
 0x8da   :  { %8071 = vmatprep.subr.mxu0 %v10527_v16  ;;  %v10767_v28 = vmax.f32 %v12148_v63, 0.0  ;;  %v10887_v63 = vmax.f32 %v12177_v20, 0.0  ;;  %v8317_v20 = vld [vmem:[%s11979_s4 + $0x248] sm:$0xff] }
 0x8db   :  { %8072 = vmatpush3.msra.mxu0 %v10527_v16  ;;  %v12149_v16 = vld [vmem:[#allocation35_spill] sm:$0xff] }
 0x8dc   :  { %8073 = vmatprep.subr.mxu0 %v10535_v36 }
 0x8dd   :  { %8074 = vmatpush3.msra.mxu0 %v10535_v36  ;;  %v10772_v36 = vmax.f32 %v12149_v16, 0.0  ;;  %v8288_v16 = vld [vmem:[%s11979_s4 + $0x70] sm:$0xff] }
 0x8de   :  { %8075 = vmatprep.subr.mxu0 %v10541_v49 }
 0x8df   :  { %8076 = vmatpush3.msra.mxu0 %v10541_v49  ;;  %v12151_v49 = vld [vmem:[#allocation34_spill] sm:$0xff] }
 0x8e0   :  { %8078 = vmatmul.mubr.msk.f32.vlgmr.msra.gmra.mxu0 %vm2311_vm1, %v6501_v19  ;;  %7251 = vmatprep.subr.mxu0 %v10733_v57  ;;  %v10783_v31 = vmax.f32 %v12151_v49, 0.0  ;;  %v10883_v19 = vmax.f32 %v12176_v1, 0.0  ;;  %v8291_v49 = vld [vmem:[%s11979_s4 + $0x98] sm:$0xff]  ;;  %v8316_v1 = vld [vmem:[%s11979_s4 + $0x230] sm:$0xff] }
 0x8e1   :  { %7252 = vmatpush3.msra.mxu0 %v10763_v13  ;;  %3990 = vmatprep.mubr.f32.mxu0 %v8287_v45  ;;  %v8289_v45 = vld [vmem:[%s11979_s4 + $0x88] sm:$0xff] }
 0x8e2   :  { %7253 = vmatprep.subr.mxu0 %v10767_v28 }
 0x8e3   :  { %7254 = vmatpush3.msra.mxu0 %v10772_v36 }
 0x8e4   :  { %7255 = vmatprep.subr.mxu0 %v10779_v18 }
 0x8e5   :  { %7256 = vmatpush3.msra.mxu0 %v10783_v31 }
 0x8e6   :  { %7257 = vmatprep.subr.mxu0 %v10787_v22 }
 0x8e7   :  { %7258 = vmatpush3.msra.mxu0 %v10791_v40 }
 0x8e8   :  { %7259 = vmatprep.subr.mxu0 %v10795_v26 }
 0x8e9   :  { %7260 = vmatpush3.msra.mxu0 %v10799_v25 }
 0x8ea   :  { %7261 = vmatprep.subr.mxu0 %v10803_v62 }
 0x8eb   :  { %7262 = vmatpush3.msra.mxu0 %v10807_v30 }
 0x8ec   :  { %7263 = vmatprep.subr.mxu0 %v10811_v37 }
 0x8ed   :  { %7264 = vmatpush3.msra.mxu0 %v10815_v27 }
 0x8ee   :  { %7265 = vmatprep.subr.mxu0 %v10819_v58 }
 0x8ef   :  { %7266 = vmatpush3.msra.mxu0 %v10823_v38 }
 0x8f0   :  { %7267 = vmatprep.subr.mxu0 %v10827_v6 }
 0x8f1   :  { %7268 = vmatpush3.msra.mxu0 %v10831_v35 }
 0x8f2   :  { %7269 = vmatprep.subr.mxu0 %v10835_v2 }
 0x8f3   :  { %7270 = vmatpush3.msra.mxu0 %v10839_v59 }
 0x8f4   :  { %7271 = vmatprep.subr.mxu0 %v10843_v33 }
 0x8f5   :  { %7272 = vmatpush3.msra.mxu0 %v10847_v12 }
 0x8f6   :  { %7273 = vmatprep.subr.mxu0 %v10851_v50 }
 0x8f7   :  { %7274 = vmatpush3.msra.mxu0 %v10855_v56 }
 0x8f8   :  { %7275 = vmatprep.subr.mxu0 %v10859_v7 }
 0x8f9   :  { %7276 = vmatpush3.msra.mxu0 %v10863_v10 }
 0x8fa   :  { %7277 = vmatprep.subr.mxu0 %v10867_v61 }
 0x8fb   :  { %7278 = vmatpush3.msra.mxu0 %v10871_v23 }
 0x8fc   :  { %7279 = vmatprep.subr.mxu0 %v10875_v8 }
 0x8fd   :  { %7280 = vmatpush3.msra.mxu0 %v10879_v29 }
 0x8fe   :  { %7281 = vmatprep.subr.mxu0 %v10883_v19 }
 0x8ff   :  { %7282 = vmatpush3.msra.mxu0 %v10887_v63 }
 0x900   :  { %7357 = vmatprep.subr.mxu0 %v10733_v57  ;;  %3991 = vmatmul.mubr.f32.vlgmr.msra.gmra.mxu0 %v8288_v16  ;;  %v8318_v16 = vld [vmem:[%s11979_s4 + $0x240] sm:$0xff] }
 0x901   :  { %7358 = vmatpush3.msra.mxu0 %v10763_v13  ;;  %3995 = vmatprep.mubr.f32.mxu0 %v8289_v45  ;;  %v8319_v45 = vld [vmem:[%s11979_s4 + $0x258] sm:$0xff] }
 0x902   :  { %7359 = vmatprep.subr.mxu0 %v10767_v28 }
 0x903   :  { %7360 = vmatpush3.msra.mxu0 %v10772_v36 }
 0x904   :  { %7361 = vmatprep.subr.mxu0 %v10779_v18  ;;  %3996 = vmatmul.mubr.f32.gmra.mxu0 %v8290_v43  ;;  %v8320_v43 = vld [vmem:[%s11979_s4 + $0x250] sm:$0xff] }
 0x905   :  { %7362 = vmatpush3.msra.mxu0 %v10783_v31  ;;  %4000 = vmatprep.mubr.f32.mxu0 %v8291_v49  ;;  %v8321_v49 = vld [vmem:[%s11979_s4 + $0x268] sm:$0xff] }
 0x906   :  { %7363 = vmatprep.subr.mxu0 %v10787_v22 }
 0x907   :  { %7364 = vmatpush3.msra.mxu0 %v10791_v40 }
 0x908   :  { %7365 = vmatprep.subr.mxu0 %v10795_v26  ;;  %4001 = vmatmul.mubr.f32.gmra.mxu0 %v8292_v0  ;;  %v8322_v0 = vld [vmem:[%s11979_s4 + $0x260] sm:$0xff] }
 0x909   :  { %7366 = vmatpush3.msra.mxu0 %v10799_v25  ;;  %4005 = vmatprep.mubr.f32.mxu0 %v8293_v48  ;;  %v8323_v48 = vld [vmem:[%s11979_s4 + $0x278] sm:$0xff] }
 0x90a   :  { %7367 = vmatprep.subr.mxu0 %v10803_v62 }
 0x90b   :  { %7368 = vmatpush3.msra.mxu0 %v10807_v30 }
 0x90c   :  { %7369 = vmatprep.subr.mxu0 %v10811_v37  ;;  %4006 = vmatmul.mubr.f32.gmra.mxu0 %v8294_v47  ;;  %v8324_v47 = vld [vmem:[%s11979_s4 + $0x270] sm:$0xff] }
 0x90d   :  { %7370 = vmatpush3.msra.mxu0 %v10815_v27  ;;  %4010 = vmatprep.mubr.f32.mxu0 %v8295_v15  ;;  %v8325_v15 = vld [vmem:[%s11979_s4 + $0x288] sm:$0xff] }
 0x90e   :  { %7371 = vmatprep.subr.mxu0 %v10819_v58 }
 0x90f   :  { %7372 = vmatpush3.msra.mxu0 %v10823_v38 }
 0x910   :  { %7373 = vmatprep.subr.mxu0 %v10827_v6  ;;  %4011 = vmatmul.mubr.f32.gmra.mxu0 %v8296_v24  ;;  %v8326_v24 = vld [vmem:[%s11979_s4 + $0x280] sm:$0xff] }
 0x911   :  { %7374 = vmatpush3.msra.mxu0 %v10831_v35  ;;  %4015 = vmatprep.mubr.f32.mxu0 %v8297_v4  ;;  %v8327_v4 = vld [vmem:[%s11979_s4 + $0x298] sm:$0xff] }
 0x912   :  { %7375 = vmatprep.subr.mxu0 %v10835_v2 }
 0x913   :  { %7376 = vmatpush3.msra.mxu0 %v10839_v59 }
 0x914   :  { %7377 = vmatprep.subr.mxu0 %v10843_v33  ;;  %4016 = vmatmul.mubr.f32.gmra.mxu0 %v8298_v60  ;;  %v8328_v60 = vld [vmem:[%s11979_s4 + $0x290] sm:$0xff] }
 0x915   :  { %7378 = vmatpush3.msra.mxu0 %v10847_v12  ;;  %4020 = vmatprep.mubr.f32.mxu0 %v8299_v55  ;;  %v8329_v55 = vld [vmem:[%s11979_s4 + $0x318] sm:$0xff] }
 0x916   :  { %7379 = vmatprep.subr.mxu0 %v10851_v50 }
 0x917   :  { %7380 = vmatpush3.msra.mxu0 %v10855_v56 }
 0x918   :  { %7381 = vmatprep.subr.mxu0 %v10859_v7  ;;  %4021 = vmatmul.mubr.f32.gmra.mxu0 %v8300_v5  ;;  %v8330_v5 = vld [vmem:[%s11979_s4 + $0x310] sm:$0xff] }
 0x919   :  { %7382 = vmatpush3.msra.mxu0 %v10863_v10  ;;  %4204 = vmatprep.mubr.f32.mxu0 %v8301_v54  ;;  %v8331_v54 = vld [vmem:[%s11979_s4 + $0x328] sm:$0xff] }
 0x91a   :  { %7383 = vmatprep.subr.mxu0 %v10867_v61 }
 0x91b   :  { %7384 = vmatpush3.msra.mxu0 %v10871_v23 }
 0x91c   :  { %7385 = vmatprep.subr.mxu0 %v10875_v8 }
 0x91d   :  { %7386 = vmatpush3.msra.mxu0 %v10879_v29 }
 0x91e   :  { %7387 = vmatprep.subr.mxu0 %v10883_v19 }
 0x91f   :  { %7388 = vmatpush3.msra.mxu0 %v10887_v63 }
 0x920   :  { %7463 = vmatprep.subr.mxu0 %v10733_v57  ;;  %4205 = vmatmul.mubr.f32.vlgmr.msra.gmra.mxu0 %v8302_v14  ;;  %v8332_v14 = vld [vmem:[%s11979_s4 + $0x320] sm:$0xff] }
 0x921   :  { %7464 = vmatpush3.msra.mxu0 %v10763_v13  ;;  %4209 = vmatprep.mubr.f32.mxu0 %v8303_v11  ;;  %v8333_v11 = vld [vmem:[%s11979_s4 + $0x338] sm:$0xff] }
 0x922   :  { %7465 = vmatprep.subr.mxu0 %v10767_v28 }
 0x923   :  { %7466 = vmatpush3.msra.mxu0 %v10772_v36 }
 0x924   :  { %7467 = vmatprep.subr.mxu0 %v10779_v18  ;;  %4210 = vmatmul.mubr.f32.gmra.mxu0 %v8304_v51  ;;  %v8334_v51 = vld [vmem:[%s11979_s4 + $0x330] sm:$0xff] }
 0x925   :  { %7468 = vmatpush3.msra.mxu0 %v10783_v31  ;;  %4214 = vmatprep.mubr.f32.mxu0 %v8305_v17  ;;  %v8335_v17 = vld [vmem:[%s11979_s4 + $0x348] sm:$0xff] }
 0x926   :  { %7469 = vmatprep.subr.mxu0 %v10787_v22 }
 0x927   :  { %7470 = vmatpush3.msra.mxu0 %v10791_v40 }
 0x928   :  { %7471 = vmatprep.subr.mxu0 %v10795_v26  ;;  %4215 = vmatmul.mubr.f32.gmra.mxu0 %v8306_v3  ;;  %v8336_v3 = vld [vmem:[%s11979_s4 + $0x340] sm:$0xff] }
 0x929   :  { %7472 = vmatpush3.msra.mxu0 %v10799_v25  ;;  %4219 = vmatprep.mubr.f32.mxu0 %v8307_v42  ;;  %v8337_v42 = vld [vmem:[%s11979_s4 + $0x358] sm:$0xff] }
 0x92a   :  { %7473 = vmatprep.subr.mxu0 %v10803_v62 }
 0x92b   :  { %7474 = vmatpush3.msra.mxu0 %v10807_v30 }
 0x92c   :  { %7475 = vmatprep.subr.mxu0 %v10811_v37  ;;  %4220 = vmatmul.mubr.f32.gmra.mxu0 %v8308_v44  ;;  %v8338_v44 = vld [vmem:[%s11979_s4 + $0x350] sm:$0xff] }
 0x92d   :  { %7476 = vmatpush3.msra.mxu0 %v10815_v27  ;;  %4224 = vmatprep.mubr.f32.mxu0 %v8309_v46  ;;  %v8339_v46 = vld [vmem:[%s11979_s4 + $0x368] sm:$0xff] }
 0x92e   :  { %7477 = vmatprep.subr.mxu0 %v10819_v58 }
 0x92f   :  { %7478 = vmatpush3.msra.mxu0 %v10823_v38 }
 0x930   :  { %7479 = vmatprep.subr.mxu0 %v10827_v6  ;;  %4225 = vmatmul.mubr.f32.gmra.mxu0 %v8310_v34  ;;  %v8340_v34 = vld [vmem:[%s11979_s4 + $0x360] sm:$0xff] }
 0x931   :  { %7480 = vmatpush3.msra.mxu0 %v10831_v35  ;;  %4229 = vmatprep.mubr.f32.mxu0 %v8311_v21  ;;  %v8341_v21 = vld [vmem:[%s11979_s4 + $0x378] sm:$0xff] }
 0x932   :  { %7481 = vmatprep.subr.mxu0 %v10835_v2 }
 0x933   :  { %7482 = vmatpush3.msra.mxu0 %v10839_v59 }
 0x934   :  { %7483 = vmatprep.subr.mxu0 %v10843_v33  ;;  %4230 = vmatmul.mubr.f32.gmra.mxu0 %v8312_v53  ;;  %v8342_v53 = vld [vmem:[%s11979_s4 + $0x370] sm:$0xff] }
 0x935   :  { %7484 = vmatpush3.msra.mxu0 %v10847_v12  ;;  %4234 = vmatprep.mubr.f32.mxu0 %v8313_v39  ;;  %v8343_v39 = vld [vmem:[%s11982_s5] sm:$0xff] }
 0x936   :  { %7485 = vmatprep.subr.mxu0 %v10851_v50 }
 0x937   :  { %7486 = vmatpush3.msra.mxu0 %v10855_v56 }
 0x938   :  { %7487 = vmatprep.subr.mxu0 %v10859_v7  ;;  %4235 = vmatmul.mubr.f32.gmra.mxu0 %v8314_v52 }
 0x939   :  { %7488 = vmatpush3.msra.mxu0 %v10863_v10  ;;  %4418 = vmatprep.mubr.f32.mxu0 %v8315_v32 }
 0x93a   :  { %7489 = vmatprep.subr.mxu0 %v10867_v61 }
 0x93b   :  { %7490 = vmatpush3.msra.mxu0 %v10871_v23 }
 0x93c   :  { %7491 = vmatprep.subr.mxu0 %v10875_v8 }
 0x93d   :  { %7492 = vmatpush3.msra.mxu0 %v10879_v29 }
 0x93e   :  { %7493 = vmatprep.subr.mxu0 %v10883_v19 }
 0x93f   :  { %7494 = vmatpush3.msra.mxu0 %v10887_v63 }
 0x940   :  { %7569 = vmatprep.subr.mxu0 %v10733_v57  ;;  %4419 = vmatmul.mubr.f32.vlgmr.msra.gmra.mxu0 %v8316_v1 }
 0x941   :  { %7570 = vmatpush3.msra.mxu0 %v10763_v13  ;;  %4423 = vmatprep.mubr.f32.mxu0 %v8317_v20 }
 0x942   :  { %7571 = vmatprep.subr.mxu0 %v10767_v28 }
 0x943   :  { %7572 = vmatpush3.msra.mxu0 %v10772_v36 }
 0x944   :  { %7573 = vmatprep.subr.mxu0 %v10779_v18  ;;  %4424 = vmatmul.mubr.f32.gmra.mxu0 %v8318_v16 }
 0x945   :  { %7574 = vmatpush3.msra.mxu0 %v10783_v31  ;;  %4428 = vmatprep.mubr.f32.mxu0 %v8319_v45 }
 0x946   :  { %7575 = vmatprep.subr.mxu0 %v10787_v22 }
 0x947   :  { %7576 = vmatpush3.msra.mxu0 %v10791_v40 }
 0x948   :  { %7577 = vmatprep.subr.mxu0 %v10795_v26  ;;  %4429 = vmatmul.mubr.f32.gmra.mxu0 %v8320_v43  ;;  %v8344_v43 = vld [vmem:[%s11979_s4 + $0x8] sm:$0xff] }
 0x949   :  { %7578 = vmatpush3.msra.mxu0 %v10799_v25  ;;  %4433 = vmatprep.mubr.f32.mxu0 %v8321_v49  ;;  %v8347_v49 = vld [vmem:[%s11979_s4 + $0x10] sm:$0xff] }
 0x94a   :  { %7579 = vmatprep.subr.mxu0 %v10803_v62 }
 0x94b   :  { %7580 = vmatpush3.msra.mxu0 %v10807_v30 }
 0x94c   :  { %7581 = vmatprep.subr.mxu0 %v10811_v37  ;;  %4434 = vmatmul.mubr.f32.gmra.mxu0 %v8322_v0  ;;  %v8348_v0 = vld [vmem:[%s11979_s4 + $0x28] sm:$0xff] }
 0x94d   :  { %7582 = vmatpush3.msra.mxu0 %v10815_v27  ;;  %4438 = vmatprep.mubr.f32.mxu0 %v8323_v48  ;;  %v8349_v48 = vld [vmem:[%s11979_s4 + $0x20] sm:$0xff] }
 0x94e   :  { %7583 = vmatprep.subr.mxu0 %v10819_v58 }
 0x94f   :  { %7584 = vmatpush3.msra.mxu0 %v10823_v38 }
 0x950   :  { %7585 = vmatprep.subr.mxu0 %v10827_v6  ;;  %4439 = vmatmul.mubr.f32.gmra.mxu0 %v8324_v47  ;;  %v8350_v47 = vld [vmem:[%s11979_s4 + $0x38] sm:$0xff] }
 0x951   :  { %7586 = vmatpush3.msra.mxu0 %v10831_v35  ;;  %4443 = vmatprep.mubr.f32.mxu0 %v8325_v15  ;;  %v8351_v15 = vld [vmem:[%s11979_s4 + $0x30] sm:$0xff] }
 0x952   :  { %7587 = vmatprep.subr.mxu0 %v10835_v2 }
 0x953   :  { %7588 = vmatpush3.msra.mxu0 %v10839_v59 }
 0x954   :  { %7589 = vmatprep.subr.mxu0 %v10843_v33  ;;  %4444 = vmatmul.mubr.f32.gmra.mxu0 %v8326_v24  ;;  %v8352_v24 = vld [vmem:[%s11979_s4 + $0x48] sm:$0xff] }
 0x955   :  { %7590 = vmatpush3.msra.mxu0 %v10847_v12  ;;  %4448 = vmatprep.mubr.f32.mxu0 %v8327_v4  ;;  %v8353_v4 = vld [vmem:[%s11979_s4 + $0x40] sm:$0xff] }
 0x956   :  { %7591 = vmatprep.subr.mxu0 %v10851_v50 }
 0x957   :  { %7592 = vmatpush3.msra.mxu0 %v10855_v56 }
 0x958   :  { %7593 = vmatprep.subr.mxu0 %v10859_v7  ;;  %4449 = vmatmul.mubr.f32.gmra.mxu0 %v8328_v60  ;;  %v8354_v60 = vld [vmem:[%s11979_s4 + $0x58] sm:$0xff] }
 0x959   :  { %7594 = vmatpush3.msra.mxu0 %v10863_v10  ;;  %4632 = vmatprep.mubr.f32.mxu0 %v8329_v55  ;;  %v8355_v55 = vld [vmem:[%s11979_s4 + $0x50] sm:$0xff] }
 0x95a   :  { %7595 = vmatprep.subr.mxu0 %v10867_v61 }
 0x95b   :  { %7596 = vmatpush3.msra.mxu0 %v10871_v23 }
 0x95c   :  { %7597 = vmatprep.subr.mxu0 %v10875_v8 }
 0x95d   :  { %7598 = vmatpush3.msra.mxu0 %v10879_v29 }
 0x95e   :  { %7599 = vmatprep.subr.mxu0 %v10883_v19 }
 0x95f   :  { %7600 = vmatpush3.msra.mxu0 %v10887_v63 }
 0x960   :  { %4633 = vmatmul.mubr.f32.vlgmr.msra.gmra.mxu0 %v8330_v5  ;;  %v8356_v5 = vld [vmem:[%s11979_s4 + $0x68] sm:$0xff] }
 0x961   :  { %4637 = vmatprep.mubr.f32.mxu0 %v8331_v54  ;;  %v8357_v54 = vld [vmem:[%s11979_s4 + $0x60] sm:$0xff] }
 0x964   :  { %4638 = vmatmul.mubr.f32.gmra.mxu0 %v8332_v14  ;;  %v8358_v14 = vld [vmem:[%s11979_s4 + $0xe8] sm:$0xff] }
 0x965   :  { %4642 = vmatprep.mubr.f32.mxu0 %v8333_v11  ;;  %v8359_v11 = vld [vmem:[%s11979_s4 + $0xe0] sm:$0xff] }
 0x968   :  { %4643 = vmatmul.mubr.f32.gmra.mxu0 %v8334_v51  ;;  %v8360_v51 = vld [vmem:[%s11979_s4 + $0xf8] sm:$0xff] }
 0x969   :  { %4647 = vmatprep.mubr.f32.mxu0 %v8335_v17  ;;  %v8361_v17 = vld [vmem:[%s11979_s4 + $0xf0] sm:$0xff] }
 0x96c   :  { %4648 = vmatmul.mubr.f32.gmra.mxu0 %v8336_v3  ;;  %v8362_v3 = vld [vmem:[%s11979_s4 + $0x108] sm:$0xff] }
 0x96d   :  { %4652 = vmatprep.mubr.f32.mxu0 %v8337_v42  ;;  %v8363_v42 = vld [vmem:[%s11979_s4 + $0x100] sm:$0xff] }
 0x970   :  { %4653 = vmatmul.mubr.f32.gmra.mxu0 %v8338_v44  ;;  %v8364_v44 = vld [vmem:[%s11979_s4 + $0x118] sm:$0xff] }
 0x971   :  { %4657 = vmatprep.mubr.f32.mxu0 %v8339_v46  ;;  %v8365_v46 = vld [vmem:[%s11979_s4 + $0x110] sm:$0xff] }
 0x974   :  { %4658 = vmatmul.mubr.f32.gmra.mxu0 %v8340_v34  ;;  %v8366_v34 = vld [vmem:[%s11979_s4 + $0x128] sm:$0xff] }
 0x975   :  { %4662 = vmatprep.mubr.f32.mxu0 %v8341_v21  ;;  %v8367_v21 = vld [vmem:[%s11979_s4 + $0x120] sm:$0xff] }
 0x978   :  { %4663 = vmatmul.mubr.f32.gmra.mxu0 %v8342_v53  ;;  %v8368_v53 = vld [vmem:[%s11979_s4 + $0x138] sm:$0xff] }
 0x979   :  { %8099 = vmatprep.mubr.msk.f32.mxu0 %vm2311_vm1, %v8343_v39  ;;  %v8369_v39 = vld [vmem:[%s11979_s4 + $0x130] sm:$0xff] }
 0x992   :  { %v8062_v52 = vpop.f32.mrf.mxu0 }
 0x993   :  { %v11158_v32 = vadd.f32 %v8062_v52, %v10737_v41  ;;  %v8345_v41 = vld [vmem:[%s11979_s4] sm:$0xff]  ;;  %v8370_v52 = vld [vmem:[%s11979_s4 + $0x148] sm:$0xff] }
 0x994   :  { %v3646_v1 = vpop.f32.mrf.mxu0 }
 0x995   :  { %v11161_v20 = vadd.f32 %v3646_v1, %v10739_v9  ;;  %v8346_v9 = vld [vmem:[%s11979_s4 + $0x18] sm:$0xff]  ;;  %v8371_v1 = vld [vmem:[%s11979_s4 + $0x140] sm:$0xff] }
 0x9a0   :  { %v8079_v16 = vpop.f32.mrf.mxu0 }
 0x9a2   :  { %v3732_v45 = vpop.f32.mrf.mxu0 }
 0x9a3   :  { %8082 = vmatprep.mubr.msk.f32.mxu1 %vm2480_vm2, %v3732_v45  ;;  %v8373_v45 = vld [vmem:[%s11979_s4 + $0x1c0] sm:$0xff] }
 0x9a4   :  { %8083 = vmatmul.mubr.msk.f32.vlgmr.msra.gmra.mxu1 %vm2480_vm2, %v8079_v16  ;;  %v8372_v16 = vld [vmem:[%s11979_s4 + $0x1c8] sm:$0xff] }
 0x9a5   :  { %7199 = vmatpush3.msra.mxu1 %v10763_v13  ;;  %3890 = vmatprep.mubr.f32.mxu1 %v8344_v43 }
 0x9a6   :  { %7200 = vmatprep.subr.mxu1 %v10767_v28 }
 0x9a7   :  { %7201 = vmatpush3.msra.mxu1 %v10772_v36 }
 0x9a8   :  { %7202 = vmatprep.subr.mxu1 %v10779_v18 }
 0x9a9   :  { %7203 = vmatpush3.msra.mxu1 %v10783_v31 }
 0x9aa   :  { %7204 = vmatprep.subr.mxu1 %v10787_v22 }
 0x9ab   :  { %7205 = vmatpush3.msra.mxu1 %v10791_v40 }
 0x9ac   :  { %7206 = vmatprep.subr.mxu1 %v10795_v26 }
 0x9ad   :  { %7207 = vmatpush3.msra.mxu1 %v10799_v25 }
 0x9ae   :  { %7208 = vmatprep.subr.mxu1 %v10803_v62 }
 0x9af   :  { %7209 = vmatpush3.msra.mxu1 %v10807_v30 }
 0x9b0   :  { %7210 = vmatprep.subr.mxu1 %v10811_v37 }
 0x9b1   :  { %7211 = vmatpush3.msra.mxu1 %v10815_v27 }
 0x9b2   :  { %7212 = vmatprep.subr.mxu1 %v10819_v58 }
 0x9b3   :  { %7213 = vmatpush3.msra.mxu1 %v10823_v38 }
 0x9b4   :  { %7214 = vmatprep.subr.mxu1 %v10827_v6 }
 0x9b5   :  { %7215 = vmatpush3.msra.mxu1 %v10831_v35 }
 0x9b6   :  { %7216 = vmatprep.subr.mxu1 %v10835_v2 }
 0x9b7   :  { %7217 = vmatpush3.msra.mxu1 %v10839_v59 }
 0x9b8   :  { %7218 = vmatprep.subr.mxu1 %v10843_v33 }
 0x9b9   :  { %7219 = vmatpush3.msra.mxu1 %v10847_v12 }
 0x9ba   :  { %7220 = vmatprep.subr.mxu1 %v10851_v50 }
 0x9bb   :  { %7221 = vmatpush3.msra.mxu1 %v10855_v56 }
 0x9bc   :  { %7222 = vmatprep.subr.mxu1 %v10859_v7 }
 0x9bd   :  { %7223 = vmatpush3.msra.mxu1 %v10863_v10 }
 0x9be   :  { %7224 = vmatprep.subr.mxu1 %v10867_v61 }
 0x9bf   :  { %7225 = vmatpush3.msra.mxu1 %v10871_v23 }
 0x9c0   :  { %7226 = vmatprep.subr.mxu1 %v10875_v8  ;;  %v7283_v43 = vpop.f32.mrf.mxu0 }
 0x9c1   :  { %7227 = vmatpush3.msra.mxu1 %v10879_v29 }
 0x9c2   :  { %7228 = vmatprep.subr.mxu1 %v10883_v19 }
 0x9c3   :  { %7229 = vmatpush3.msra.mxu1 %v10887_v63 }
 0x9c4   :  { %3891 = vmatmul.mubr.f32.vlgmr.msra.gmra.mxu1 %v8345_v41  ;;  %7304 = vmatprep.subr.mxu1 %v10733_v57  ;;  %v8374_v41 = vld [vmem:[%s11979_s4 + $0x1d8] sm:$0xff] }
 0x9c5   :  { %7305 = vmatpush3.msra.mxu1 %v10763_v13  ;;  %3895 = vmatprep.mubr.f32.mxu1 %v8346_v9  ;;  %v7284_v9 = vpop.f32.mrf.mxu0 }
 0x9c6   :  { %7306 = vmatprep.subr.mxu1 %v10767_v28 }
 0x9c7   :  { %7307 = vmatpush3.msra.mxu1 %v10772_v36 }
 0x9c8   :  { %7308 = vmatprep.subr.mxu1 %v10779_v18  ;;  %3896 = vmatmul.mubr.f32.gmra.mxu1 %v8347_v49  ;;  %v11357_v49 = vadd.f32 %v7284_v9, %v7283_v43  ;;  %v8386_v43 = vld [vmem:[%s11979_s4 + $0x2a8] sm:$0xff] }
 0x9c9   :  { %7309 = vmatpush3.msra.mxu1 %v10783_v31  ;;  %3900 = vmatprep.mubr.f32.mxu1 %v8348_v0  ;;  %v8375_v0 = vld [vmem:[%s11979_s4 + $0x1d0] sm:$0xff] }
 0x9ca   :  { %7310 = vmatprep.subr.mxu1 %v10787_v22 }
 0x9cb   :  { %7311 = vmatpush3.msra.mxu1 %v10791_v40 }
 0x9cc   :  { %7312 = vmatprep.subr.mxu1 %v10795_v26  ;;  %3901 = vmatmul.mubr.f32.gmra.mxu1 %v8349_v48  ;;  %v8376_v48 = vld [vmem:[%s11979_s4 + $0x1e8] sm:$0xff] }
 0x9cd   :  { %7313 = vmatpush3.msra.mxu1 %v10799_v25  ;;  %3905 = vmatprep.mubr.f32.mxu1 %v8350_v47  ;;  %v7286_v47 = vpop.f32.mrf.mxu0 }
 0x9ce   :  { %7314 = vmatprep.subr.mxu1 %v10803_v62 }
 0x9cf   :  { %7315 = vmatpush3.msra.mxu1 %v10807_v30 }
 0x9d0   :  { %7316 = vmatprep.subr.mxu1 %v10811_v37  ;;  %3906 = vmatmul.mubr.f32.gmra.mxu1 %v8351_v15  ;;  %v7287_v15 = vpop.f32.mrf.mxu0 }
 0x9d1   :  { %7317 = vmatpush3.msra.mxu1 %v10815_v27  ;;  %3910 = vmatprep.mubr.f32.mxu1 %v8352_v24  ;;  %v8377_v24 = vld [vmem:[%s11979_s4 + $0x1e0] sm:$0xff] }
 0x9d2   :  { %7318 = vmatprep.subr.mxu1 %v10819_v58 }
 0x9d3   :  { %7319 = vmatpush3.msra.mxu1 %v10823_v38 }
 0x9d4   :  { %7320 = vmatprep.subr.mxu1 %v10827_v6  ;;  %3911 = vmatmul.mubr.f32.gmra.mxu1 %v8353_v4  ;;  %v11373_v4 = vadd.f32 %v7287_v15, %v7286_v47  ;;  %v8388_v47 = vld [vmem:[%s11979_s4 + $0x2b8] sm:$0xff] }
 0x9d5   :  { %7321 = vmatpush3.msra.mxu1 %v10831_v35  ;;  %3915 = vmatprep.mubr.f32.mxu1 %v8354_v60  ;;  %v8378_v60 = vld [vmem:[%s11979_s4 + $0x1f8] sm:$0xff] }
 0x9d6   :  { %7322 = vmatprep.subr.mxu1 %v10835_v2 }
 0x9d7   :  { %7323 = vmatpush3.msra.mxu1 %v10839_v59 }
 0x9d8   :  { %7324 = vmatprep.subr.mxu1 %v10843_v33  ;;  %3916 = vmatmul.mubr.f32.gmra.mxu1 %v8355_v55  ;;  %v7289_v55 = vpop.f32.mrf.mxu0 }
 0x9d9   :  { %7325 = vmatpush3.msra.mxu1 %v10847_v12  ;;  %3920 = vmatprep.mubr.f32.mxu1 %v8356_v5 }
 0x9da   :  { %7326 = vmatprep.subr.mxu1 %v10851_v50  ;;  %v7290_v5 = vpop.f32.mrf.mxu0 }
 0x9db   :  { %7327 = vmatpush3.msra.mxu1 %v10855_v56 }
 0x9dc   :  { %7328 = vmatprep.subr.mxu1 %v10859_v7  ;;  %3921 = vmatmul.mubr.f32.gmra.mxu1 %v8357_v54  ;;  %v8379_v54 = vld [vmem:[%s11979_s4 + $0x1f0] sm:$0xff] }
 0x9dd   :  { %7329 = vmatpush3.msra.mxu1 %v10863_v10  ;;  %4097 = vmatprep.mubr.f32.mxu1 %v8358_v14  ;;  %v11385_v14 = vadd.f32 %v7290_v5, %v7289_v55 }
 0x9de   :  { %7330 = vmatprep.subr.mxu1 %v10867_v61 }
 0x9df   :  { %7331 = vmatpush3.msra.mxu1 %v10871_v23 }
 0x9e0   :  { %7332 = vmatprep.subr.mxu1 %v10875_v8 }
 0x9e1   :  { %7333 = vmatpush3.msra.mxu1 %v10879_v29 }
 0x9e2   :  { %7334 = vmatprep.subr.mxu1 %v10883_v19 }
 0x9e3   :  { %7335 = vmatpush3.msra.mxu1 %v10887_v63 }
 0x9e4   :  { %4098 = vmatmul.mubr.f32.vlgmr.msra.gmra.mxu1 %v8359_v11  ;;  %7410 = vmatprep.subr.mxu1 %v10733_v57  ;;  %v8380_v11 = vld [vmem:[%s11979_s4 + $0x208] sm:$0xff] }
 0x9e5   :  { %7411 = vmatpush3.msra.mxu1 %v10763_v13  ;;  %4102 = vmatprep.mubr.f32.mxu1 %v8360_v51  ;;  %v7292_v51 = vpop.f32.mrf.mxu0 }
 0x9e6   :  { %7412 = vmatprep.subr.mxu1 %v10767_v28 }
 0x9e7   :  { %7413 = vmatpush3.msra.mxu1 %v10772_v36 }
 0x9e8   :  { %4103 = vmatmul.mubr.f32.gmra.mxu1 %v8361_v17  ;;  %7414 = vmatprep.subr.mxu1 %v10779_v18  ;;  %v7293_v17 = vpop.f32.mrf.mxu0 }
 0x9e9   :  { %7415 = vmatpush3.msra.mxu1 %v10783_v31  ;;  %4107 = vmatprep.mubr.f32.mxu1 %v8362_v3  ;;  %v8381_v3 = vld [vmem:[%s11979_s4 + $0x200] sm:$0xff] }
 0x9ea   :  { %7416 = vmatprep.subr.mxu1 %v10787_v22 }
 0x9eb   :  { %7417 = vmatpush3.msra.mxu1 %v10791_v40 }
 0x9ec   :  { %4108 = vmatmul.mubr.f32.gmra.mxu1 %v8363_v42  ;;  %7418 = vmatprep.subr.mxu1 %v10795_v26  ;;  %v11397_v42 = vadd.f32 %v7293_v17, %v7292_v51 }
 0x9ed   :  { %7419 = vmatpush3.msra.mxu1 %v10799_v25  ;;  %4112 = vmatprep.mubr.f32.mxu1 %v8364_v44  ;;  %v8382_v44 = vld [vmem:[%s11979_s4 + $0x218] sm:$0xff] }
 0x9ee   :  { %7420 = vmatprep.subr.mxu1 %v10803_v62 }
 0x9ef   :  { %7421 = vmatpush3.msra.mxu1 %v10807_v30 }
 0x9f0   :  { %4113 = vmatmul.mubr.f32.gmra.mxu1 %v8365_v46  ;;  %7422 = vmatprep.subr.mxu1 %v10811_v37  ;;  %v7295_v46 = vpop.f32.mrf.mxu0 }
 0x9f1   :  { %7423 = vmatpush3.msra.mxu1 %v10815_v27  ;;  %4117 = vmatprep.mubr.f32.mxu1 %v8366_v34 }
 0x9f2   :  { %7424 = vmatprep.subr.mxu1 %v10819_v58  ;;  %v7296_v34 = vpop.f32.mrf.mxu0 }
 0x9f3   :  { %7425 = vmatpush3.msra.mxu1 %v10823_v38 }
 0x9f4   :  { %4118 = vmatmul.mubr.f32.gmra.mxu1 %v8367_v21  ;;  %7426 = vmatprep.subr.mxu1 %v10827_v6  ;;  %v8383_v21 = vld [vmem:[%s11979_s4 + $0x210] sm:$0xff] }
 0x9f5   :  { %7427 = vmatpush3.msra.mxu1 %v10831_v35  ;;  %4122 = vmatprep.mubr.f32.mxu1 %v8368_v53  ;;  %v11409_v53 = vadd.f32 %v7296_v34, %v7295_v46 }
 0x9f6   :  { %7428 = vmatprep.subr.mxu1 %v10835_v2 }
 0x9f7   :  { %7429 = vmatpush3.msra.mxu1 %v10839_v59 }
 0x9f8   :  { %4123 = vmatmul.mubr.f32.gmra.mxu1 %v8369_v39  ;;  %7430 = vmatprep.subr.mxu1 %v10843_v33  ;;  %v8384_v39 = vld [vmem:[%s11979_s4 + $0x228] sm:$0xff] }
 0x9f9   :  { %7431 = vmatpush3.msra.mxu1 %v10847_v12  ;;  %4127 = vmatprep.mubr.f32.mxu1 %v8370_v52  ;;  %v7298_v52 = vpop.f32.mrf.mxu0 }
 0x9fa   :  { %7432 = vmatprep.subr.mxu1 %v10851_v50 }
 0x9fb   :  { %7433 = vmatpush3.msra.mxu1 %v10855_v56 }
 0x9fc   :  { %4128 = vmatmul.mubr.f32.gmra.mxu1 %v8371_v1  ;;  %7434 = vmatprep.subr.mxu1 %v10859_v7  ;;  %v7299_v1 = vpop.f32.mrf.mxu0 }
 0x9fd   :  { %7435 = vmatpush3.msra.mxu1 %v10863_v10  ;;  %4311 = vmatprep.mubr.f32.mxu1 %v8372_v16  ;;  %v8385_v16 = vld [vmem:[%s11979_s4 + $0x220] sm:$0xff] }
 0x9fe   :  { %7436 = vmatprep.subr.mxu1 %v10867_v61 }
 0x9ff   :  { %7437 = vmatpush3.msra.mxu1 %v10871_v23 }
 0xa00   :  { %7438 = vmatprep.subr.mxu1 %v10875_v8 }
 0xa01   :  { %7439 = vmatpush3.msra.mxu1 %v10879_v29 }
 0xa02   :  { %7440 = vmatprep.subr.mxu1 %v10883_v19 }
 0xa03   :  { %7441 = vmatpush3.msra.mxu1 %v10887_v63 }
 0xa04   :  { %4312 = vmatmul.mubr.f32.vlgmr.msra.gmra.mxu1 %v8373_v45  ;;  %7516 = vmatprep.subr.mxu1 %v10733_v57  ;;  %v11421_v45 = vadd.f32 %v7299_v1, %v7298_v52 }
 0xa05   :  { %7517 = vmatpush3.msra.mxu1 %v10763_v13  ;;  %4316 = vmatprep.mubr.f32.mxu1 %v8374_v41  ;;  %v7301_v41 = vpop.f32.mrf.mxu0 }
 0xa06   :  { %7518 = vmatprep.subr.mxu1 %v10767_v28 }
 0xa07   :  { %7519 = vmatpush3.msra.mxu1 %v10772_v36  ;;  %v7302_v9 = vpop.f32.mrf.mxu0 }
 0xa08   :  { %4317 = vmatmul.mubr.f32.gmra.mxu1 %v8375_v0  ;;  %7520 = vmatprep.subr.mxu1 %v10779_v18  ;;  %v11430_v0 = vadd.f32 %v7302_v9, %v7301_v41 }
 0xa09   :  { %7521 = vmatpush3.msra.mxu1 %v10783_v31  ;;  %4321 = vmatprep.mubr.f32.mxu1 %v8376_v48  ;;  %v8387_v48 = vld [vmem:[%s11979_s4 + $0x2a0] sm:$0xff]  ;;  %v7389_v15 = vpop.f32.mrf.mxu0 }
 0xa0a   :  { %7522 = vmatprep.subr.mxu1 %v10787_v22 }
 0xa0b   :  { %7523 = vmatpush3.msra.mxu1 %v10791_v40 }
 0xa0c   :  { %4322 = vmatmul.mubr.f32.gmra.mxu1 %v8377_v24  ;;  %7524 = vmatprep.subr.mxu1 %v10795_v26  ;;  %v8389_v24 = vld [vmem:[%s11979_s4 + $0x2b0] sm:$0xff] }
 0xa0d   :  { %7525 = vmatpush3.msra.mxu1 %v10799_v25  ;;  %4326 = vmatprep.mubr.f32.mxu1 %v8378_v60 }
 0xa0e   :  { %7526 = vmatprep.subr.mxu1 %v10803_v62 }
 0xa0f   :  { %7527 = vmatpush3.msra.mxu1 %v10807_v30 }
 0xa10   :  { %4327 = vmatmul.mubr.f32.gmra.mxu1 %v8379_v54  ;;  %7528 = vmatprep.subr.mxu1 %v10811_v37 }
 0xa11   :  { %7529 = vmatpush3.msra.mxu1 %v10815_v27  ;;  %4331 = vmatprep.mubr.f32.mxu1 %v8380_v11 }
 0xa12   :  { %7530 = vmatprep.subr.mxu1 %v10819_v58 }
 0xa13   :  { %7531 = vmatpush3.msra.mxu1 %v10823_v38 }
 0xa14   :  { %4332 = vmatmul.mubr.f32.gmra.mxu1 %v8381_v3  ;;  %7532 = vmatprep.subr.mxu1 %v10827_v6 }
 0xa15   :  { %7533 = vmatpush3.msra.mxu1 %v10831_v35  ;;  %4336 = vmatprep.mubr.f32.mxu1 %v8382_v44 }
 0xa16   :  { %7534 = vmatprep.subr.mxu1 %v10835_v2 }
 0xa17   :  { %7535 = vmatpush3.msra.mxu1 %v10839_v59 }
 0xa18   :  { %4337 = vmatmul.mubr.f32.gmra.mxu1 %v8383_v21  ;;  %7536 = vmatprep.subr.mxu1 %v10843_v33 }
 0xa19   :  { %7537 = vmatpush3.msra.mxu1 %v10847_v12  ;;  %4341 = vmatprep.mubr.f32.mxu1 %v8384_v39 }
 0xa1a   :  { %7538 = vmatprep.subr.mxu1 %v10851_v50 }
 0xa1b   :  { %7539 = vmatpush3.msra.mxu1 %v10855_v56 }
 0xa1c   :  { %4342 = vmatmul.mubr.f32.gmra.mxu1 %v8385_v16  ;;  %7540 = vmatprep.subr.mxu1 %v10859_v7 }
 0xa1d   :  { %7541 = vmatpush3.msra.mxu1 %v10863_v10  ;;  %4525 = vmatprep.mubr.f32.mxu1 %v8386_v43 }
 0xa1e   :  { %7542 = vmatprep.subr.mxu1 %v10867_v61 }
 0xa1f   :  { %7543 = vmatpush3.msra.mxu1 %v10871_v23 }
 0xa20   :  { %7544 = vmatprep.subr.mxu1 %v10875_v8 }
 0xa21   :  { %7545 = vmatpush3.msra.mxu1 %v10879_v29 }
 0xa22   :  { %7546 = vmatprep.subr.mxu1 %v10883_v19 }
 0xa23   :  { %7547 = vmatpush3.msra.mxu1 %v10887_v63 }
 0xa24   :  { %4526 = vmatmul.mubr.f32.vlgmr.msra.gmra.mxu1 %v8387_v48  ;;  %7622 = vmatprep.subr.mxu1 %v10733_v57  ;;  %v7390_v57 = vpop.f32.mrf.mxu0 }
 0xa25   :  { %7623 = vmatpush3.msra.mxu1 %v10763_v13  ;;  %4530 = vmatprep.mubr.f32.mxu1 %v8388_v47  ;;  %v8390_v13 = vld [vmem:[%s11979_s4 + $0x2c8] sm:$0xff]  ;;  %v11453_v60 = vadd.f32 %v7390_v57, %v7389_v15 }
 0xa26   :  { %7624 = vmatprep.subr.mxu1 %v10767_v28  ;;  %v7392_v28 = vpop.f32.mrf.mxu0 }
 0xa27   :  { %7625 = vmatpush3.msra.mxu1 %v10772_v36  ;;  %v8391_v36 = vld [vmem:[%s11979_s4 + $0x2c0] sm:$0xff] }
 0xa28   :  { %4531 = vmatmul.mubr.f32.gmra.mxu1 %v8389_v24  ;;  %7626 = vmatprep.subr.mxu1 %v10779_v18  ;;  %v7393_v18 = vpop.f32.mrf.mxu0 }
 0xa29   :  { %7627 = vmatpush3.msra.mxu1 %v10783_v31  ;;  %4535 = vmatprep.mubr.f32.mxu1 %v8390_v13  ;;  %v8392_v31 = vld [vmem:[%s11979_s4 + $0x2d8] sm:$0xff]  ;;  %v11465_v55 = vadd.f32 %v7393_v18, %v7392_v28 }
 0xa2a   :  { %7628 = vmatprep.subr.mxu1 %v10787_v22  ;;  %v7395_v22 = vpop.f32.mrf.mxu0 }
 0xa2b   :  { %7629 = vmatpush3.msra.mxu1 %v10791_v40  ;;  %v8393_v40 = vld [vmem:[%s11979_s4 + $0x2d0] sm:$0xff] }
 0xa2c   :  { %4536 = vmatmul.mubr.f32.gmra.mxu1 %v8391_v36  ;;  %7630 = vmatprep.subr.mxu1 %v10795_v26  ;;  %v7396_v26 = vpop.f32.mrf.mxu0 }
 0xa2d   :  { %7631 = vmatpush3.msra.mxu1 %v10799_v25  ;;  %4540 = vmatprep.mubr.f32.mxu1 %v8392_v31  ;;  %v8394_v25 = vld [vmem:[%s11979_s4 + $0x2e8] sm:$0xff]  ;;  %v11477_v5 = vadd.f32 %v7396_v26, %v7395_v22 }
 0xa2e   :  { %7632 = vmatprep.subr.mxu1 %v10803_v62  ;;  %v7398_v62 = vpop.f32.mrf.mxu0 }
 0xa2f   :  { %7633 = vmatpush3.msra.mxu1 %v10807_v30  ;;  %v8395_v30 = vld [vmem:[%s11979_s4 + $0x2e0] sm:$0xff] }
 0xa30   :  { %4541 = vmatmul.mubr.f32.gmra.mxu1 %v8393_v40  ;;  %7634 = vmatprep.subr.mxu1 %v10811_v37  ;;  %v7399_v37 = vpop.f32.mrf.mxu0 }
 0xa31   :  { %7635 = vmatpush3.msra.mxu1 %v10815_v27  ;;  %4545 = vmatprep.mubr.f32.mxu1 %v8394_v25  ;;  %v8396_v27 = vld [vmem:[%s11979_s4 + $0x2f8] sm:$0xff]  ;;  %v11489_v54 = vadd.f32 %v7399_v37, %v7398_v62 }
 0xa32   :  { %7636 = vmatprep.subr.mxu1 %v10819_v58  ;;  %v8397_v58 = vld [vmem:[%s11979_s4 + $0x2f0] sm:$0xff]  ;;  %v11574_v18 = vpop.f32.mrf.mxu0 }
 0xa33   :  { %7637 = vmatpush3.msra.mxu1 %v10823_v38  ;;  %v8398_v38 = vld [vmem:[%s11979_s4 + $0x308] sm:$0xff] }
 0xa34   :  { %4546 = vmatmul.mubr.f32.gmra.mxu1 %v8395_v30  ;;  %7638 = vmatprep.subr.mxu1 %v10827_v6  ;;  %v8399_v6 = vld [vmem:[%s11979_s4 + $0x300] sm:$0xff]  ;;  %v11577_v40 = vpop.f32.mrf.mxu0 }
 0xa35   :  { %7639 = vmatpush3.msra.mxu1 %v10831_v35  ;;  %4550 = vmatprep.mubr.f32.mxu1 %v8396_v27  ;;  %v8400_v35 = vld [vmem:[%s11979_s4 + $0x388] sm:$0xff] }
 0xa36   :  { %7640 = vmatprep.subr.mxu1 %v10835_v2  ;;  %v8401_v2 = vld [vmem:[%s11979_s4 + $0x380] sm:$0xff]  ;;  %v11580_v62 = vpop.f32.mrf.mxu0 }
 0xa37   :  { %7641 = vmatpush3.msra.mxu1 %v10839_v59  ;;  %v8402_v59 = vld [vmem:[%s11979_s4 + $0x398] sm:$0xff] }
 0xa38   :  { %4551 = vmatmul.mubr.f32.gmra.mxu1 %v8397_v58  ;;  %7642 = vmatprep.subr.mxu1 %v10843_v33  ;;  %v8403_v33 = vld [vmem:[%s11979_s4 + $0x390] sm:$0xff]  ;;  %v11583_v37 = vpop.f32.mrf.mxu0 }
 0xa39   :  { %7643 = vmatpush3.msra.mxu1 %v10847_v12  ;;  %4555 = vmatprep.mubr.f32.mxu1 %v8398_v38  ;;  %v8404_v12 = vld [vmem:[%s11979_s4 + $0x3a8] sm:$0xff] }
 0xa3a   :  { %7644 = vmatprep.subr.mxu1 %v10851_v50  ;;  %v8405_v50 = vld [vmem:[%s11979_s4 + $0x3a0] sm:$0xff] }
 0xa3b   :  { %7645 = vmatpush3.msra.mxu1 %v10855_v56  ;;  %v8406_v56 = vld [vmem:[%s11979_s4 + $0x3b8] sm:$0xff] }
 0xa3c   :  { %4556 = vmatmul.mubr.f32.gmra.mxu1 %v8399_v6  ;;  %7646 = vmatprep.subr.mxu1 %v10859_v7  ;;  %v8407_v7 = vld [vmem:[%s11979_s4 + $0x3b0] sm:$0xff] }
 0xa3d   :  { %7647 = vmatpush3.msra.mxu1 %v10863_v10  ;;  %4739 = vmatprep.mubr.f32.mxu1 %v8400_v35  ;;  %v8408_v10 = vld [vmem:[%s11979_s4 + $0x3c8] sm:$0xff] }
 0xa3e   :  { %7648 = vmatprep.subr.mxu1 %v10867_v61  ;;  %v8409_v61 = vld [vmem:[%s11979_s4 + $0x3c0] sm:$0xff] }
 0xa3f   :  { %7649 = vmatpush3.msra.mxu1 %v10871_v23  ;;  %v8410_v23 = vld [vmem:[%s11979_s4 + $0x3d8] sm:$0xff] }
 0xa40   :  { %7650 = vmatprep.subr.mxu1 %v10875_v8  ;;  %v8411_v8 = vld [vmem:[%s11979_s4 + $0x3d0] sm:$0xff] }
 0xa41   :  { %7651 = vmatpush3.msra.mxu1 %v10879_v29  ;;  %v8412_v29 = vld [vmem:[%s11979_s4 + $0x3e8] sm:$0xff] }
 0xa42   :  { %7652 = vmatprep.subr.mxu1 %v10883_v19  ;;  %v8413_v19 = vld [vmem:[%s11979_s4 + $0x3e0] sm:$0xff] }
 0xa43   :  { %7653 = vmatpush3.msra.mxu1 %v10887_v63  ;;  %v8414_v63 = vld [vmem:[%s11982_s5 + $0x20] sm:$0xff] }
 0xa44   :  { %4740 = vmatmul.mubr.f32.vlgmr.msra.gmra.mxu1 %v8401_v2 }
 0xa45   :  { %4744 = vmatprep.mubr.f32.mxu1 %v8402_v59 }
 0xa48   :  { %4745 = vmatmul.mubr.f32.gmra.mxu1 %v8403_v33 }
 0xa49   :  { %4749 = vmatprep.mubr.f32.mxu1 %v8404_v12 }
 0xa4c   :  { %4750 = vmatmul.mubr.f32.gmra.mxu1 %v8405_v50 }
 0xa4d   :  { %4754 = vmatprep.mubr.f32.mxu1 %v8406_v56 }
 0xa50   :  { %4755 = vmatmul.mubr.f32.gmra.mxu1 %v8407_v7 }
 0xa51   :  { %4759 = vmatprep.mubr.f32.mxu1 %v8408_v10 }
 0xa54   :  { %4760 = vmatmul.mubr.f32.gmra.mxu1 %v8409_v61 }
 0xa55   :  { %4764 = vmatprep.mubr.f32.mxu1 %v8410_v23 }
 0xa58   :  { %4765 = vmatmul.mubr.f32.gmra.mxu1 %v8411_v8 }
 0xa59   :  { %4769 = vmatprep.mubr.f32.mxu1 %v8412_v29 }
 0xa5c   :  { %4770 = vmatmul.mubr.f32.gmra.mxu1 %v8413_v19 }
 0xa5d   :  { %8143 = vmatprep.mubr.msk.f32.mxu1 %vm2311_vm1, %v8414_v63 }
 0xa64   :  { %v8084_v11 = vpop.f32.mrf.mxu1 }
 0xa65   :  { %v11561_v51 = vadd.f32 %v8084_v11, %v11158_v32 }
 0xa66   :  { %v3815_v17 = vpop.f32.mrf.mxu1 }
 0xa67   :  { %12178 = vst [vmem:[#allocation24_spill] sm:$0xff] %v11561_v51  ;;  %v11564_v3 = vadd.f32 %v3815_v17, %v11161_v20 }
 0xa69   :  { %12179 = vst [vmem:[#allocation15_spill] sm:$0xff] %v11564_v3  ;;  %v11568_v44 = vadd.f32 %v11561_v51, %v11564_v3 }
 0xa6b   :  { %12180 = vst [vmem:[#allocation32_spill] sm:$0xff] %v11568_v44 }
 0xa84   :  { %v7230_v46 = vpop.f32.mrf.mxu1 }
 0xa86   :  { %v7231_v34 = vpop.f32.mrf.mxu1 }
 0xa87   :  { %v7232_v21 = vadd.f32 %v7231_v34, %v7230_v46 }
 0xa88   :  { %v7233_v39 = vpop.f32.mrf.mxu1 }
 0xa89   :  { %v4026_v52 = vmax.f32 %v7232_v21, %v11357_v49 }
 0xa8a   :  { %v7234_v1 = vpop.f32.mrf.mxu1 }
 0xa8b   :  { %v7235_v16 = vadd.f32 %v7234_v1, %v7233_v39 }
 0xa8c   :  { %v7236_v43 = vpop.f32.mrf.mxu1 }
 0xa8d   :  { %v4027_v32 = vmax.f32 %v7235_v16, %v11373_v4 }
 0xa8e   :  { %v7237_v41 = vpop.f32.mrf.mxu1 }
 0xa8f   :  { %v7238_v9 = vadd.f32 %v7237_v41, %v7236_v43 }
 0xa90   :  { %v7239_v48 = vpop.f32.mrf.mxu1 }
 0xa91   :  { %v4028_v20 = vmax.f32 %v7238_v9, %v11385_v14 }
 0xa92   :  { %v7240_v47 = vpop.f32.mrf.mxu1 }
 0xa93   :  { %v7241_v15 = vadd.f32 %v7240_v47, %v7239_v48 }
 0xa94   :  { %v7242_v24 = vpop.f32.mrf.mxu1 }
 0xa95   :  { %v4029_v57 = vmax.f32 %v7241_v15, %v11397_v42 }
 0xa96   :  { %v7243_v13 = vpop.f32.mrf.mxu1 }
 0xa97   :  { %v7244_v28 = vadd.f32 %v7243_v13, %v7242_v24 }
 0xa98   :  { %v7245_v36 = vpop.f32.mrf.mxu1 }
 0xa99   :  { %v4030_v49 = vmax.f32 %v7244_v28, %v11409_v53  ;;  %v11585_v53 = vpop.f32.mrf.mxu0 }
 0xa9a   :  { %v7246_v31 = vpop.f32.mrf.mxu1 }
 0xa9b   :  { %v7247_v22 = vadd.f32 %v7246_v31, %v7245_v36  ;;  %v11588_v33 = vpop.f32.mrf.mxu0 }
 0xa9c   :  { %v7248_v4 = vpop.f32.mrf.mxu1 }
 0xa9d   :  { %v4031_v26 = vmax.f32 %v7247_v22, %v11421_v45  ;;  %v11590_v56 = vpop.f32.mrf.mxu0 }
 0xa9e   :  { %v7249_v14 = vpop.f32.mrf.mxu1 }
 0xa9f   :  { %v7250_v25 = vadd.f32 %v7249_v14, %v7248_v4  ;;  %v11593_v8 = vpop.f32.mrf.mxu0 }
 0xaa1   :  { %v4032_v42 = vmax.f32 %v7250_v25, %v11430_v0  ;;  %v11596_v17 = vpop.f32.mrf.mxu0 }
 0xaa4   :  { %v7336_v30 = vpop.f32.mrf.mxu1 }
 0xaa6   :  { %v7337_v27 = vpop.f32.mrf.mxu1 }
 0xaa7   :  { %v7338_v58 = vadd.f32 %v7337_v27, %v7336_v30 }
 0xaa8   :  { %v7339_v38 = vpop.f32.mrf.mxu1 }
 0xaa9   :  { %v4133_v6 = vmax.f32 %v4026_v52, %v7338_v58  ;;  %v11601_v52 = vpop.f32.mrf.mxu0 }
 0xaaa   :  { %v7340_v35 = vpop.f32.mrf.mxu1 }
 0xaab   :  { %v4240_v2 = vmax.f32 %v4133_v6, %v11453_v60  ;;  %v7341_v59 = vadd.f32 %v7340_v35, %v7339_v38 }
 0xaac   :  { %v7342_v45 = vpop.f32.mrf.mxu1 }
 0xaad   :  { %v4134_v12 = vmax.f32 %v4027_v32, %v7341_v59  ;;  %v11605_v32 = vpop.f32.mrf.mxu0 }
 0xaae   :  { %v7343_v50 = vpop.f32.mrf.mxu1 }
 0xaaf   :  { %v4241_v0 = vmax.f32 %v4134_v12, %v11465_v55  ;;  %v7344_v7 = vadd.f32 %v7343_v50, %v7342_v45  ;;  %v11609_v48 = vpop.f32.mrf.mxu0 }
 0xab0   :  { %v7345_v10 = vpop.f32.mrf.mxu1 }
 0xab1   :  { %v4135_v61 = vmax.f32 %v4028_v20, %v7344_v7  ;;  %v11611_v47 = vpop.f32.mrf.mxu0 }
 0xab2   :  { %v7346_v23 = vpop.f32.mrf.mxu1 }
 0xab3   :  { %v4242_v29 = vmax.f32 %v4135_v61, %v11477_v5  ;;  %v7347_v19 = vadd.f32 %v7346_v23, %v7345_v10  ;;  %v11615_v28 = vpop.f32.mrf.mxu0 }
 0xab4   :  { %v7348_v60 = vpop.f32.mrf.mxu1 }
 0xab5   :  { %v4136_v63 = vmax.f32 %v4029_v57, %v7347_v19  ;;  %v11619_v4 = vpop.f32.mrf.mxu0 }
 0xab6   :  { %v7349_v11 = vpop.f32.mrf.mxu1 }
 0xab7   :  { %v4243_v46 = vmax.f32 %v4136_v63, %v11489_v54  ;;  %v7350_v34 = vadd.f32 %v7349_v11, %v7348_v60  ;;  %v11623_v30 = vpop.f32.mrf.mxu0 }
 0xab8   :  { %v7351_v21 = vpop.f32.mrf.mxu1 }
 0xab9   :  { %v11599_v39 = vmax.f32 %v4030_v49, %v7350_v34  ;;  %v7510_v35 = vpop.f32.mrf.mxu0 }
 0xaba   :  { %v7352_v55 = vpop.f32.mrf.mxu1 }
 0xabb   :  { %v7353_v1 = vadd.f32 %v7352_v55, %v7351_v21  ;;  %v7511_v45 = vpop.f32.mrf.mxu0 }
 0xabc   :  { %v7354_v16 = vpop.f32.mrf.mxu1 }
 0xabd   :  { %v11603_v43 = vmax.f32 %v4031_v26, %v7353_v1  ;;  %v7513_v50 = vpop.f32.mrf.mxu0 }
 0xabe   :  { %v7355_v5 = vpop.f32.mrf.mxu1 }
 0xabf   :  { %v7356_v41 = vadd.f32 %v7355_v5, %v7354_v16  ;;  %v7514_v7 = vpop.f32.mrf.mxu0 }
 0xac1   :  { %v11607_v9 = vmax.f32 %v4032_v42, %v7356_v41  ;;  %v11629_v61 = vpop.f32.mrf.mxu0 }
 0xac2   :  { %12184 = vst [vmem:[#allocation26_spill] sm:$0xff] %v11629_v61 }
 0xac3   :  { %v11635_v19 = vpop.f32.mrf.mxu0 }
 0xac4   :  { %v7442_v54 = vpop.f32.mrf.mxu1  ;;  %12186 = vst [vmem:[#allocation28_spill] sm:$0xff] %v11635_v19  ;;  %v7409_v19 = vadd.f32 %v11588_v33, %v11585_v53  ;;  %v7515_v53 = vadd.f32 %v7514_v7, %v7513_v50 }
 0xac5   :  { %v11639_v63 = vpop.f32.mrf.mxu0 }
 0xac6   :  { %v7443_v20 = vpop.f32.mrf.mxu1  ;;  %12187 = vst [vmem:[#allocation27_spill] sm:$0xff] %v11639_v63 }
 0xac7   :  { %v7444_v15 = vadd.f32 %v7443_v20, %v7442_v54  ;;  %v11645_v34 = vpop.f32.mrf.mxu0 }
 0xac8   :  { %v7445_v24 = vpop.f32.mrf.mxu1  ;;  %12188 = vst [vmem:[#allocation19_spill] sm:$0xff] %v11645_v34 }
 0xac9   :  { %v11613_v57 = vmax.f32 %v4240_v2, %v7444_v15  ;;  %v11647_v1 = vpop.f32.mrf.mxu0 }
 0xaca   :  { %v7446_v13 = vpop.f32.mrf.mxu1  ;;  %12189 = vst [vmem:[#allocation18_spill] sm:$0xff] %v11647_v1 }
 0xacb   :  { %12181 = vst [vmem:[#allocation23_spill] sm:$0xff] %v11613_v57  ;;  %v7447_v36 = vadd.f32 %v7446_v13, %v7445_v24  ;;  %v11649_v41 = vpop.f32.mrf.mxu0 }
 0xacc   :  { %v7448_v49 = vpop.f32.mrf.mxu1  ;;  %12190 = vst [vmem:[#allocation29_spill] sm:$0xff] %v11649_v41 }
 0xacd   :  { %v11617_v31 = vmax.f32 %v4241_v0, %v7447_v36  ;;  %v11651_v15 = vpop.f32.mrf.mxu0 }
 0xace   :  { %v7449_v22 = vpop.f32.mrf.mxu1  ;;  %12191 = vst [vmem:[#allocation20_spill] sm:$0xff] %v11651_v15 }
 0xacf   :  { %12182 = vst [vmem:[#allocation17_spill] sm:$0xff] %v11617_v31  ;;  %v7450_v26 = vadd.f32 %v7449_v22, %v7448_v49  ;;  %v7611_v13 = vpop.f32.mrf.mxu0 }
 0xad0   :  { %v7451_v14 = vpop.f32.mrf.mxu1 }
 0xad1   :  { %v11621_v25 = vmax.f32 %v4242_v29, %v7450_v26  ;;  %v7613_v49 = vpop.f32.mrf.mxu0 }
 0xad2   :  { %v7452_v42 = vpop.f32.mrf.mxu1 }
 0xad3   :  { %v7453_v27 = vadd.f32 %v7452_v42, %v7451_v14  ;;  %v7614_v14 = vpop.f32.mrf.mxu0 }
 0xad4   :  { %v7454_v58 = vpop.f32.mrf.mxu1 }
 0xad5   :  { %v11625_v38 = vmax.f32 %v4243_v46, %v7453_v27  ;;  %v7616_v51 = vpop.f32.mrf.mxu0 }
 0xad6   :  { %v7455_v6 = vpop.f32.mrf.mxu1 }
 0xad7   :  { %v7617_v61 = vpop.f32.mrf.mxu0  ;;  %v7456_v1 = vadd.f32 %v7455_v6, %v7454_v58 }
 0xad8   :  { %v7457_v2 = vpop.f32.mrf.mxu1  ;;  %v7618_v7 = vadd.f32 %v7617_v61, %v7616_v51 }
 0xad9   :  { %v7619_v41 = vpop.f32.mrf.mxu0 }
 0xada   :  { %v7458_v59 = vpop.f32.mrf.mxu1 }
 0xadb   :  { %v7459_v57 = vadd.f32 %v7458_v59, %v7457_v2 }
 0xadc   :  { %v7460_v12 = vpop.f32.mrf.mxu1 }
 0xade   :  { %v7461_v0 = vpop.f32.mrf.mxu1 }
 0xadf   :  { %v7462_v63 = vadd.f32 %v7461_v0, %v7460_v12  ;;  %v7620_v12 = vpop.f32.mrf.mxu0 }
 0xae0   :  { %v7621_v50 = vadd.f32 %v7620_v12, %v7619_v41 }
 0xae4   :  { %v11627_v10 = vpop.f32.mrf.mxu1 }
 0xae5   :  { %12183 = vst [vmem:[#allocation16_spill] sm:$0xff] %v11627_v10 }
 0xae6   :  { %v11631_v23 = vpop.f32.mrf.mxu1 }
 0xae7   :  { %12185 = vst [vmem:[#allocation25_spill] sm:$0xff] %v11631_v23 }
 0xae8   :  { %v11633_v29 = vpop.f32.mrf.mxu1 }
 0xaea   :  { %v11637_v60 = vpop.f32.mrf.mxu1 }
 0xaeb   :  { %v7553_v51 = vadd.f32 %v11637_v60, %v11633_v29 }
 0xaec   :  { %v11641_v11 = vpop.f32.mrf.mxu1 }
 0xaee   :  { %v11643_v46 = vpop.f32.mrf.mxu1 }
 0xaf0   :  { %v7557_v21 = vpop.f32.mrf.mxu1 }
 0xaf2   :  { %v7558_v55 = vpop.f32.mrf.mxu1 }
 0xaf4   :  { %v7560_v16 = vpop.f32.mrf.mxu1 }
 0xaf6   :  { %v7561_v5 = vpop.f32.mrf.mxu1 }
 0xaf7   :  { %v7562_v2 = vadd.f32 %v7561_v5, %v7560_v16  ;;  %v12201_v16 = vld [vmem:[#allocation25_spill] sm:$0xff] }
 0xaf8   :  { %v7563_v54 = vpop.f32.mrf.mxu1 }
 0xafa   :  { %v7564_v20 = vpop.f32.mrf.mxu1 }
 0xafc   :  { %v7566_v24 = vpop.f32.mrf.mxu1 }
 0xafe   :  { %v7567_v36 = vpop.f32.mrf.mxu1 }
 0xb04   :  { %v11653_v22 = vpop.f32.mrf.mxu1 }
 0xb05   :  { %12192 = vst [vmem:[#allocation30_spill] sm:$0xff] %v11653_v22  ;;  %v7406_v22 = vadd.f32 %v11583_v37, %v11580_v62  ;;  %v7512_v62 = vadd.f32 %v7511_v45, %v7510_v35  ;;  %v7568_v37 = vadd.f32 %v7567_v36, %v7566_v24  ;;  %v7559_v35 = vadd.f32 %v7558_v55, %v7557_v21  ;;  %v12205_v24 = vld [vmem:[#allocation27_spill] sm:$0xff] }
 0xb06   :  { %v11655_v26 = vpop.f32.mrf.mxu1 }
 0xb07   :  { %12193 = vst [vmem:[#allocation21_spill] sm:$0xff] %v11655_v26 }
 0xb08   :  { %v11657_v42 = vpop.f32.mrf.mxu1 }
 0xb09   :  { %12194 = vst [vmem:[#allocation31_spill] sm:$0xff] %v11657_v42  ;;  %v7403_v42 = vadd.f32 %v11577_v40, %v11574_v18  ;;  %v7509_v18 = vadd.f32 %v11623_v30, %v11619_v4  ;;  %v7500_v4 = vadd.f32 %v11601_v52, %v11596_v17  ;;  %v12198_v17 = vld [vmem:[#allocation20_spill] sm:$0xff] }
 0xb0a   :  { %v11659_v27 = vpop.f32.mrf.mxu1  ;;  %v7612_v52 = vadd.f32 %v7611_v13, %v12198_v17  ;;  %v12206_v13 = vld [vmem:[#allocation19_spill] sm:$0xff] }
 0xb0b   :  { %12195 = vst [vmem:[#allocation22_spill] sm:$0xff] %v11659_v27  ;;  %v4246_v27 = vmax.f32 %v11607_v9, %v7409_v19  ;;  %v4244_v10 = vmax.f32 %v11599_v39, %v7403_v42  ;;  %v7565_v9 = vadd.f32 %v7564_v20, %v7563_v54  ;;  %v12202_v54 = vld [vmem:[#allocation18_spill] sm:$0xff]  ;;  %v7606_v36 = vadd.f32 %v12206_v13, %v12205_v24  ;;  %v8429_v13 = vld [vmem:[%s11982_s5 + $0x50] sm:$0xff] }
 0xb0c   :  { %v11661_v3 = vpop.f32.mrf.mxu1 }
 0xb0d   :  { %12196 = vst [vmem:[#allocation51_spill] sm:$0xff] %v11661_v3  ;;  %v4353_v23 = vmax.f32 %v4246_v27, %v7462_v63  ;;  %v4351_v15 = vmax.f32 %v4244_v10, %v7456_v1  ;;  %v12200_v1 = vld [vmem:[#allocation16_spill] sm:$0xff]  ;;  %v12209_v27 = vld [vmem:[#allocation26_spill] sm:$0xff] }
 0xb0e   :  { %v11663_v44 = vpop.f32.mrf.mxu1  ;;  %v7550_v5 = vadd.f32 %v12201_v16, %v12200_v1 }
 0xb0f   :  { %12197 = vst [vmem:[#allocation36_spill] sm:$0xff] %v11663_v44  ;;  %v4245_v44 = vmax.f32 %v11603_v43, %v7406_v22  ;;  %v4460_v40 = vmax.f32 %v4353_v23, %v7515_v53  ;;  %v7506_v43 = vadd.f32 %v11615_v28, %v11611_v47  ;;  %v7556_v47 = vadd.f32 %v11643_v46, %v11641_v11  ;;  %v12199_v46 = vld [vmem:[#allocation17_spill] sm:$0xff]  ;;  %v12210_v53 = vld [vmem:[#allocation28_spill] sm:$0xff] }
 0xb10   :  { %v7663_v34 = vpop.f32.mrf.mxu1  ;;  %v7615_v28 = vadd.f32 %v7614_v14, %v7613_v49  ;;  %v4455_v55 = vmax.f32 %v12199_v46, %v7500_v4  ;;  %v8421_v4 = vld [vmem:[%s11982_s5 + $0x38] sm:$0xff] }
 0xb11   :  { %v4352_v31 = vmax.f32 %v4245_v44, %v7459_v57  ;;  %v4567_v59 = vmax.f32 %v4460_v40, %v7568_v37  ;;  %v7503_v44 = vadd.f32 %v11609_v48, %v11605_v32  ;;  %v4458_v57 = vmax.f32 %v4351_v15, %v7509_v18  ;;  %v12211_v37 = vld [vmem:[#allocation31_spill] sm:$0xff] }
 0xb12   :  { %v7664_v26 = vpop.f32.mrf.mxu1  ;;  %v4457_v30 = vmax.f32 %v11625_v38, %v7506_v43  ;;  %v7497_v32 = vadd.f32 %v11593_v8, %v11590_v56  ;;  %v12203_v56 = vld [vmem:[#allocation29_spill] sm:$0xff]  ;;  %v4562_v60 = vmax.f32 %v4455_v55, %v7553_v51  ;;  %v12212_v12 = vld [vmem:[#allocation22_spill] sm:$0xff] }
 0xb13   :  { %v4459_v6 = vmax.f32 %v4352_v31, %v7512_v62  ;;  %v4565_v10 = vmax.f32 %v4458_v57, %v7562_v2  ;;  %v4674_v23 = vmax.f32 %v4567_v59, %v7621_v50  ;;  %v4456_v48 = vmax.f32 %v11621_v25, %v7503_v44  ;;  %v12214_v43 = vld [vmem:[#allocation21_spill] sm:$0xff]  ;;  %v8415_v44 = vld [vmem:[%s11982_s5 + $0x8] sm:$0xff]  ;;  %v8417_v57 = vld [vmem:[%s11982_s5 + $0x10] sm:$0xff] }
 0xb14   :  { %v7666_v3 = vpop.f32.mrf.mxu1  ;;  %v4564_v38 = vmax.f32 %v4457_v30, %v7559_v35  ;;  %v7609_v8 = vadd.f32 %v12203_v56, %v12202_v54  ;;  %v7665_v20 = vadd.f32 %v7664_v26, %v7663_v34  ;;  %v12207_v22 = vld [vmem:[#allocation51_spill] sm:$0xff]  ;;  %v4669_v40 = vmax.f32 %v4562_v60, %v7606_v36  ;;  %v8418_v35 = vld [vmem:[%s11982_s5 + $0x18] sm:$0xff] }
 0xb15   :  { %v4566_v45 = vmax.f32 %v4459_v6, %v7565_v9  ;;  %v4563_v41 = vmax.f32 %v4456_v48, %v7556_v47  ;;  %v4672_v25 = vmax.f32 %v4565_v10, %v7615_v28  ;;  %v12213_v9 = vld [vmem:[#allocation30_spill] sm:$0xff]  ;;  %v8422_v30 = vld [vmem:[%s11983_s6 + $0x8] sm:$0xff]  ;;  %v8425_v51 = vld [vmem:[%s11983_s6 + $0x18] sm:$0xff] }
 0xb16   :  { %v7667_v33 = vpop.f32.mrf.mxu1  ;;  %v4671_v49 = vmax.f32 %v4564_v38, %v7612_v52  ;;  %v12208_v14 = vld [vmem:[#allocation36_spill] sm:$0xff]  ;;  %v8423_v47 = vld [vmem:[%s11983_s6] sm:$0xff]  ;;  %v8427_v38 = vld [vmem:[%s11982_s5 + $0x48] sm:$0xff] }
 0xb17   :  { %v4673_v61 = vmax.f32 %v4566_v45, %v7618_v7  ;;  %v7668_v21 = vadd.f32 %v7667_v33, %v7666_v3  ;;  %v12204_v3 = vld [vmem:[#allocation23_spill] sm:$0xff]  ;;  %v7662_v34 = vadd.f32 %v12208_v14, %v12207_v22  ;;  %v7603_v33 = vadd.f32 %v12210_v53, %v12209_v27  ;;  %v8419_v45 = vld [vmem:[%s11982_s5 + $0x30] sm:$0xff]  ;;  %v8420_v7 = vld [vmem:[%s11983_s6 + $0x20] sm:$0xff] }
 0xb18   :  { %v7669_v0 = vpop.f32.mrf.mxu1  ;;  %v4454_v29 = vmax.f32 %v12204_v3, %v7497_v32  ;;  %v4670_v62 = vmax.f32 %v4563_v41, %v7609_v8  ;;  %v11719_v18 = vmax.f32 %v4671_v49, %v7665_v20  ;;  %v8424_v32 = vld [vmem:[%s11983_s6 + $0x10] sm:$0xff]  ;;  %v8426_v52 = vld [vmem:[%s11982_s5 + $0x40] sm:$0xff]  ;;  %v8430_v36 = vld [vmem:[%s11982_s5 + $0x58] sm:$0xff] }
 0xb19   :  { %v11709_v26 = vmax.f32 %v4672_v25, %v7668_v21  ;;  %v8431_v49 = vld [vmem:[%s11983_s6 + $0x30] sm:$0xff] }
 0xb1a   :  { %v7670_v58 = vpop.f32.mrf.mxu1  ;;  %v4561_v42 = vmax.f32 %v4454_v29, %v7550_v5  ;;  %v11727_v6 = vmax.f32 %v4670_v62, %v7662_v34  ;;  %v8433_v62 = vld [vmem:[%s11982_s5 + $0x68] sm:$0xff] }
 0xb1b   :  { %v7671_v19 = vadd.f32 %v7670_v58, %v7669_v0  ;;  %v7659_v0 = vadd.f32 %v12212_v12, %v12211_v37  ;;  %v7656_v58 = vadd.f32 %v12214_v43, %v12213_v9  ;;  %v8434_v37 = vld [vmem:[%s11983_s6 + $0x38] sm:$0xff] }
 0xb1c   :  { %v7672_v39 = vpop.f32.mrf.mxu1  ;;  %v4668_v2 = vmax.f32 %v4561_v42, %v7603_v33  ;;  %v8432_v33 = vld [vmem:[%s11982_s5 + $0x60] sm:$0xff] }
 0xb1d   :  { %v11698_v15 = vmax.f32 %v4673_v61, %v7671_v19  ;;  %v11733_v59 = vmax.f32 %v4669_v40, %v7659_v0  ;;  %v8428_v61 = vld [vmem:[%s11983_s6 + $0x28] sm:$0xff] }
 0xb1e   :  { %v7673_v31 = vpop.f32.mrf.mxu1  ;;  %v11739_v50 = vmax.f32 %v4668_v2, %v7656_v58  ;;  %v8435_v2 = vld [vmem:[%s11982_s5 + $0x70] sm:$0xff] }
 0xb1f   :  { %v7674_v63 = vadd.f32 %v7673_v31, %v7672_v39  ;;  %v8416_v39 = vld [vmem:[%s11982_s5 + $0x28] sm:$0xff] }
 0xb21   :  { %v11691_v11 = vmax.f32 %v4674_v23, %v7674_v63 }
 0xb23   :  { %8085 = vmatprep.subr.mxu0 %v11691_v11  ;;  %8129 = vmatprep.subr.mxu1 %v11691_v11 }
 0xb24   :  { %8086 = vmatpush3.msra.mxu0 %v11691_v11  ;;  %8130 = vmatpush3.msra.mxu1 %v11691_v11 }
 0xb25   :  { %8087 = vmatprep.subr.mxu0 %v11698_v15  ;;  %8131 = vmatprep.subr.mxu1 %v11698_v15 }
 0xb26   :  { %8088 = vmatpush3.msra.mxu0 %v11698_v15  ;;  %8132 = vmatpush3.msra.mxu1 %v11698_v15 }
 0xb27   :  { %8089 = vmatprep.subr.mxu0 %v11709_v26  ;;  %8133 = vmatprep.subr.mxu1 %v11709_v26 }
 0xb28   :  { %8090 = vmatpush3.msra.mxu0 %v11709_v26  ;;  %8134 = vmatpush3.msra.mxu1 %v11709_v26 }
 0xb29   :  { %8091 = vmatprep.subr.mxu0 %v11719_v18  ;;  %8135 = vmatprep.subr.mxu1 %v11719_v18 }
 0xb2a   :  { %8092 = vmatpush3.msra.mxu0 %v11719_v18  ;;  %8136 = vmatpush3.msra.mxu1 %v11719_v18 }
 0xb2b   :  { %8093 = vmatprep.subr.mxu0 %v11727_v6  ;;  %8137 = vmatprep.subr.mxu1 %v11727_v6 }
 0xb2c   :  { %8094 = vmatpush3.msra.mxu0 %v11727_v6  ;;  %8138 = vmatpush3.msra.mxu1 %v11727_v6 }
 0xb2d   :  { %8095 = vmatprep.subr.mxu0 %v11733_v59  ;;  %8139 = vmatprep.subr.mxu1 %v11733_v59 }
 0xb2e   :  { %8096 = vmatpush3.msra.mxu0 %v11733_v59  ;;  %8140 = vmatpush3.msra.mxu1 %v11733_v59 }
 0xb2f   :  { %8097 = vmatprep.subr.mxu0 %v11739_v50  ;;  %8141 = vmatprep.subr.mxu1 %v11739_v50 }
 0xb30   :  { %8098 = vmatpush3.msra.mxu0 %v11739_v50  ;;  %8142 = vmatpush3.msra.mxu1 %v11739_v50 }
 0xb31   :  { %8102 = vmatprep.subr.mxu0 %v11691_v11  ;;  %8151 = vmatprep.subr.mxu1 %v11691_v11 }
 0xb32   :  { %8100 = vmatmul.mubr.msk.f32.vlgmr.msra.gmra.mxu0 %vm2311_vm1, %v8415_v44  ;;  %8144 = vmatmul.mubr.msk.f32.vlgmr.msra.gmra.mxu1 %vm2311_vm1, %v8416_v39  ;;  %v8436_v44 = vld [vmem:[%s11982_s5 + $0x78] sm:$0xff]  ;;  %v8437_v39 = vld [vmem:[%s11983_s6 + $0x40] sm:$0xff] }
 0xb33   :  { %8103 = vmatpush3.msra.mxu0 %v11691_v11  ;;  %8152 = vmatpush3.msra.mxu1 %v11691_v11 }
 0xb34   :  { %8104 = vmatprep.subr.mxu0 %v11698_v15  ;;  %8153 = vmatprep.subr.mxu1 %v11698_v15 }
 0xb35   :  { %8105 = vmatpush3.msra.mxu0 %v11698_v15  ;;  %8154 = vmatpush3.msra.mxu1 %v11698_v15 }
 0xb36   :  { %8106 = vmatprep.subr.mxu0 %v11709_v26  ;;  %8155 = vmatprep.subr.mxu1 %v11709_v26 }
 0xb37   :  { %8107 = vmatpush3.msra.mxu0 %v11709_v26  ;;  %8156 = vmatpush3.msra.mxu1 %v11709_v26 }
 0xb38   :  { %8108 = vmatprep.subr.mxu0 %v11719_v18  ;;  %8157 = vmatprep.subr.mxu1 %v11719_v18 }
 0xb39   :  { %8109 = vmatpush3.msra.mxu0 %v11719_v18  ;;  %8158 = vmatpush3.msra.mxu1 %v11719_v18 }
 0xb3a   :  { %8110 = vmatprep.subr.mxu0 %v11727_v6  ;;  %8159 = vmatprep.subr.mxu1 %v11727_v6 }
 0xb3b   :  { %8111 = vmatpush3.msra.mxu0 %v11727_v6  ;;  %8160 = vmatpush3.msra.mxu1 %v11727_v6 }
 0xb3c   :  { %8112 = vmatprep.subr.mxu0 %v11733_v59  ;;  %8161 = vmatprep.subr.mxu1 %v11733_v59 }
 0xb3d   :  { %8113 = vmatpush3.msra.mxu0 %v11733_v59  ;;  %8162 = vmatpush3.msra.mxu1 %v11733_v59 }
 0xb3e   :  { %8114 = vmatprep.subr.mxu0 %v11739_v50  ;;  %8163 = vmatprep.subr.mxu1 %v11739_v50 }
 0xb3f   :  { %8115 = vmatpush3.msra.mxu0 %v11739_v50  ;;  %8116 = vmatprep.mubr.msk.f32.mxu0 %vm2311_vm1, %v8417_v57 }
 0xb40   :  { %8164 = vmatpush3.msra.mxu1 %v11739_v50  ;;  %8117 = vmatmul.mubr.msk.f32.vlgmr.msra.gmra.mxu0 %vm2311_vm1, %v8418_v35 }
 0xb41   :  { %8165 = vmatprep.mubr.msk.f32.mxu1 %vm2311_vm1, %v8419_v45  ;;  %8190 = vmatprep.subr.mxu1 %v8420_v7 }
 0xb42   :  { %8166 = vmatmul.mubr.msk.f32.vlgmr.msra.gmra.mxu1 %vm2311_vm1, %v8421_v4  ;;  %8119 = vmatprep.subr.mxu0 %v8422_v30 }
 0xb43   :  { %8191 = vmatpush3.msra.mxu1 %v8420_v7  ;;  %8120 = vmatpush3.msra.mxu0 %v8422_v30 }
 0xb44   :  { %8195 = vmatprep.subr.mxu1 %v11691_v11  ;;  %8124 = vmatprep.subr.mxu0 %v8423_v47 }
 0xbf2   :  { %v8101_v28 = vpop.f32.mrf.mxu0  ;;  %v8145_v23 = vpop.f32.mrf.mxu1 }
 0xbf4   :  { %v4848_v31 = vpop.f32.mrf.mxu0  ;;  %v5160_v63 = vpop.f32.mrf.mxu1 }
 0xc00   :  { %v8118_v10 = vpop.f32.mrf.mxu0 }
 0xc02   :  { %v4923_v19 = vpop.f32.mrf.mxu0  ;;  %v8167_v48 = vpop.f32.mrf.mxu1 }
 0xc03   :  { %8121 = vmatprep.mubr.msk.f32.mxu0 %vm2480_vm2, %v4923_v19  ;;  %v12215_v19 = vld [vmem:[#allocation32_spill] sm:$0xff] }
 0xc04   :  { %8122 = vmatmul.mubr.msk.f32.vlgmr.msra.gmra.mxu0 %vm2480_vm2, %v8118_v10  ;;  %v5318_v17 = vpop.f32.mrf.mxu1 }
 0xc05   :  { %8126 = vmatprep.mubr.msk.f32.mxu0 %vm2480_vm2, %v4848_v31  ;;  %8125 = vmatpush3.msra.mxu0 %v8423_v47  ;;  %v8438_v47 = vld [vmem:[%s11982_s5 + $0x80] sm:$0xff] }
 0xc06   :  { %8146 = vmatprep.subr.mxu0 %v8424_v32 }
 0xc08   :  { %8127 = vmatmul.mubr.msk.f32.vlgmr.msra.gmra.mxu0 %vm2480_vm2, %v8101_v28 }
 0xc09   :  { %8147 = vmatpush3.msra.mxu0 %v8424_v32  ;;  %8148 = vmatprep.mubr.msk.f32.mxu0 %vm2480_vm2, %v5160_v63 }
 0xc0a   :  { %8168 = vmatprep.subr.mxu0 %v8425_v51 }
 0xc0c   :  { %8149 = vmatmul.mubr.msk.f32.vlgmr.msra.gmra.mxu0 %vm2480_vm2, %v8145_v23 }
 0xc0d   :  { %8169 = vmatpush3.msra.mxu0 %v8425_v51  ;;  %8170 = vmatprep.mubr.msk.f32.mxu0 %vm2480_vm2, %v5318_v17 }
 0xc0e   :  { %8173 = vmatprep.subr.mxu0 %v11691_v11 }
 0xc10   :  { %8171 = vmatmul.mubr.msk.f32.vlgmr.msra.gmra.mxu0 %vm2480_vm2, %v8167_v48 }
 0xc11   :  { %8174 = vmatpush3.msra.mxu0 %v11691_v11  ;;  %8187 = vmatprep.mubr.msk.f32.mxu0 %vm2311_vm1, %v8426_v52 }
 0xc12   :  { %8175 = vmatprep.subr.mxu0 %v11698_v15 }
 0xc13   :  { %8176 = vmatpush3.msra.mxu0 %v11698_v15 }
 0xc14   :  { %8177 = vmatprep.subr.mxu0 %v11709_v26 }
 0xc15   :  { %8178 = vmatpush3.msra.mxu0 %v11709_v26 }
 0xc16   :  { %8179 = vmatprep.subr.mxu0 %v11719_v18 }
 0xc17   :  { %8180 = vmatpush3.msra.mxu0 %v11719_v18 }
 0xc18   :  { %8181 = vmatprep.subr.mxu0 %v11727_v6 }
 0xc19   :  { %8182 = vmatpush3.msra.mxu0 %v11727_v6 }
 0xc1a   :  { %8183 = vmatprep.subr.mxu0 %v11733_v59 }
 0xc1b   :  { %8184 = vmatpush3.msra.mxu0 %v11733_v59 }
 0xc1c   :  { %8185 = vmatprep.subr.mxu0 %v11739_v50 }
 0xc1d   :  { %8186 = vmatpush3.msra.mxu0 %v11739_v50 }
 0xc1e   :  { %8188 = vmatmul.mubr.msk.f32.vlgmr.msra.gmra.mxu0 %vm2311_vm1, %v8427_v38  ;;  %8212 = vmatprep.subr.mxu0 %v8428_v61 }
 0xc1f   :  { %8213 = vmatpush3.msra.mxu0 %v8428_v61 }
 0xc20   :  { %8217 = vmatprep.subr.mxu0 %v11691_v11 }
 0xcc4   :  { %v8123_v21 = vpop.f32.mrf.mxu0 }
 0xcc6   :  { %v5004_v46 = vpop.f32.mrf.mxu0 }
 0xcc8   :  { %v8128_v55 = vpop.f32.mrf.mxu0 }
 0xcc9   :  { %v5091_v1 = vadd.f32 %v8128_v55, %v8123_v21 }
 0xcca   :  { %v5085_v16 = vpop.f32.mrf.mxu0 }
 0xccb   :  { %v5086_v5 = vadd.f32 %v5085_v16, %v5004_v46  ;;  %v12216_v46 = vld [vmem:[#allocation15_spill] sm:$0xff] }
 0xccc   :  { %v8150_v41 = vpop.f32.mrf.mxu0 }
 0xccd   :  { %v5251_v54 = vadd.f32 %v8150_v41, %v5091_v1  ;;  %v12217_v1 = vld [vmem:[#allocation24_spill] sm:$0xff] }
 0xcce   :  { %v5241_v56 = vpop.f32.mrf.mxu0 }
 0xccf   :  { %v5250_v8 = vadd.f32 %v5241_v56, %v5086_v5 }
 0xcd0   :  { %v8172_v25 = vpop.f32.mrf.mxu0 }
 0xcd1   :  { %v5409_v20 = vadd.f32 %v8172_v25, %v5251_v54 }
 0xcd2   :  { %v5399_v3 = vpop.f32.mrf.mxu0 }
 0xcd3   :  { %v5408_v29 = vadd.f32 %v5399_v3, %v5250_v8 }
 0xcde   :  { %v8189_v60 = vpop.f32.mrf.mxu0 }
 0xce0   :  { %v5476_v24 = vpop.f32.mrf.mxu0 }
 0xce1   :  { %8192 = vmatprep.mubr.msk.f32.mxu1 %vm2480_vm2, %v5476_v24 }
 0xce2   :  { %8193 = vmatmul.mubr.msk.f32.vlgmr.msra.gmra.mxu1 %vm2480_vm2, %v8189_v60 }
 0xce3   :  { %8196 = vmatpush3.msra.mxu1 %v11691_v11  ;;  %8209 = vmatprep.mubr.msk.f32.mxu1 %vm2311_vm1, %v8429_v13 }
 0xce4   :  { %8197 = vmatprep.subr.mxu1 %v11698_v15 }
 0xce5   :  { %8198 = vmatpush3.msra.mxu1 %v11698_v15 }
 0xce6   :  { %8199 = vmatprep.subr.mxu1 %v11709_v26 }
 0xce7   :  { %8200 = vmatpush3.msra.mxu1 %v11709_v26 }
 0xce8   :  { %8201 = vmatprep.subr.mxu1 %v11719_v18 }
 0xce9   :  { %8202 = vmatpush3.msra.mxu1 %v11719_v18 }
 0xcea   :  { %8203 = vmatprep.subr.mxu1 %v11727_v6 }
 0xceb   :  { %8204 = vmatpush3.msra.mxu1 %v11727_v6 }
 0xcec   :  { %8205 = vmatprep.subr.mxu1 %v11733_v59 }
 0xced   :  { %8206 = vmatpush3.msra.mxu1 %v11733_v59 }
 0xcee   :  { %8207 = vmatprep.subr.mxu1 %v11739_v50 }
 0xcef   :  { %8208 = vmatpush3.msra.mxu1 %v11739_v50 }
 0xcf0   :  { %8210 = vmatmul.mubr.msk.f32.vlgmr.msra.gmra.mxu1 %vm2311_vm1, %v8430_v36  ;;  %8234 = vmatprep.subr.mxu1 %v8431_v49 }
 0xcf1   :  { %8235 = vmatpush3.msra.mxu1 %v8431_v49 }
 0xcf2   :  { %8239 = vmatprep.subr.mxu1 %v11691_v11 }
 0xda2   :  { %v8194_v22 = vpop.f32.mrf.mxu1 }
 0xda3   :  { %v5567_v14 = vadd.f32 %v8194_v22, %v5409_v20 }
 0xda4   :  { %v5557_v34 = vpop.f32.mrf.mxu1 }
 0xda5   :  { %v5566_v42 = vadd.f32 %v5557_v34, %v5408_v29 }
 0xdb0   :  { %v8211_v27 = vpop.f32.mrf.mxu1 }
 0xdb2   :  { %v5634_v53 = vpop.f32.mrf.mxu1 }
 0xdb3   :  { %8214 = vmatprep.mubr.msk.f32.mxu0 %vm2480_vm2, %v5634_v53 }
 0xdb4   :  { %8215 = vmatmul.mubr.msk.f32.vlgmr.msra.gmra.mxu0 %vm2480_vm2, %v8211_v27  ;;  %v6543_v27 = vld [vmem:[%s11984_s7] ss:$0 sm:$0xff] }
 0xdb5   :  { %8218 = vmatpush3.msra.mxu0 %v11691_v11  ;;  %8231 = vmatprep.mubr.msk.f32.mxu0 %vm2311_vm1, %v8432_v33 }
 0xdb6   :  { %8219 = vmatprep.subr.mxu0 %v11698_v15 }
 0xdb7   :  { %8220 = vmatpush3.msra.mxu0 %v11698_v15 }
 0xdb8   :  { %8221 = vmatprep.subr.mxu0 %v11709_v26 }
 0xdb9   :  { %8222 = vmatpush3.msra.mxu0 %v11709_v26 }
 0xdba   :  { %8223 = vmatprep.subr.mxu0 %v11719_v18 }
 0xdbb   :  { %8224 = vmatpush3.msra.mxu0 %v11719_v18 }
 0xdbc   :  { %8225 = vmatprep.subr.mxu0 %v11727_v6 }
 0xdbd   :  { %8226 = vmatpush3.msra.mxu0 %v11727_v6 }
 0xdbe   :  { %8227 = vmatprep.subr.mxu0 %v11733_v59 }
 0xdbf   :  { %8228 = vmatpush3.msra.mxu0 %v11733_v59 }
 0xdc0   :  { %8229 = vmatprep.subr.mxu0 %v11739_v50 }
 0xdc1   :  { %8230 = vmatpush3.msra.mxu0 %v11739_v50 }
 0xdc2   :  { %8232 = vmatmul.mubr.msk.f32.vlgmr.msra.gmra.mxu0 %vm2311_vm1, %v8433_v62  ;;  %8256 = vmatprep.subr.mxu0 %v8434_v37 }
 0xdc3   :  { %8257 = vmatpush3.msra.mxu0 %v8434_v37 }
 0xdc4   :  { %8261 = vmatprep.subr.mxu0 %v11691_v11 }
 0xe74   :  { %v8216_v12 = vpop.f32.mrf.mxu0 }
 0xe75   :  { %v5725_v0 = vadd.f32 %v8216_v12, %v5567_v14  ;;  %v6544_v12 = vld [vmem:[%s11985_s8] ss:$0 sm:$0xff] }
 0xe76   :  { %v5715_v40 = vpop.f32.mrf.mxu0 }
 0xe77   :  { %v5724_v9 = vadd.f32 %v5715_v40, %v5566_v42 }
 0xe82   :  { %v8233_v43 = vpop.f32.mrf.mxu0 }
 0xe84   :  { %v5792_v58 = vpop.f32.mrf.mxu0 }
 0xe85   :  { %8236 = vmatprep.mubr.msk.f32.mxu1 %vm2480_vm2, %v5792_v58 }
 0xe86   :  { %8237 = vmatmul.mubr.msk.f32.vlgmr.msra.gmra.mxu1 %vm2480_vm2, %v8233_v43 }
 0xe87   :  { %8240 = vmatpush3.msra.mxu1 %v11691_v11  ;;  %8253 = vmatprep.mubr.msk.f32.mxu1 %vm2311_vm1, %v8435_v2 }
 0xe88   :  { %8241 = vmatprep.subr.mxu1 %v11698_v15 }
 0xe89   :  { %8242 = vmatpush3.msra.mxu1 %v11698_v15 }
 0xe8a   :  { %8243 = vmatprep.subr.mxu1 %v11709_v26 }
 0xe8b   :  { %8244 = vmatpush3.msra.mxu1 %v11709_v26 }
 0xe8c   :  { %8245 = vmatprep.subr.mxu1 %v11719_v18 }
 0xe8d   :  { %8246 = vmatpush3.msra.mxu1 %v11719_v18 }
 0xe8e   :  { %8247 = vmatprep.subr.mxu1 %v11727_v6 }
 0xe8f   :  { %8248 = vmatpush3.msra.mxu1 %v11727_v6 }
 0xe90   :  { %8249 = vmatprep.subr.mxu1 %v11733_v59 }
 0xe91   :  { %8250 = vmatpush3.msra.mxu1 %v11733_v59 }
 0xe92   :  { %8251 = vmatprep.subr.mxu1 %v11739_v50 }
 0xe93   :  { %8252 = vmatpush3.msra.mxu1 %v11739_v50 }
 0xe94   :  { %8254 = vmatmul.mubr.msk.f32.vlgmr.msra.gmra.mxu1 %vm2311_vm1, %v8436_v44  ;;  %8278 = vmatprep.subr.mxu1 %v8437_v39 }
 0xe95   :  { %8279 = vmatpush3.msra.mxu1 %v8437_v39 }
 0xf46   :  { %v8238_v57 = vpop.f32.mrf.mxu1 }
 0xf47   :  { %v5883_v35 = vadd.f32 %v8238_v57, %v5725_v0 }
 0xf48   :  { %v5873_v45 = vpop.f32.mrf.mxu1 }
 0xf49   :  { %v5882_v7 = vadd.f32 %v5873_v45, %v5724_v9 }
 0xf54   :  { %v8255_v4 = vpop.f32.mrf.mxu1 }
 0xf56   :  { %v5950_v30 = vpop.f32.mrf.mxu1 }
 0xf57   :  { %8258 = vmatprep.mubr.msk.f32.mxu0 %vm2480_vm2, %v5950_v30 }
 0xf58   :  { %8259 = vmatmul.mubr.msk.f32.vlgmr.msra.gmra.mxu0 %vm2480_vm2, %v8255_v4 }
 0xf59   :  { %8262 = vmatpush3.msra.mxu0 %v11691_v11  ;;  %8275 = vmatprep.mubr.msk.f32.mxu0 %vm2311_vm1, %v8438_v47  ;;  %v8439_v11 = vld [vmem:[%s11982_s5 + $0x88] sm:$0xff] }
 0xf5a   :  { %8263 = vmatprep.subr.mxu0 %v11698_v15 }
 0xf5b   :  { %8264 = vmatpush3.msra.mxu0 %v11698_v15 }
 0xf5c   :  { %8265 = vmatprep.subr.mxu0 %v11709_v26 }
 0xf5d   :  { %8266 = vmatpush3.msra.mxu0 %v11709_v26 }
 0xf5e   :  { %8267 = vmatprep.subr.mxu0 %v11719_v18 }
 0xf5f   :  { %8268 = vmatpush3.msra.mxu0 %v11719_v18 }
 0xf60   :  { %8269 = vmatprep.subr.mxu0 %v11727_v6 }
 0xf61   :  { %8270 = vmatpush3.msra.mxu0 %v11727_v6 }
 0xf62   :  { %8271 = vmatprep.subr.mxu0 %v11733_v59 }
 0xf63   :  { %8272 = vmatpush3.msra.mxu0 %v11733_v59 }
 0xf64   :  { %8273 = vmatprep.subr.mxu0 %v11739_v50 }
 0xf65   :  { %8274 = vmatpush3.msra.mxu0 %v11739_v50 }
 0xf66   :  { %8276 = vmatmul.mubr.msk.f32.vlgmr.msra.gmra.mxu0 %vm2311_vm1, %v8439_v11 }
0x1018   :  { %v8260_v15 = vpop.f32.mrf.mxu0 }
0x1019   :  { %v6041_v26 = vadd.f32 %v8260_v15, %v5883_v35 }
0x101a   :  { %v6031_v18 = vpop.f32.mrf.mxu0 }
0x101b   :  { %v6040_v28 = vadd.f32 %v6031_v18, %v5882_v7 }
0x1026   :  { %v8277_v31 = vpop.f32.mrf.mxu0 }
0x1028   :  { %v6108_v6 = vpop.f32.mrf.mxu0 }
0x1029   :  { %8280 = vmatprep.mubr.msk.f32.mxu1 %vm2480_vm2, %v6108_v6 }
0x102a   :  { %8281 = vmatmul.mubr.msk.f32.vlgmr.msra.gmra.mxu1 %vm2480_vm2, %v8277_v31 }
0x10ea   :  { %v8282_v59 = vpop.f32.mrf.mxu1 }
0x10eb   :  { %v6199_v50 = vadd.f32 %v8282_v59, %v6041_v26 }
0x10ec   :  { %v6189_v10 = vpop.f32.mrf.mxu1 }
0x10ed   :  { %v6198_v23 = vadd.f32 %v6189_v10, %v6040_v28 }
0x10ef   :  { %v6201_v63 = vadd.f32 %v12215_v19, %v6198_v23 }
0x10f1   :  { %v6202_v32 = vadd.f32 %v6201_v63, %v6199_v50 }
0x10f3   :  { %v6203_v48 = vrot.slane %v6202_v32, 4 }
0x10f5   :  { %v6204_v51 = vadd.f32 %v6203_v48, %v6202_v32 }
0x10f7   :  { %v6205_v17 = vrot.slane %v6204_v51, 2 }
0x10f9   :  { %v6206_v52 = vadd.f32 %v6205_v17, %v6204_v51 }
0x10fb   :  { %v6207_v38 = vrot.slane %v6206_v52, 1 }
0x10fd   :  { %v6208_v61 = vadd.f32 %v6207_v38, %v6206_v52 }
0x10ff   :  { %v6210_v21 = vmul.f32 0.03125, %v6208_v61 }
0x1101   :  { %v6211_v55 = vsub.f32 %v12216_v46, %v6210_v21  ;;  %v6212_v16 = vsub.f32 %v12217_v1, %v6210_v21  ;;  %v6213_v5 = vsub.f32 %v6198_v23, %v6210_v21  ;;  %v6214_v41 = vsub.f32 %v6199_v50, %v6210_v21 }
0x1103   :  { %v6215_v54 = vmul.f32 %v6211_v55, %v6211_v55  ;;  %v6216_v56 = vmul.f32 %v6212_v16, %v6212_v16  ;;  %v6217_v8 = vmul.f32 %v6213_v5, %v6213_v5  ;;  %v6218_v20 = vmul.f32 %v6214_v41, %v6214_v41 }
0x1105   :  { %v6219_v25 = vadd.f32 %v6216_v56, %v6215_v54 }
0x1107   :  { %v6220_v3 = vadd.f32 %v6219_v25, %v6217_v8 }
0x1109   :  { %v6221_v29 = vadd.f32 %v6220_v3, %v6218_v20 }
0x110b   :  { %v6222_v60 = vrot.slane %v6221_v29, 4 }
0x110d   :  { %v6223_v24 = vadd.f32 %v6222_v60, %v6221_v29 }
0x110f   :  { %v6224_v13 = vrot.slane %v6223_v24, 2 }
0x1111   :  { %v6225_v36 = vadd.f32 %v6224_v13, %v6223_v24 }
0x1113   :  { %v6226_v49 = vrot.slane %v6225_v36, 1 }
0x1115   :  { %v6227_v22 = vadd.f32 %v6226_v49, %v6225_v36 }
0x1117   :  { %v6228_v14 = vmul.f32 0.03125, %v6227_v22 }
0x1119   :  { %v6229_v34 = vadd.f32 1e-05, %v6228_v14 }
0x111b   :  { %8285 = vrsqrt.f32 %v6229_v34 }
0x1128   :  { %v8286_v42 = vpop.eup %8285 }
0x1129   :  { %v6231_v53 = vmul.f32 %v8286_v42, %v6211_v55  ;;  %v6232_v33 = vmul.f32 %v8286_v42, %v6212_v16  ;;  %v6233_v62 = vmul.f32 %v8286_v42, %v6213_v5  ;;  %v6234_v37 = vmul.f32 %v8286_v42, %v6214_v41 }
0x112b   :  { %v6242_v0 = vmul.f32 %v6543_v27, %v6231_v53  ;;  %v6243_v40 = vmul.f32 %v6543_v27, %v6232_v33  ;;  %v6244_v9 = vmul.f32 %v6543_v27, %v6233_v62  ;;  %v6245_v43 = vmul.f32 %v6543_v27, %v6234_v37 }
0x112d   :  { %v6253_v58 = vadd.f32 %v6544_v12, %v6242_v0  ;;  %v6254_v2 = vadd.f32 %v6544_v12, %v6243_v40  ;;  %v6255_v44 = vadd.f32 %v6544_v12, %v6244_v9  ;;  %v6256_v39 = vadd.f32 %v6544_v12, %v6245_v43 }
0x112f   :  { %v6257_v57 = vmax.f32 %v6253_v58, 0.0  ;;  %v6258_v35 = vmax.f32 %v6254_v2, 0.0  ;;  %v6259_v45 = vmax.f32 %v6255_v44, 0.0  ;;  %v6260_v7 = vmax.f32 %v6256_v39, 0.0 }
0x1131   :  { %6261 = vst [vmem:[%s11986_s9] sm:$0xff] %v6257_v57  ;;  %6262 = vst [vmem:[%s11986_s9 + $0x8] sm:$0xff] %v6258_v35 }
0x1132   :  { %6263 = vst [vmem:[%s11986_s9 + $0x10] sm:$0xff] %v6259_v45  ;;  %6264 = vst [vmem:[%s11986_s9 + $0x18] sm:$0xff] %v6260_v7 }

</bundles_post_ra>
